<compile_context>
chip_gen: v7x
topology: tpu7x:2x2x1
jax: 0.10.0
libtpu: 0.0.40
codegen_flags: <defaults>
</compile_context>

<pallas_src>
import jax
import jax.numpy as jnp
from jax import lax
from jax.experimental import pallas as pl
from jax.experimental.pallas import tpu as pltpu

# ---- small, module-consistent shapes -------------------------------------------------
B, S, H = 2, 8, 32          # batch, seq_len (max_len), hidden_size
NH, HD = 4, 8               # attention heads, head dim (NH * HD == H)
I = 64                      # FFN intermediate size
C = 6                       # num_classes (matches BERTClassifier default)
VOCAB = 100                 # synthetic vocab
NTYPES = 2                  # token_type (segment) vocab
NLAYERS = 2                 # tiny BERT encoder depth


# ---------------------------------------------------------------------------------------
# Fused kernel: mask gen + embedding LN + NLAYERS encoder layers + pooler + classifier
# ---------------------------------------------------------------------------------------
def _bert_fused_kernel(
    valid_ref, we_ref, se_ref, pe_ref, eg_ref, eb_ref,
    wqkv_ref, bqkv_ref, wo_ref, bo_ref, g1_ref, be1_ref,
    w1_ref, b1_ref, w2_ref, b2_ref, g2_ref, be2_ref,
    pw_ref, pb_ref, cw_ref, cb_ref,
    out_ref,
):
    def layernorm(v, g, b):
        mu = jnp.mean(v, axis=-1, keepdims=True)
        var = jnp.mean((v - mu) ** 2, axis=-1, keepdims=True)
        return (v - mu) * lax.rsqrt(var + 1e-12) * g + b

    def matmul(a, w):  # bf16 MXU matmul, f32 accumulation
        return jnp.dot(a.astype(jnp.bfloat16), w, preferred_element_type=jnp.float32)

    # --- attention bias from valid_length, computed in-kernel (0 valid, -1e9 padded) ----
    iota = lax.broadcasted_iota(jnp.int32, (B, 1, S), 2)
    bias = jnp.where(iota < valid_ref[...], 0.0, -1e9).astype(jnp.float32)   # (B, 1, S)

    # --- embeddings: word + segment + position (broadcast in-kernel) + LayerNorm --------
    x = we_ref[...] + se_ref[...] + pe_ref[...][None, :, :]                  # (B, S, H)
    x2 = layernorm(x.reshape(B * S, H), eg_ref[...], eb_ref[...])            # (B*S, H)

    scale = 1.0 / float(HD) ** 0.5

    # --- transformer encoder stack (static unroll over layers) --------------------------
    for l in range(NLAYERS):
        qkv = matmul(x2, wqkv_ref[l]) + bqkv_ref[l]                          # (B*S, 3H)
        q3 = qkv[:, 0 * H:1 * H].reshape(B, S, H)
        k3 = qkv[:, 1 * H:2 * H].reshape(B, S, H)
        v3 = qkv[:, 2 * H:3 * H].reshape(B, S, H)

        heads = []
        for hh in range(NH):                                                 # static unroll
            sl = slice(hh * HD, (hh + 1) * HD)
            s = jnp.einsum('bqd,bkd->bqk',
                           q3[:, :, sl].astype(jnp.bfloat16),
                           k3[:, :, sl].astype(jnp.bfloat16),
                           preferred_element_type=jnp.float32) * scale       # (B, S, S)
            s = s + bias                                                     # broadcast over q rows
            s = s - jnp.max(s, axis=-1, keepdims=True)
            p = jnp.exp(s)
            p = p * pl.reciprocal(jnp.sum(p, axis=-1, keepdims=True), approx=True)
            heads.append(jnp.einsum('bqk,bkd->bqd',
                                    p.astype(jnp.bfloat16),
                                    v3[:, :, sl].astype(jnp.bfloat16),
                                    preferred_element_type=jnp.float32))     # (B, S, HD)
        ctx = jnp.concatenate(heads, axis=-1).reshape(B * S, H)              # (B*S, H)

        attn = matmul(ctx, wo_ref[l]) + bo_ref[l]
        h = layernorm(x2 + attn, g1_ref[l], be1_ref[l])                      # residual + LN1

        f = matmul(h, w1_ref[l]) + b1_ref[l]                                 # FFN, GELU (tanh approx)
        f = 0.5 * f * (1.0 + jnp.tanh(0.7978845608028654 * (f + 0.044715 * f * f * f)))
        f = matmul(f, w2_ref[l]) + b2_ref[l]

        x2 = layernorm(h + f, g2_ref[l], be2_ref[l])                         # residual + LN2

    # --- pooler on [CLS] token + classifier head ----------------------------------------
    cls = x2.reshape(B, S, H)[:, 0, :]                                       # (B, H)
    pooled = jnp.tanh(matmul(cls, pw_ref[...]) + pb_ref[...])
    # TODO(synk): dr_rate dropout omitted (inference/eval mode => identity).
    out_ref[...] = matmul(pooled, cw_ref[...]) + cb_ref[...]                 # (B, C)


def _full(shape):
    nd = len(shape)
    return pl.BlockSpec(shape, lambda i, nd=nd: (0,) * nd)


def bert_classifier_forward(params, token_ids, valid_length, segment_ids):
    # Embedding-table gathers are glue outside the kernel (dynamic gather); everything else fused.
    we = jnp.take(params['word_emb'], token_ids, axis=0)        # (B, S, H)
    se = jnp.take(params['type_emb'], segment_ids, axis=0)      # (B, S, H)
    valid = valid_length.reshape(B, 1, 1).astype(jnp.int32)
    L = params['layers']

    in_specs = [
        _full((B, 1, 1)),                                       # valid_length
        _full((B, S, H)), _full((B, S, H)), _full((S, H)),      # we, se, pos_emb
        _full((1, H)), _full((1, H)),                           # emb LN gamma/beta
        _full((NLAYERS, H, 3 * H)), _full((NLAYERS, 1, 3 * H)), # fused wqkv, bqkv
        _full((NLAYERS, H, H)), _full((NLAYERS, 1, H)),         # wo, bo
        _full((NLAYERS, 1, H)), _full((NLAYERS, 1, H)),         # ln1 gamma/beta
        _full((NLAYERS, H, I)), _full((NLAYERS, 1, I)),         # w1, b1
        _full((NLAYERS, I, H)), _full((NLAYERS, 1, H)),         # w2, b2
        _full((NLAYERS, 1, H)), _full((NLAYERS, 1, H)),         # ln2 gamma/beta
        _full((H, H)), _full((1, H)),                           # pooler w, b
        _full((H, C)), _full((1, C)),                           # classifier w, b
    ]

    return pl.pallas_call(
        _bert_fused_kernel,
        out_shape=jax.ShapeDtypeStruct((B, C), jnp.float32),
        grid=(1,),
        in_specs=in_specs,
        out_specs=_full((B, C)),
        compiler_params=pltpu.CompilerParams(dimension_semantics=("arbitrary",)),
    )(valid, we, se, params['pos_emb'], params['emb_ln_g'], params['emb_ln_b'],
      L['wqkv'], L['bqkv'], L['wo'], L['bo'], L['ln1_g'], L['ln1_b'],
      L['w1'], L['b1'], L['w2'], L['b2'], L['ln2_g'], L['ln2_b'],
      params['pooler_w'], params['pooler_b'], params['cls_w'], params['cls_b'])


# ---------------------------------------------------------------------------------------
# Parameter init (deterministic, synthetic). Matmul weights stored bf16 (stacked per layer,
# Q/K/V concatenated along the output axis).
# ---------------------------------------------------------------------------------------
def init_params(key):
    keys = iter(jax.random.split(key, 32))

    def nrm(shape, dtype=jnp.float32, scale=0.02):
        w = scale * jax.random.normal(next(keys), shape, dtype=jnp.float32)
        return w.astype(dtype)

    layers = dict(
        wqkv=nrm((NLAYERS, H, 3 * H), jnp.bfloat16),
        bqkv=jnp.zeros((NLAYERS, 1, 3 * H), jnp.float32),
        wo=nrm((NLAYERS, H, H), jnp.bfloat16), bo=jnp.zeros((NLAYERS, 1, H), jnp.float32),
        ln1_g=jnp.ones((NLAYERS, 1, H), jnp.float32), ln1_b=jnp.zeros((NLAYERS, 1, H), jnp.float32),
        w1=nrm((NLAYERS, H, I), jnp.bfloat16), b1=jnp.zeros((NLAYERS, 1, I), jnp.float32),
        w2=nrm((NLAYERS, I, H), jnp.bfloat16), b2=jnp.zeros((NLAYERS, 1, H), jnp.float32),
        ln2_g=jnp.ones((NLAYERS, 1, H), jnp.float32), ln2_b=jnp.zeros((NLAYERS, 1, H), jnp.float32),
    )
    return dict(
        word_emb=nrm((VOCAB, H)),
        pos_emb=nrm((S, H)),
        type_emb=nrm((NTYPES, H)),
        emb_ln_g=jnp.ones((1, H), jnp.float32),
        emb_ln_b=jnp.zeros((1, H), jnp.float32),
        pooler_w=nrm((H, H), jnp.bfloat16),
        pooler_b=jnp.zeros((1, H), jnp.float32),
        cls_w=nrm((H, C), jnp.bfloat16),
        cls_b=jnp.zeros((1, C), jnp.float32),
        layers=layers,
    )


if __name__ == "__main__":
    key = jax.random.PRNGKey(0)
    pkey, tkey = jax.random.split(key, 2)
    params = init_params(pkey)

    token_ids = jax.random.randint(tkey, (B, S), 0, VOCAB, dtype=jnp.int32)
    valid_length = jnp.array([5, 8], dtype=jnp.int32)
    segment_ids = jnp.zeros((B, S), dtype=jnp.int32)

    fwd = jax.jit(bert_classifier_forward)
    logits = fwd(params, token_ids, valid_length, segment_ids)
    logits = jax.block_until_ready(logits)

    assert logits.shape == (B, C), logits.shape
    assert bool(jnp.all(jnp.isfinite(logits)))
    print("KERNEL_OK")
</pallas_src>

<mosaic_0001>
module attributes {stable_mosaic.version = 11 : i64} {
  func.func @_bert_fused_kernel(%arg0: i32, %arg1: memref<2x1x1xi32, #tpu.memory_space<vmem>>, %arg2: memref<2x8x32xf32, #tpu.memory_space<vmem>>, %arg3: memref<2x8x32xf32, #tpu.memory_space<vmem>>, %arg4: memref<8x32xf32, #tpu.memory_space<vmem>>, %arg5: memref<1x32xf32, #tpu.memory_space<vmem>>, %arg6: memref<1x32xf32, #tpu.memory_space<vmem>>, %arg7: memref<2x32x96xbf16, #tpu.memory_space<vmem>>, %arg8: memref<2x1x96xf32, #tpu.memory_space<vmem>>, %arg9: memref<2x32x32xbf16, #tpu.memory_space<vmem>>, %arg10: memref<2x1x32xf32, #tpu.memory_space<vmem>>, %arg11: memref<2x1x32xf32, #tpu.memory_space<vmem>>, %arg12: memref<2x1x32xf32, #tpu.memory_space<vmem>>, %arg13: memref<2x32x64xbf16, #tpu.memory_space<vmem>>, %arg14: memref<2x1x64xf32, #tpu.memory_space<vmem>>, %arg15: memref<2x64x32xbf16, #tpu.memory_space<vmem>>, %arg16: memref<2x1x32xf32, #tpu.memory_space<vmem>>, %arg17: memref<2x1x32xf32, #tpu.memory_space<vmem>>, %arg18: memref<2x1x32xf32, #tpu.memory_space<vmem>>, %arg19: memref<32x32xbf16, #tpu.memory_space<vmem>>, %arg20: memref<1x32xf32, #tpu.memory_space<vmem>>, %arg21: memref<32x6xbf16, #tpu.memory_space<vmem>>, %arg22: memref<1x6xf32, #tpu.memory_space<vmem>>, %arg23: memref<2x6xf32, #tpu.memory_space<vmem>>) attributes {dimension_semantics = [#tpu.dimension_semantics<arbitrary>], iteration_bounds = array<i64: 1>, scalar_prefetch = 0 : i64, scratch_operands = 0 : i64, tpu.core_type = #tpu.core_type<tc>, window_params = [{pipeline_mode = #tpu.pipeline_mode<synchronous>, transform_indices = @transform_0, window_bounds = array<i64: 2, 1, 1>}, {pipeline_mode = #tpu.pipeline_mode<synchronous>, transform_indices = @transform_1, window_bounds = array<i64: 2, 8, 32>}, {pipeline_mode = #tpu.pipeline_mode<synchronous>, transform_indices = @transform_2, window_bounds = array<i64: 2, 8, 32>}, {pipeline_mode = #tpu.pipeline_mode<synchronous>, transform_indices = @transform_3, window_bounds = array<i64: 8, 32>}, {pipeline_mode = #tpu.pipeline_mode<synchronous>, transform_indices = @transform_4, window_bounds = array<i64: 1, 32>}, {pipeline_mode = #tpu.pipeline_mode<synchronous>, transform_indices = @transform_5, window_bounds = array<i64: 1, 32>}, {pipeline_mode = #tpu.pipeline_mode<synchronous>, transform_indices = @transform_6, window_bounds = array<i64: 2, 32, 96>}, {pipeline_mode = #tpu.pipeline_mode<synchronous>, transform_indices = @transform_7, window_bounds = array<i64: 2, 1, 96>}, {pipeline_mode = #tpu.pipeline_mode<synchronous>, transform_indices = @transform_8, window_bounds = array<i64: 2, 32, 32>}, {pipeline_mode = #tpu.pipeline_mode<synchronous>, transform_indices = @transform_9, window_bounds = array<i64: 2, 1, 32>}, {pipeline_mode = #tpu.pipeline_mode<synchronous>, transform_indices = @transform_10, window_bounds = array<i64: 2, 1, 32>}, {pipeline_mode = #tpu.pipeline_mode<synchronous>, transform_indices = @transform_11, window_bounds = array<i64: 2, 1, 32>}, {pipeline_mode = #tpu.pipeline_mode<synchronous>, transform_indices = @transform_12, window_bounds = array<i64: 2, 32, 64>}, {pipeline_mode = #tpu.pipeline_mode<synchronous>, transform_indices = @transform_13, window_bounds = array<i64: 2, 1, 64>}, {pipeline_mode = #tpu.pipeline_mode<synchronous>, transform_indices = @transform_14, window_bounds = array<i64: 2, 64, 32>}, {pipeline_mode = #tpu.pipeline_mode<synchronous>, transform_indices = @transform_15, window_bounds = array<i64: 2, 1, 32>}, {pipeline_mode = #tpu.pipeline_mode<synchronous>, transform_indices = @transform_16, window_bounds = array<i64: 2, 1, 32>}, {pipeline_mode = #tpu.pipeline_mode<synchronous>, transform_indices = @transform_17, window_bounds = array<i64: 2, 1, 32>}, {pipeline_mode = #tpu.pipeline_mode<synchronous>, transform_indices = @transform_18, window_bounds = array<i64: 32, 32>}, {pipeline_mode = #tpu.pipeline_mode<synchronous>, transform_indices = @transform_19, window_bounds = array<i64: 1, 32>}, {pipeline_mode = #tpu.pipeline_mode<synchronous>, transform_indices = @transform_20, window_bounds = array<i64: 32, 6>}, {pipeline_mode = #tpu.pipeline_mode<synchronous>, transform_indices = @transform_21, window_bounds = array<i64: 1, 6>}, {pipeline_mode = #tpu.pipeline_mode<synchronous>, transform_indices = @transform_22, window_bounds = array<i64: 2, 6>}]} {
    %0 = tpu.iota {dimensions = array<i32: 2>} : vector<2x1x8xi32>
    %c0 = arith.constant 0 : index
    %c0_0 = arith.constant 0 : index
    %c0_1 = arith.constant 0 : index
    %1 = vector.load %arg1[%c0, %c0_0, %c0_1] : memref<2x1x1xi32, #tpu.memory_space<vmem>>, vector<2x1x1xi32>
    %2 = vector.broadcast %1 : vector<2x1x1xi32> to vector<2x1x8xi32>
    %3 = arith.cmpi slt, %0, %2 : vector<2x1x8xi32>
    %cst = arith.constant 0.000000e+00 : f32
    %cst_2 = arith.constant -1.000000e+09 : f32
    %4 = vector.broadcast %cst : f32 to vector<2x1x8xf32>
    %5 = vector.broadcast %cst_2 : f32 to vector<2x1x8xf32>
    %6 = arith.select %3, %4, %5 : vector<2x1x8xi1>, vector<2x1x8xf32>
    %c0_3 = arith.constant 0 : index
    %c0_4 = arith.constant 0 : index
    %c0_5 = arith.constant 0 : index
    %7 = vector.load %arg2[%c0_3, %c0_4, %c0_5] : memref<2x8x32xf32, #tpu.memory_space<vmem>>, vector<2x8x32xf32>
    %c0_6 = arith.constant 0 : index
    %c0_7 = arith.constant 0 : index
    %c0_8 = arith.constant 0 : index
    %8 = vector.load %arg3[%c0_6, %c0_7, %c0_8] : memref<2x8x32xf32, #tpu.memory_space<vmem>>, vector<2x8x32xf32>
    %9 = arith.addf %7, %8 : vector<2x8x32xf32>
    %c0_9 = arith.constant 0 : index
    %c0_10 = arith.constant 0 : index
    %10 = vector.load %arg4[%c0_9, %c0_10] : memref<8x32xf32, #tpu.memory_space<vmem>>, vector<8x32xf32>
    %11 = vector.shape_cast %10 : vector<8x32xf32> to vector<1x8x32xf32>
    %12 = vector.broadcast %11 : vector<1x8x32xf32> to vector<2x8x32xf32>
    %13 = arith.addf %9, %12 : vector<2x8x32xf32>
    %14 = vector.shape_cast %13 : vector<2x8x32xf32> to vector<16x32xf32>
    %c0_11 = arith.constant 0 : index
    %c0_12 = arith.constant 0 : index
    %15 = vector.load %arg5[%c0_11, %c0_12] : memref<1x32xf32, #tpu.memory_space<vmem>>, vector<1x32xf32>
    %c0_13 = arith.constant 0 : index
    %c0_14 = arith.constant 0 : index
    %16 = vector.load %arg6[%c0_13, %c0_14] : memref<1x32xf32, #tpu.memory_space<vmem>>, vector<1x32xf32>
    %cst_15 = arith.constant dense<0.000000e+00> : vector<16xf32>
    %17 = vector.multi_reduction <add>, %14, %cst_15 [1] : vector<16x32xf32> to vector<16xf32>
    %18 = vector.shape_cast %17 : vector<16xf32> to vector<16x1xf32>
    %cst_16 = arith.constant 3.200000e+01 : f32
    %19 = vector.broadcast %cst_16 : f32 to vector<16x1xf32>
    %20 = arith.divf %18, %19 : vector<16x1xf32>
    %21 = vector.broadcast %20 : vector<16x1xf32> to vector<16x32xf32>
    %22 = arith.subf %14, %21 : vector<16x32xf32>
    %23 = arith.mulf %22, %22 : vector<16x32xf32>
    %cst_17 = arith.constant dense<0.000000e+00> : vector<16xf32>
    %24 = vector.multi_reduction <add>, %23, %cst_17 [1] : vector<16x32xf32> to vector<16xf32>
    %25 = vector.shape_cast %24 : vector<16xf32> to vector<16x1xf32>
    %cst_18 = arith.constant 3.200000e+01 : f32
    %26 = vector.broadcast %cst_18 : f32 to vector<16x1xf32>
    %27 = arith.divf %25, %26 : vector<16x1xf32>
    %28 = vector.broadcast %20 : vector<16x1xf32> to vector<16x32xf32>
    %29 = arith.subf %14, %28 : vector<16x32xf32>
    %cst_19 = arith.constant 9.99999996E-13 : f32
    %30 = vector.broadcast %cst_19 : f32 to vector<16x1xf32>
    %31 = arith.addf %27, %30 : vector<16x1xf32>
    %32 = math.rsqrt %31 : vector<16x1xf32>
    %33 = vector.broadcast %32 : vector<16x1xf32> to vector<16x32xf32>
    %34 = arith.mulf %29, %33 : vector<16x32xf32>
    %35 = vector.broadcast %15 : vector<1x32xf32> to vector<16x32xf32>
    %36 = arith.mulf %34, %35 : vector<16x32xf32>
    %37 = vector.broadcast %16 : vector<1x32xf32> to vector<16x32xf32>
    %38 = arith.addf %36, %37 : vector<16x32xf32>
    %c0_20 = arith.constant 0 : index
    %c0_21 = arith.constant 0 : index
    %c0_22 = arith.constant 0 : index
    %39 = vector.load %arg7[%c0_20, %c0_21, %c0_22] : memref<2x32x96xbf16, #tpu.memory_space<vmem>>, vector<1x32x96xbf16>
    %40 = vector.shape_cast %39 : vector<1x32x96xbf16> to vector<32x96xbf16>
    %41 = arith.truncf %38 : vector<16x32xf32> to vector<16x32xbf16>
    %cst_23 = arith.constant dense<0.000000e+00> : vector<16x96xf32>
    %42 = tpu.matmul %41, %40, %cst_23 {dimension_numbers = #tpu.dot_dimension_numbers<[1], [0], [0], [1], [0, 0, 1, 1], [], []>} : vector<16x32xbf16>, vector<32x96xbf16>, vector<16x96xf32> -> vector<16x96xf32>
    %c0_24 = arith.constant 0 : index
    %c0_25 = arith.constant 0 : index
    %c0_26 = arith.constant 0 : index
    %43 = vector.load %arg8[%c0_24, %c0_25, %c0_26] : memref<2x1x96xf32, #tpu.memory_space<vmem>>, vector<1x1x96xf32>
    %44 = vector.shape_cast %43 : vector<1x1x96xf32> to vector<1x96xf32>
    %45 = vector.broadcast %44 : vector<1x96xf32> to vector<16x96xf32>
    %46 = arith.addf %42, %45 : vector<16x96xf32>
    %47 = vector.extract_strided_slice %46 {offsets = [0, 0], sizes = [16, 32], strides = [1, 1]} : vector<16x96xf32> to vector<16x32xf32>
    %48 = vector.shape_cast %47 : vector<16x32xf32> to vector<2x8x32xf32>
    %49 = vector.extract_strided_slice %46 {offsets = [0, 32], sizes = [16, 32], strides = [1, 1]} : vector<16x96xf32> to vector<16x32xf32>
    %50 = vector.shape_cast %49 : vector<16x32xf32> to vector<2x8x32xf32>
    %51 = vector.extract_strided_slice %46 {offsets = [0, 64], sizes = [16, 32], strides = [1, 1]} : vector<16x96xf32> to vector<16x32xf32>
    %52 = vector.shape_cast %51 : vector<16x32xf32> to vector<2x8x32xf32>
    %53 = vector.extract_strided_slice %48 {offsets = [0, 0, 0], sizes = [2, 8, 8], strides = [1, 1, 1]} : vector<2x8x32xf32> to vector<2x8x8xf32>
    %54 = arith.truncf %53 : vector<2x8x8xf32> to vector<2x8x8xbf16>
    %55 = vector.extract_strided_slice %50 {offsets = [0, 0, 0], sizes = [2, 8, 8], strides = [1, 1, 1]} : vector<2x8x32xf32> to vector<2x8x8xf32>
    %56 = arith.truncf %55 : vector<2x8x8xf32> to vector<2x8x8xbf16>
    "tpu.trace_start"() <{level = 10 : i32, message = "bqd,bkd->bqk"}> : () -> ()
    %cst_27 = arith.constant dense<0.000000e+00> : vector<2x8x8xf32>
    %57 = tpu.matmul %54, %56, %cst_27 {dimension_numbers = #tpu.dot_dimension_numbers<[2], [2], [1], [1], [0, 0, 0, 1, 1, 1], [0], [0]>} : vector<2x8x8xbf16>, vector<2x8x8xbf16>, vector<2x8x8xf32> -> vector<2x8x8xf32>
    "tpu.trace_stop"() : () -> ()
    %cst_28 = arith.constant 0.353553385 : f32
    %58 = vector.broadcast %cst_28 : f32 to vector<2x8x8xf32>
    %59 = arith.mulf %57, %58 : vector<2x8x8xf32>
    %60 = vector.broadcast %6 : vector<2x1x8xf32> to vector<2x8x8xf32>
    %61 = arith.addf %59, %60 : vector<2x8x8xf32>
    %cst_29 = arith.constant dense<0xFF800000> : vector<2x8xf32>
    %62 = vector.multi_reduction <maximumf>, %61, %cst_29 [2] : vector<2x8x8xf32> to vector<2x8xf32>
    %63 = vector.shape_cast %62 : vector<2x8xf32> to vector<2x8x1xf32>
    %64 = vector.broadcast %63 : vector<2x8x1xf32> to vector<2x8x8xf32>
    %65 = arith.subf %61, %64 : vector<2x8x8xf32>
    %66 = math.exp %65 : vector<2x8x8xf32>
    %cst_30 = arith.constant dense<0.000000e+00> : vector<2x8xf32>
    %67 = vector.multi_reduction <add>, %66, %cst_30 [2] : vector<2x8x8xf32> to vector<2x8xf32>
    %68 = vector.shape_cast %67 : vector<2x8xf32> to vector<2x8x1xf32>
    %69 = tpu.reciprocal %68 {approx = true} : vector<2x8x1xf32> -> vector<2x8x1xf32>
    %70 = vector.broadcast %69 : vector<2x8x1xf32> to vector<2x8x8xf32>
    %71 = arith.mulf %66, %70 : vector<2x8x8xf32>
    %72 = arith.truncf %71 : vector<2x8x8xf32> to vector<2x8x8xbf16>
    %73 = vector.extract_strided_slice %52 {offsets = [0, 0, 0], sizes = [2, 8, 8], strides = [1, 1, 1]} : vector<2x8x32xf32> to vector<2x8x8xf32>
    %74 = arith.truncf %73 : vector<2x8x8xf32> to vector<2x8x8xbf16>
    "tpu.trace_start"() <{level = 10 : i32, message = "bqk,bkd->bqd"}> : () -> ()
    %cst_31 = arith.constant dense<0.000000e+00> : vector<2x8x8xf32>
    %75 = tpu.matmul %72, %74, %cst_31 {dimension_numbers = #tpu.dot_dimension_numbers<[2], [1], [1], [2], [0, 0, 0, 1, 1, 2], [0], [0]>} : vector<2x8x8xbf16>, vector<2x8x8xbf16>, vector<2x8x8xf32> -> vector<2x8x8xf32>
    "tpu.trace_stop"() : () -> ()
    %76 = vector.extract_strided_slice %48 {offsets = [0, 0, 8], sizes = [2, 8, 8], strides = [1, 1, 1]} : vector<2x8x32xf32> to vector<2x8x8xf32>
    %77 = arith.truncf %76 : vector<2x8x8xf32> to vector<2x8x8xbf16>
    %78 = vector.extract_strided_slice %50 {offsets = [0, 0, 8], sizes = [2, 8, 8], strides = [1, 1, 1]} : vector<2x8x32xf32> to vector<2x8x8xf32>
    %79 = arith.truncf %78 : vector<2x8x8xf32> to vector<2x8x8xbf16>
    "tpu.trace_start"() <{level = 10 : i32, message = "bqd,bkd->bqk"}> : () -> ()
    %cst_32 = arith.constant dense<0.000000e+00> : vector<2x8x8xf32>
    %80 = tpu.matmul %77, %79, %cst_32 {dimension_numbers = #tpu.dot_dimension_numbers<[2], [2], [1], [1], [0, 0, 0, 1, 1, 1], [0], [0]>} : vector<2x8x8xbf16>, vector<2x8x8xbf16>, vector<2x8x8xf32> -> vector<2x8x8xf32>
    "tpu.trace_stop"() : () -> ()
    %cst_33 = arith.constant 0.353553385 : f32
    %81 = vector.broadcast %cst_33 : f32 to vector<2x8x8xf32>
    %82 = arith.mulf %80, %81 : vector<2x8x8xf32>
    %83 = vector.broadcast %6 : vector<2x1x8xf32> to vector<2x8x8xf32>
    %84 = arith.addf %82, %83 : vector<2x8x8xf32>
    %cst_34 = arith.constant dense<0xFF800000> : vector<2x8xf32>
    %85 = vector.multi_reduction <maximumf>, %84, %cst_34 [2] : vector<2x8x8xf32> to vector<2x8xf32>
    %86 = vector.shape_cast %85 : vector<2x8xf32> to vector<2x8x1xf32>
    %87 = vector.broadcast %86 : vector<2x8x1xf32> to vector<2x8x8xf32>
    %88 = arith.subf %84, %87 : vector<2x8x8xf32>
    %89 = math.exp %88 : vector<2x8x8xf32>
    %cst_35 = arith.constant dense<0.000000e+00> : vector<2x8xf32>
    %90 = vector.multi_reduction <add>, %89, %cst_35 [2] : vector<2x8x8xf32> to vector<2x8xf32>
    %91 = vector.shape_cast %90 : vector<2x8xf32> to vector<2x8x1xf32>
    %92 = tpu.reciprocal %91 {approx = true} : vector<2x8x1xf32> -> vector<2x8x1xf32>
    %93 = vector.broadcast %92 : vector<2x8x1xf32> to vector<2x8x8xf32>
    %94 = arith.mulf %89, %93 : vector<2x8x8xf32>
    %95 = arith.truncf %94 : vector<2x8x8xf32> to vector<2x8x8xbf16>
    %96 = vector.extract_strided_slice %52 {offsets = [0, 0, 8], sizes = [2, 8, 8], strides = [1, 1, 1]} : vector<2x8x32xf32> to vector<2x8x8xf32>
    %97 = arith.truncf %96 : vector<2x8x8xf32> to vector<2x8x8xbf16>
    "tpu.trace_start"() <{level = 10 : i32, message = "bqk,bkd->bqd"}> : () -> ()
    %cst_36 = arith.constant dense<0.000000e+00> : vector<2x8x8xf32>
    %98 = tpu.matmul %95, %97, %cst_36 {dimension_numbers = #tpu.dot_dimension_numbers<[2], [1], [1], [2], [0, 0, 0, 1, 1, 2], [0], [0]>} : vector<2x8x8xbf16>, vector<2x8x8xbf16>, vector<2x8x8xf32> -> vector<2x8x8xf32>
    "tpu.trace_stop"() : () -> ()
    %99 = vector.extract_strided_slice %48 {offsets = [0, 0, 16], sizes = [2, 8, 8], strides = [1, 1, 1]} : vector<2x8x32xf32> to vector<2x8x8xf32>
    %100 = arith.truncf %99 : vector<2x8x8xf32> to vector<2x8x8xbf16>
    %101 = vector.extract_strided_slice %50 {offsets = [0, 0, 16], sizes = [2, 8, 8], strides = [1, 1, 1]} : vector<2x8x32xf32> to vector<2x8x8xf32>
    %102 = arith.truncf %101 : vector<2x8x8xf32> to vector<2x8x8xbf16>
    "tpu.trace_start"() <{level = 10 : i32, message = "bqd,bkd->bqk"}> : () -> ()
    %cst_37 = arith.constant dense<0.000000e+00> : vector<2x8x8xf32>
    %103 = tpu.matmul %100, %102, %cst_37 {dimension_numbers = #tpu.dot_dimension_numbers<[2], [2], [1], [1], [0, 0, 0, 1, 1, 1], [0], [0]>} : vector<2x8x8xbf16>, vector<2x8x8xbf16>, vector<2x8x8xf32> -> vector<2x8x8xf32>
    "tpu.trace_stop"() : () -> ()
    %cst_38 = arith.constant 0.353553385 : f32
    %104 = vector.broadcast %cst_38 : f32 to vector<2x8x8xf32>
    %105 = arith.mulf %103, %104 : vector<2x8x8xf32>
    %106 = vector.broadcast %6 : vector<2x1x8xf32> to vector<2x8x8xf32>
    %107 = arith.addf %105, %106 : vector<2x8x8xf32>
    %cst_39 = arith.constant dense<0xFF800000> : vector<2x8xf32>
    %108 = vector.multi_reduction <maximumf>, %107, %cst_39 [2] : vector<2x8x8xf32> to vector<2x8xf32>
    %109 = vector.shape_cast %108 : vector<2x8xf32> to vector<2x8x1xf32>
    %110 = vector.broadcast %109 : vector<2x8x1xf32> to vector<2x8x8xf32>
    %111 = arith.subf %107, %110 : vector<2x8x8xf32>
    %112 = math.exp %111 : vector<2x8x8xf32>
    %cst_40 = arith.constant dense<0.000000e+00> : vector<2x8xf32>
    %113 = vector.multi_reduction <add>, %112, %cst_40 [2] : vector<2x8x8xf32> to vector<2x8xf32>
    %114 = vector.shape_cast %113 : vector<2x8xf32> to vector<2x8x1xf32>
    %115 = tpu.reciprocal %114 {approx = true} : vector<2x8x1xf32> -> vector<2x8x1xf32>
    %116 = vector.broadcast %115 : vector<2x8x1xf32> to vector<2x8x8xf32>
    %117 = arith.mulf %112, %116 : vector<2x8x8xf32>
    %118 = arith.truncf %117 : vector<2x8x8xf32> to vector<2x8x8xbf16>
    %119 = vector.extract_strided_slice %52 {offsets = [0, 0, 16], sizes = [2, 8, 8], strides = [1, 1, 1]} : vector<2x8x32xf32> to vector<2x8x8xf32>
    %120 = arith.truncf %119 : vector<2x8x8xf32> to vector<2x8x8xbf16>
    "tpu.trace_start"() <{level = 10 : i32, message = "bqk,bkd->bqd"}> : () -> ()
    %cst_41 = arith.constant dense<0.000000e+00> : vector<2x8x8xf32>
    %121 = tpu.matmul %118, %120, %cst_41 {dimension_numbers = #tpu.dot_dimension_numbers<[2], [1], [1], [2], [0, 0, 0, 1, 1, 2], [0], [0]>} : vector<2x8x8xbf16>, vector<2x8x8xbf16>, vector<2x8x8xf32> -> vector<2x8x8xf32>
    "tpu.trace_stop"() : () -> ()
    %122 = vector.extract_strided_slice %48 {offsets = [0, 0, 24], sizes = [2, 8, 8], strides = [1, 1, 1]} : vector<2x8x32xf32> to vector<2x8x8xf32>
    %123 = arith.truncf %122 : vector<2x8x8xf32> to vector<2x8x8xbf16>
    %124 = vector.extract_strided_slice %50 {offsets = [0, 0, 24], sizes = [2, 8, 8], strides = [1, 1, 1]} : vector<2x8x32xf32> to vector<2x8x8xf32>
    %125 = arith.truncf %124 : vector<2x8x8xf32> to vector<2x8x8xbf16>
    "tpu.trace_start"() <{level = 10 : i32, message = "bqd,bkd->bqk"}> : () -> ()
    %cst_42 = arith.constant dense<0.000000e+00> : vector<2x8x8xf32>
    %126 = tpu.matmul %123, %125, %cst_42 {dimension_numbers = #tpu.dot_dimension_numbers<[2], [2], [1], [1], [0, 0, 0, 1, 1, 1], [0], [0]>} : vector<2x8x8xbf16>, vector<2x8x8xbf16>, vector<2x8x8xf32> -> vector<2x8x8xf32>
    "tpu.trace_stop"() : () -> ()
    %cst_43 = arith.constant 0.353553385 : f32
    %127 = vector.broadcast %cst_43 : f32 to vector<2x8x8xf32>
    %128 = arith.mulf %126, %127 : vector<2x8x8xf32>
    %129 = vector.broadcast %6 : vector<2x1x8xf32> to vector<2x8x8xf32>
    %130 = arith.addf %128, %129 : vector<2x8x8xf32>
    %cst_44 = arith.constant dense<0xFF800000> : vector<2x8xf32>
    %131 = vector.multi_reduction <maximumf>, %130, %cst_44 [2] : vector<2x8x8xf32> to vector<2x8xf32>
    %132 = vector.shape_cast %131 : vector<2x8xf32> to vector<2x8x1xf32>
    %133 = vector.broadcast %132 : vector<2x8x1xf32> to vector<2x8x8xf32>
    %134 = arith.subf %130, %133 : vector<2x8x8xf32>
    %135 = math.exp %134 : vector<2x8x8xf32>
    %cst_45 = arith.constant dense<0.000000e+00> : vector<2x8xf32>
    %136 = vector.multi_reduction <add>, %135, %cst_45 [2] : vector<2x8x8xf32> to vector<2x8xf32>
    %137 = vector.shape_cast %136 : vector<2x8xf32> to vector<2x8x1xf32>
    %138 = tpu.reciprocal %137 {approx = true} : vector<2x8x1xf32> -> vector<2x8x1xf32>
    %139 = vector.broadcast %138 : vector<2x8x1xf32> to vector<2x8x8xf32>
    %140 = arith.mulf %135, %139 : vector<2x8x8xf32>
    %141 = arith.truncf %140 : vector<2x8x8xf32> to vector<2x8x8xbf16>
    %142 = vector.extract_strided_slice %52 {offsets = [0, 0, 24], sizes = [2, 8, 8], strides = [1, 1, 1]} : vector<2x8x32xf32> to vector<2x8x8xf32>
    %143 = arith.truncf %142 : vector<2x8x8xf32> to vector<2x8x8xbf16>
    "tpu.trace_start"() <{level = 10 : i32, message = "bqk,bkd->bqd"}> : () -> ()
    %cst_46 = arith.constant dense<0.000000e+00> : vector<2x8x8xf32>
    %144 = tpu.matmul %141, %143, %cst_46 {dimension_numbers = #tpu.dot_dimension_numbers<[2], [1], [1], [2], [0, 0, 0, 1, 1, 2], [0], [0]>} : vector<2x8x8xbf16>, vector<2x8x8xbf16>, vector<2x8x8xf32> -> vector<2x8x8xf32>
    "tpu.trace_stop"() : () -> ()
    %145 = tpu.concatenate %75, %98, %121, %144 in 2 : vector<2x8x8xf32>, vector<2x8x8xf32>, vector<2x8x8xf32>, vector<2x8x8xf32> -> vector<2x8x32xf32>
    %146 = vector.shape_cast %145 : vector<2x8x32xf32> to vector<16x32xf32>
    %c0_47 = arith.constant 0 : index
    %c0_48 = arith.constant 0 : index
    %c0_49 = arith.constant 0 : index
    %147 = vector.load %arg9[%c0_47, %c0_48, %c0_49] : memref<2x32x32xbf16, #tpu.memory_space<vmem>>, vector<1x32x32xbf16>
    %148 = vector.shape_cast %147 : vector<1x32x32xbf16> to vector<32x32xbf16>
    %149 = arith.truncf %146 : vector<16x32xf32> to vector<16x32xbf16>
    %cst_50 = arith.constant dense<0.000000e+00> : vector<16x32xf32>
    %150 = tpu.matmul %149, %148, %cst_50 {dimension_numbers = #tpu.dot_dimension_numbers<[1], [0], [0], [1], [0, 0, 1, 1], [], []>} : vector<16x32xbf16>, vector<32x32xbf16>, vector<16x32xf32> -> vector<16x32xf32>
    %c0_51 = arith.constant 0 : index
    %c0_52 = arith.constant 0 : index
    %c0_53 = arith.constant 0 : index
    %151 = vector.load %arg10[%c0_51, %c0_52, %c0_53] : memref<2x1x32xf32, #tpu.memory_space<vmem>>, vector<1x1x32xf32>
    %152 = vector.shape_cast %151 : vector<1x1x32xf32> to vector<1x32xf32>
    %153 = vector.broadcast %152 : vector<1x32xf32> to vector<16x32xf32>
    %154 = arith.addf %150, %153 : vector<16x32xf32>
    %155 = arith.addf %38, %154 : vector<16x32xf32>
    %c0_54 = arith.constant 0 : index
    %c0_55 = arith.constant 0 : index
    %c0_56 = arith.constant 0 : index
    %156 = vector.load %arg11[%c0_54, %c0_55, %c0_56] : memref<2x1x32xf32, #tpu.memory_space<vmem>>, vector<1x1x32xf32>
    %157 = vector.shape_cast %156 : vector<1x1x32xf32> to vector<1x32xf32>
    %c0_57 = arith.constant 0 : index
    %c0_58 = arith.constant 0 : index
    %c0_59 = arith.constant 0 : index
    %158 = vector.load %arg12[%c0_57, %c0_58, %c0_59] : memref<2x1x32xf32, #tpu.memory_space<vmem>>, vector<1x1x32xf32>
    %159 = vector.shape_cast %158 : vector<1x1x32xf32> to vector<1x32xf32>
    %cst_60 = arith.constant dense<0.000000e+00> : vector<16xf32>
    %160 = vector.multi_reduction <add>, %155, %cst_60 [1] : vector<16x32xf32> to vector<16xf32>
    %161 = vector.shape_cast %160 : vector<16xf32> to vector<16x1xf32>
    %cst_61 = arith.constant 3.200000e+01 : f32
    %162 = vector.broadcast %cst_61 : f32 to vector<16x1xf32>
    %163 = arith.divf %161, %162 : vector<16x1xf32>
    %164 = vector.broadcast %163 : vector<16x1xf32> to vector<16x32xf32>
    %165 = arith.subf %155, %164 : vector<16x32xf32>
    %166 = arith.mulf %165, %165 : vector<16x32xf32>
    %cst_62 = arith.constant dense<0.000000e+00> : vector<16xf32>
    %167 = vector.multi_reduction <add>, %166, %cst_62 [1] : vector<16x32xf32> to vector<16xf32>
    %168 = vector.shape_cast %167 : vector<16xf32> to vector<16x1xf32>
    %cst_63 = arith.constant 3.200000e+01 : f32
    %169 = vector.broadcast %cst_63 : f32 to vector<16x1xf32>
    %170 = arith.divf %168, %169 : vector<16x1xf32>
    %171 = vector.broadcast %163 : vector<16x1xf32> to vector<16x32xf32>
    %172 = arith.subf %155, %171 : vector<16x32xf32>
    %cst_64 = arith.constant 9.99999996E-13 : f32
    %173 = vector.broadcast %cst_64 : f32 to vector<16x1xf32>
    %174 = arith.addf %170, %173 : vector<16x1xf32>
    %175 = math.rsqrt %174 : vector<16x1xf32>
    %176 = vector.broadcast %175 : vector<16x1xf32> to vector<16x32xf32>
    %177 = arith.mulf %172, %176 : vector<16x32xf32>
    %178 = vector.broadcast %157 : vector<1x32xf32> to vector<16x32xf32>
    %179 = arith.mulf %177, %178 : vector<16x32xf32>
    %180 = vector.broadcast %159 : vector<1x32xf32> to vector<16x32xf32>
    %181 = arith.addf %179, %180 : vector<16x32xf32>
    %c0_65 = arith.constant 0 : index
    %c0_66 = arith.constant 0 : index
    %c0_67 = arith.constant 0 : index
    %182 = vector.load %arg13[%c0_65, %c0_66, %c0_67] : memref<2x32x64xbf16, #tpu.memory_space<vmem>>, vector<1x32x64xbf16>
    %183 = vector.shape_cast %182 : vector<1x32x64xbf16> to vector<32x64xbf16>
    %184 = arith.truncf %181 : vector<16x32xf32> to vector<16x32xbf16>
    %cst_68 = arith.constant dense<0.000000e+00> : vector<16x64xf32>
    %185 = tpu.matmul %184, %183, %cst_68 {dimension_numbers = #tpu.dot_dimension_numbers<[1], [0], [0], [1], [0, 0, 1, 1], [], []>} : vector<16x32xbf16>, vector<32x64xbf16>, vector<16x64xf32> -> vector<16x64xf32>
    %c0_69 = arith.constant 0 : index
    %c0_70 = arith.constant 0 : index
    %c0_71 = arith.constant 0 : index
    %186 = vector.load %arg14[%c0_69, %c0_70, %c0_71] : memref<2x1x64xf32, #tpu.memory_space<vmem>>, vector<1x1x64xf32>
    %187 = vector.shape_cast %186 : vector<1x1x64xf32> to vector<1x64xf32>
    %188 = vector.broadcast %187 : vector<1x64xf32> to vector<16x64xf32>
    %189 = arith.addf %185, %188 : vector<16x64xf32>
    %cst_72 = arith.constant 5.000000e-01 : f32
    %190 = vector.broadcast %cst_72 : f32 to vector<16x64xf32>
    %191 = arith.mulf %190, %189 : vector<16x64xf32>
    %cst_73 = arith.constant 4.471500e-02 : f32
    %192 = vector.broadcast %cst_73 : f32 to vector<16x64xf32>
    %193 = arith.mulf %192, %189 : vector<16x64xf32>
    %194 = arith.mulf %193, %189 : vector<16x64xf32>
    %195 = arith.mulf %194, %189 : vector<16x64xf32>
    %196 = arith.addf %189, %195 : vector<16x64xf32>
    %cst_74 = arith.constant 0.797884583 : f32
    %197 = vector.broadcast %cst_74 : f32 to vector<16x64xf32>
    %198 = arith.mulf %197, %196 : vector<16x64xf32>
    %199 = math.tanh %198 : vector<16x64xf32>
    %cst_75 = arith.constant 1.000000e+00 : f32
    %200 = vector.broadcast %cst_75 : f32 to vector<16x64xf32>
    %201 = arith.addf %200, %199 : vector<16x64xf32>
    %202 = arith.mulf %191, %201 : vector<16x64xf32>
    %c0_76 = arith.constant 0 : index
    %c0_77 = arith.constant 0 : index
    %c0_78 = arith.constant 0 : index
    %203 = vector.load %arg15[%c0_76, %c0_77, %c0_78] : memref<2x64x32xbf16, #tpu.memory_space<vmem>>, vector<1x64x32xbf16>
    %204 = vector.shape_cast %203 : vector<1x64x32xbf16> to vector<64x32xbf16>
    %205 = arith.truncf %202 : vector<16x64xf32> to vector<16x64xbf16>
    %cst_79 = arith.constant dense<0.000000e+00> : vector<16x32xf32>
    %206 = tpu.matmul %205, %204, %cst_79 {dimension_numbers = #tpu.dot_dimension_numbers<[1], [0], [0], [1], [0, 0, 1, 1], [], []>} : vector<16x64xbf16>, vector<64x32xbf16>, vector<16x32xf32> -> vector<16x32xf32>
    %c0_80 = arith.constant 0 : index
    %c0_81 = arith.constant 0 : index
    %c0_82 = arith.constant 0 : index
    %207 = vector.load %arg16[%c0_80, %c0_81, %c0_82] : memref<2x1x32xf32, #tpu.memory_space<vmem>>, vector<1x1x32xf32>
    %208 = vector.shape_cast %207 : vector<1x1x32xf32> to vector<1x32xf32>
    %209 = vector.broadcast %208 : vector<1x32xf32> to vector<16x32xf32>
    %210 = arith.addf %206, %209 : vector<16x32xf32>
    %211 = arith.addf %181, %210 : vector<16x32xf32>
    %c0_83 = arith.constant 0 : index
    %c0_84 = arith.constant 0 : index
    %c0_85 = arith.constant 0 : index
    %212 = vector.load %arg17[%c0_83, %c0_84, %c0_85] : memref<2x1x32xf32, #tpu.memory_space<vmem>>, vector<1x1x32xf32>
    %213 = vector.shape_cast %212 : vector<1x1x32xf32> to vector<1x32xf32>
    %c0_86 = arith.constant 0 : index
    %c0_87 = arith.constant 0 : index
    %c0_88 = arith.constant 0 : index
    %214 = vector.load %arg18[%c0_86, %c0_87, %c0_88] : memref<2x1x32xf32, #tpu.memory_space<vmem>>, vector<1x1x32xf32>
    %215 = vector.shape_cast %214 : vector<1x1x32xf32> to vector<1x32xf32>
    %cst_89 = arith.constant dense<0.000000e+00> : vector<16xf32>
    %216 = vector.multi_reduction <add>, %211, %cst_89 [1] : vector<16x32xf32> to vector<16xf32>
    %217 = vector.shape_cast %216 : vector<16xf32> to vector<16x1xf32>
    %cst_90 = arith.constant 3.200000e+01 : f32
    %218 = vector.broadcast %cst_90 : f32 to vector<16x1xf32>
    %219 = arith.divf %217, %218 : vector<16x1xf32>
    %220 = vector.broadcast %219 : vector<16x1xf32> to vector<16x32xf32>
    %221 = arith.subf %211, %220 : vector<16x32xf32>
    %222 = arith.mulf %221, %221 : vector<16x32xf32>
    %cst_91 = arith.constant dense<0.000000e+00> : vector<16xf32>
    %223 = vector.multi_reduction <add>, %222, %cst_91 [1] : vector<16x32xf32> to vector<16xf32>
    %224 = vector.shape_cast %223 : vector<16xf32> to vector<16x1xf32>
    %cst_92 = arith.constant 3.200000e+01 : f32
    %225 = vector.broadcast %cst_92 : f32 to vector<16x1xf32>
    %226 = arith.divf %224, %225 : vector<16x1xf32>
    %227 = vector.broadcast %219 : vector<16x1xf32> to vector<16x32xf32>
    %228 = arith.subf %211, %227 : vector<16x32xf32>
    %cst_93 = arith.constant 9.99999996E-13 : f32
    %229 = vector.broadcast %cst_93 : f32 to vector<16x1xf32>
    %230 = arith.addf %226, %229 : vector<16x1xf32>
    %231 = math.rsqrt %230 : vector<16x1xf32>
    %232 = vector.broadcast %231 : vector<16x1xf32> to vector<16x32xf32>
    %233 = arith.mulf %228, %232 : vector<16x32xf32>
    %234 = vector.broadcast %213 : vector<1x32xf32> to vector<16x32xf32>
    %235 = arith.mulf %233, %234 : vector<16x32xf32>
    %236 = vector.broadcast %215 : vector<1x32xf32> to vector<16x32xf32>
    %237 = arith.addf %235, %236 : vector<16x32xf32>
    %c1 = arith.constant 1 : index
    %c0_94 = arith.constant 0 : index
    %c0_95 = arith.constant 0 : index
    %238 = vector.load %arg7[%c1, %c0_94, %c0_95] : memref<2x32x96xbf16, #tpu.memory_space<vmem>>, vector<1x32x96xbf16>
    %239 = vector.shape_cast %238 : vector<1x32x96xbf16> to vector<32x96xbf16>
    %240 = arith.truncf %237 : vector<16x32xf32> to vector<16x32xbf16>
    %cst_96 = arith.constant dense<0.000000e+00> : vector<16x96xf32>
    %241 = tpu.matmul %240, %239, %cst_96 {dimension_numbers = #tpu.dot_dimension_numbers<[1], [0], [0], [1], [0, 0, 1, 1], [], []>} : vector<16x32xbf16>, vector<32x96xbf16>, vector<16x96xf32> -> vector<16x96xf32>
    %c1_97 = arith.constant 1 : index
    %c0_98 = arith.constant 0 : index
    %c0_99 = arith.constant 0 : index
    %242 = vector.load %arg8[%c1_97, %c0_98, %c0_99] : memref<2x1x96xf32, #tpu.memory_space<vmem>>, vector<1x1x96xf32>
    %243 = vector.shape_cast %242 : vector<1x1x96xf32> to vector<1x96xf32>
    %244 = vector.broadcast %243 : vector<1x96xf32> to vector<16x96xf32>
    %245 = arith.addf %241, %244 : vector<16x96xf32>
    %246 = vector.extract_strided_slice %245 {offsets = [0, 0], sizes = [16, 32], strides = [1, 1]} : vector<16x96xf32> to vector<16x32xf32>
    %247 = vector.shape_cast %246 : vector<16x32xf32> to vector<2x8x32xf32>
    %248 = vector.extract_strided_slice %245 {offsets = [0, 32], sizes = [16, 32], strides = [1, 1]} : vector<16x96xf32> to vector<16x32xf32>
    %249 = vector.shape_cast %248 : vector<16x32xf32> to vector<2x8x32xf32>
    %250 = vector.extract_strided_slice %245 {offsets = [0, 64], sizes = [16, 32], strides = [1, 1]} : vector<16x96xf32> to vector<16x32xf32>
    %251 = vector.shape_cast %250 : vector<16x32xf32> to vector<2x8x32xf32>
    %252 = vector.extract_strided_slice %247 {offsets = [0, 0, 0], sizes = [2, 8, 8], strides = [1, 1, 1]} : vector<2x8x32xf32> to vector<2x8x8xf32>
    %253 = arith.truncf %252 : vector<2x8x8xf32> to vector<2x8x8xbf16>
    %254 = vector.extract_strided_slice %249 {offsets = [0, 0, 0], sizes = [2, 8, 8], strides = [1, 1, 1]} : vector<2x8x32xf32> to vector<2x8x8xf32>
    %255 = arith.truncf %254 : vector<2x8x8xf32> to vector<2x8x8xbf16>
    "tpu.trace_start"() <{level = 10 : i32, message = "bqd,bkd->bqk"}> : () -> ()
    %cst_100 = arith.constant dense<0.000000e+00> : vector<2x8x8xf32>
    %256 = tpu.matmul %253, %255, %cst_100 {dimension_numbers = #tpu.dot_dimension_numbers<[2], [2], [1], [1], [0, 0, 0, 1, 1, 1], [0], [0]>} : vector<2x8x8xbf16>, vector<2x8x8xbf16>, vector<2x8x8xf32> -> vector<2x8x8xf32>
    "tpu.trace_stop"() : () -> ()
    %cst_101 = arith.constant 0.353553385 : f32
    %257 = vector.broadcast %cst_101 : f32 to vector<2x8x8xf32>
    %258 = arith.mulf %256, %257 : vector<2x8x8xf32>
    %259 = vector.broadcast %6 : vector<2x1x8xf32> to vector<2x8x8xf32>
    %260 = arith.addf %258, %259 : vector<2x8x8xf32>
    %cst_102 = arith.constant dense<0xFF800000> : vector<2x8xf32>
    %261 = vector.multi_reduction <maximumf>, %260, %cst_102 [2] : vector<2x8x8xf32> to vector<2x8xf32>
    %262 = vector.shape_cast %261 : vector<2x8xf32> to vector<2x8x1xf32>
    %263 = vector.broadcast %262 : vector<2x8x1xf32> to vector<2x8x8xf32>
    %264 = arith.subf %260, %263 : vector<2x8x8xf32>
    %265 = math.exp %264 : vector<2x8x8xf32>
    %cst_103 = arith.constant dense<0.000000e+00> : vector<2x8xf32>
    %266 = vector.multi_reduction <add>, %265, %cst_103 [2] : vector<2x8x8xf32> to vector<2x8xf32>
    %267 = vector.shape_cast %266 : vector<2x8xf32> to vector<2x8x1xf32>
    %268 = tpu.reciprocal %267 {approx = true} : vector<2x8x1xf32> -> vector<2x8x1xf32>
    %269 = vector.broadcast %268 : vector<2x8x1xf32> to vector<2x8x8xf32>
    %270 = arith.mulf %265, %269 : vector<2x8x8xf32>
    %271 = arith.truncf %270 : vector<2x8x8xf32> to vector<2x8x8xbf16>
    %272 = vector.extract_strided_slice %251 {offsets = [0, 0, 0], sizes = [2, 8, 8], strides = [1, 1, 1]} : vector<2x8x32xf32> to vector<2x8x8xf32>
    %273 = arith.truncf %272 : vector<2x8x8xf32> to vector<2x8x8xbf16>
    "tpu.trace_start"() <{level = 10 : i32, message = "bqk,bkd->bqd"}> : () -> ()
    %cst_104 = arith.constant dense<0.000000e+00> : vector<2x8x8xf32>
    %274 = tpu.matmul %271, %273, %cst_104 {dimension_numbers = #tpu.dot_dimension_numbers<[2], [1], [1], [2], [0, 0, 0, 1, 1, 2], [0], [0]>} : vector<2x8x8xbf16>, vector<2x8x8xbf16>, vector<2x8x8xf32> -> vector<2x8x8xf32>
    "tpu.trace_stop"() : () -> ()
    %275 = vector.extract_strided_slice %247 {offsets = [0, 0, 8], sizes = [2, 8, 8], strides = [1, 1, 1]} : vector<2x8x32xf32> to vector<2x8x8xf32>
    %276 = arith.truncf %275 : vector<2x8x8xf32> to vector<2x8x8xbf16>
    %277 = vector.extract_strided_slice %249 {offsets = [0, 0, 8], sizes = [2, 8, 8], strides = [1, 1, 1]} : vector<2x8x32xf32> to vector<2x8x8xf32>
    %278 = arith.truncf %277 : vector<2x8x8xf32> to vector<2x8x8xbf16>
    "tpu.trace_start"() <{level = 10 : i32, message = "bqd,bkd->bqk"}> : () -> ()
    %cst_105 = arith.constant dense<0.000000e+00> : vector<2x8x8xf32>
    %279 = tpu.matmul %276, %278, %cst_105 {dimension_numbers = #tpu.dot_dimension_numbers<[2], [2], [1], [1], [0, 0, 0, 1, 1, 1], [0], [0]>} : vector<2x8x8xbf16>, vector<2x8x8xbf16>, vector<2x8x8xf32> -> vector<2x8x8xf32>
    "tpu.trace_stop"() : () -> ()
    %cst_106 = arith.constant 0.353553385 : f32
    %280 = vector.broadcast %cst_106 : f32 to vector<2x8x8xf32>
    %281 = arith.mulf %279, %280 : vector<2x8x8xf32>
    %282 = vector.broadcast %6 : vector<2x1x8xf32> to vector<2x8x8xf32>
    %283 = arith.addf %281, %282 : vector<2x8x8xf32>
    %cst_107 = arith.constant dense<0xFF800000> : vector<2x8xf32>
    %284 = vector.multi_reduction <maximumf>, %283, %cst_107 [2] : vector<2x8x8xf32> to vector<2x8xf32>
    %285 = vector.shape_cast %284 : vector<2x8xf32> to vector<2x8x1xf32>
    %286 = vector.broadcast %285 : vector<2x8x1xf32> to vector<2x8x8xf32>
    %287 = arith.subf %283, %286 : vector<2x8x8xf32>
    %288 = math.exp %287 : vector<2x8x8xf32>
    %cst_108 = arith.constant dense<0.000000e+00> : vector<2x8xf32>
    %289 = vector.multi_reduction <add>, %288, %cst_108 [2] : vector<2x8x8xf32> to vector<2x8xf32>
    %290 = vector.shape_cast %289 : vector<2x8xf32> to vector<2x8x1xf32>
    %291 = tpu.reciprocal %290 {approx = true} : vector<2x8x1xf32> -> vector<2x8x1xf32>
    %292 = vector.broadcast %291 : vector<2x8x1xf32> to vector<2x8x8xf32>
    %293 = arith.mulf %288, %292 : vector<2x8x8xf32>
    %294 = arith.truncf %293 : vector<2x8x8xf32> to vector<2x8x8xbf16>
    %295 = vector.extract_strided_slice %251 {offsets = [0, 0, 8], sizes = [2, 8, 8], strides = [1, 1, 1]} : vector<2x8x32xf32> to vector<2x8x8xf32>
    %296 = arith.truncf %295 : vector<2x8x8xf32> to vector<2x8x8xbf16>
    "tpu.trace_start"() <{level = 10 : i32, message = "bqk,bkd->bqd"}> : () -> ()
    %cst_109 = arith.constant dense<0.000000e+00> : vector<2x8x8xf32>
    %297 = tpu.matmul %294, %296, %cst_109 {dimension_numbers = #tpu.dot_dimension_numbers<[2], [1], [1], [2], [0, 0, 0, 1, 1, 2], [0], [0]>} : vector<2x8x8xbf16>, vector<2x8x8xbf16>, vector<2x8x8xf32> -> vector<2x8x8xf32>
    "tpu.trace_stop"() : () -> ()
    %298 = vector.extract_strided_slice %247 {offsets = [0, 0, 16], sizes = [2, 8, 8], strides = [1, 1, 1]} : vector<2x8x32xf32> to vector<2x8x8xf32>
    %299 = arith.truncf %298 : vector<2x8x8xf32> to vector<2x8x8xbf16>
    %300 = vector.extract_strided_slice %249 {offsets = [0, 0, 16], sizes = [2, 8, 8], strides = [1, 1, 1]} : vector<2x8x32xf32> to vector<2x8x8xf32>
    %301 = arith.truncf %300 : vector<2x8x8xf32> to vector<2x8x8xbf16>
    "tpu.trace_start"() <{level = 10 : i32, message = "bqd,bkd->bqk"}> : () -> ()
    %cst_110 = arith.constant dense<0.000000e+00> : vector<2x8x8xf32>
    %302 = tpu.matmul %299, %301, %cst_110 {dimension_numbers = #tpu.dot_dimension_numbers<[2], [2], [1], [1], [0, 0, 0, 1, 1, 1], [0], [0]>} : vector<2x8x8xbf16>, vector<2x8x8xbf16>, vector<2x8x8xf32> -> vector<2x8x8xf32>
    "tpu.trace_stop"() : () -> ()
    %cst_111 = arith.constant 0.353553385 : f32
    %303 = vector.broadcast %cst_111 : f32 to vector<2x8x8xf32>
    %304 = arith.mulf %302, %303 : vector<2x8x8xf32>
    %305 = vector.broadcast %6 : vector<2x1x8xf32> to vector<2x8x8xf32>
    %306 = arith.addf %304, %305 : vector<2x8x8xf32>
    %cst_112 = arith.constant dense<0xFF800000> : vector<2x8xf32>
    %307 = vector.multi_reduction <maximumf>, %306, %cst_112 [2] : vector<2x8x8xf32> to vector<2x8xf32>
    %308 = vector.shape_cast %307 : vector<2x8xf32> to vector<2x8x1xf32>
    %309 = vector.broadcast %308 : vector<2x8x1xf32> to vector<2x8x8xf32>
    %310 = arith.subf %306, %309 : vector<2x8x8xf32>
    %311 = math.exp %310 : vector<2x8x8xf32>
    %cst_113 = arith.constant dense<0.000000e+00> : vector<2x8xf32>
    %312 = vector.multi_reduction <add>, %311, %cst_113 [2] : vector<2x8x8xf32> to vector<2x8xf32>
    %313 = vector.shape_cast %312 : vector<2x8xf32> to vector<2x8x1xf32>
    %314 = tpu.reciprocal %313 {approx = true} : vector<2x8x1xf32> -> vector<2x8x1xf32>
    %315 = vector.broadcast %314 : vector<2x8x1xf32> to vector<2x8x8xf32>
    %316 = arith.mulf %311, %315 : vector<2x8x8xf32>
    %317 = arith.truncf %316 : vector<2x8x8xf32> to vector<2x8x8xbf16>
    %318 = vector.extract_strided_slice %251 {offsets = [0, 0, 16], sizes = [2, 8, 8], strides = [1, 1, 1]} : vector<2x8x32xf32> to vector<2x8x8xf32>
    %319 = arith.truncf %318 : vector<2x8x8xf32> to vector<2x8x8xbf16>
    "tpu.trace_start"() <{level = 10 : i32, message = "bqk,bkd->bqd"}> : () -> ()
    %cst_114 = arith.constant dense<0.000000e+00> : vector<2x8x8xf32>
    %320 = tpu.matmul %317, %319, %cst_114 {dimension_numbers = #tpu.dot_dimension_numbers<[2], [1], [1], [2], [0, 0, 0, 1, 1, 2], [0], [0]>} : vector<2x8x8xbf16>, vector<2x8x8xbf16>, vector<2x8x8xf32> -> vector<2x8x8xf32>
    "tpu.trace_stop"() : () -> ()
    %321 = vector.extract_strided_slice %247 {offsets = [0, 0, 24], sizes = [2, 8, 8], strides = [1, 1, 1]} : vector<2x8x32xf32> to vector<2x8x8xf32>
    %322 = arith.truncf %321 : vector<2x8x8xf32> to vector<2x8x8xbf16>
    %323 = vector.extract_strided_slice %249 {offsets = [0, 0, 24], sizes = [2, 8, 8], strides = [1, 1, 1]} : vector<2x8x32xf32> to vector<2x8x8xf32>
    %324 = arith.truncf %323 : vector<2x8x8xf32> to vector<2x8x8xbf16>
    "tpu.trace_start"() <{level = 10 : i32, message = "bqd,bkd->bqk"}> : () -> ()
    %cst_115 = arith.constant dense<0.000000e+00> : vector<2x8x8xf32>
    %325 = tpu.matmul %322, %324, %cst_115 {dimension_numbers = #tpu.dot_dimension_numbers<[2], [2], [1], [1], [0, 0, 0, 1, 1, 1], [0], [0]>} : vector<2x8x8xbf16>, vector<2x8x8xbf16>, vector<2x8x8xf32> -> vector<2x8x8xf32>
    "tpu.trace_stop"() : () -> ()
    %cst_116 = arith.constant 0.353553385 : f32
    %326 = vector.broadcast %cst_116 : f32 to vector<2x8x8xf32>
    %327 = arith.mulf %325, %326 : vector<2x8x8xf32>
    %328 = vector.broadcast %6 : vector<2x1x8xf32> to vector<2x8x8xf32>
    %329 = arith.addf %327, %328 : vector<2x8x8xf32>
    %cst_117 = arith.constant dense<0xFF800000> : vector<2x8xf32>
    %330 = vector.multi_reduction <maximumf>, %329, %cst_117 [2] : vector<2x8x8xf32> to vector<2x8xf32>
    %331 = vector.shape_cast %330 : vector<2x8xf32> to vector<2x8x1xf32>
    %332 = vector.broadcast %331 : vector<2x8x1xf32> to vector<2x8x8xf32>
    %333 = arith.subf %329, %332 : vector<2x8x8xf32>
    %334 = math.exp %333 : vector<2x8x8xf32>
    %cst_118 = arith.constant dense<0.000000e+00> : vector<2x8xf32>
    %335 = vector.multi_reduction <add>, %334, %cst_118 [2] : vector<2x8x8xf32> to vector<2x8xf32>
    %336 = vector.shape_cast %335 : vector<2x8xf32> to vector<2x8x1xf32>
    %337 = tpu.reciprocal %336 {approx = true} : vector<2x8x1xf32> -> vector<2x8x1xf32>
    %338 = vector.broadcast %337 : vector<2x8x1xf32> to vector<2x8x8xf32>
    %339 = arith.mulf %334, %338 : vector<2x8x8xf32>
    %340 = arith.truncf %339 : vector<2x8x8xf32> to vector<2x8x8xbf16>
    %341 = vector.extract_strided_slice %251 {offsets = [0, 0, 24], sizes = [2, 8, 8], strides = [1, 1, 1]} : vector<2x8x32xf32> to vector<2x8x8xf32>
    %342 = arith.truncf %341 : vector<2x8x8xf32> to vector<2x8x8xbf16>
    "tpu.trace_start"() <{level = 10 : i32, message = "bqk,bkd->bqd"}> : () -> ()
    %cst_119 = arith.constant dense<0.000000e+00> : vector<2x8x8xf32>
    %343 = tpu.matmul %340, %342, %cst_119 {dimension_numbers = #tpu.dot_dimension_numbers<[2], [1], [1], [2], [0, 0, 0, 1, 1, 2], [0], [0]>} : vector<2x8x8xbf16>, vector<2x8x8xbf16>, vector<2x8x8xf32> -> vector<2x8x8xf32>
    "tpu.trace_stop"() : () -> ()
    %344 = tpu.concatenate %274, %297, %320, %343 in 2 : vector<2x8x8xf32>, vector<2x8x8xf32>, vector<2x8x8xf32>, vector<2x8x8xf32> -> vector<2x8x32xf32>
    %345 = vector.shape_cast %344 : vector<2x8x32xf32> to vector<16x32xf32>
    %c1_120 = arith.constant 1 : index
    %c0_121 = arith.constant 0 : index
    %c0_122 = arith.constant 0 : index
    %346 = vector.load %arg9[%c1_120, %c0_121, %c0_122] : memref<2x32x32xbf16, #tpu.memory_space<vmem>>, vector<1x32x32xbf16>
    %347 = vector.shape_cast %346 : vector<1x32x32xbf16> to vector<32x32xbf16>
    %348 = arith.truncf %345 : vector<16x32xf32> to vector<16x32xbf16>
    %cst_123 = arith.constant dense<0.000000e+00> : vector<16x32xf32>
    %349 = tpu.matmul %348, %347, %cst_123 {dimension_numbers = #tpu.dot_dimension_numbers<[1], [0], [0], [1], [0, 0, 1, 1], [], []>} : vector<16x32xbf16>, vector<32x32xbf16>, vector<16x32xf32> -> vector<16x32xf32>
    %c1_124 = arith.constant 1 : index
    %c0_125 = arith.constant 0 : index
    %c0_126 = arith.constant 0 : index
    %350 = vector.load %arg10[%c1_124, %c0_125, %c0_126] : memref<2x1x32xf32, #tpu.memory_space<vmem>>, vector<1x1x32xf32>
    %351 = vector.shape_cast %350 : vector<1x1x32xf32> to vector<1x32xf32>
    %352 = vector.broadcast %351 : vector<1x32xf32> to vector<16x32xf32>
    %353 = arith.addf %349, %352 : vector<16x32xf32>
    %354 = arith.addf %237, %353 : vector<16x32xf32>
    %c1_127 = arith.constant 1 : index
    %c0_128 = arith.constant 0 : index
    %c0_129 = arith.constant 0 : index
    %355 = vector.load %arg11[%c1_127, %c0_128, %c0_129] : memref<2x1x32xf32, #tpu.memory_space<vmem>>, vector<1x1x32xf32>
    %356 = vector.shape_cast %355 : vector<1x1x32xf32> to vector<1x32xf32>
    %c1_130 = arith.constant 1 : index
    %c0_131 = arith.constant 0 : index
    %c0_132 = arith.constant 0 : index
    %357 = vector.load %arg12[%c1_130, %c0_131, %c0_132] : memref<2x1x32xf32, #tpu.memory_space<vmem>>, vector<1x1x32xf32>
    %358 = vector.shape_cast %357 : vector<1x1x32xf32> to vector<1x32xf32>
    %cst_133 = arith.constant dense<0.000000e+00> : vector<16xf32>
    %359 = vector.multi_reduction <add>, %354, %cst_133 [1] : vector<16x32xf32> to vector<16xf32>
    %360 = vector.shape_cast %359 : vector<16xf32> to vector<16x1xf32>
    %cst_134 = arith.constant 3.200000e+01 : f32
    %361 = vector.broadcast %cst_134 : f32 to vector<16x1xf32>
    %362 = arith.divf %360, %361 : vector<16x1xf32>
    %363 = vector.broadcast %362 : vector<16x1xf32> to vector<16x32xf32>
    %364 = arith.subf %354, %363 : vector<16x32xf32>
    %365 = arith.mulf %364, %364 : vector<16x32xf32>
    %cst_135 = arith.constant dense<0.000000e+00> : vector<16xf32>
    %366 = vector.multi_reduction <add>, %365, %cst_135 [1] : vector<16x32xf32> to vector<16xf32>
    %367 = vector.shape_cast %366 : vector<16xf32> to vector<16x1xf32>
    %cst_136 = arith.constant 3.200000e+01 : f32
    %368 = vector.broadcast %cst_136 : f32 to vector<16x1xf32>
    %369 = arith.divf %367, %368 : vector<16x1xf32>
    %370 = vector.broadcast %362 : vector<16x1xf32> to vector<16x32xf32>
    %371 = arith.subf %354, %370 : vector<16x32xf32>
    %cst_137 = arith.constant 9.99999996E-13 : f32
    %372 = vector.broadcast %cst_137 : f32 to vector<16x1xf32>
    %373 = arith.addf %369, %372 : vector<16x1xf32>
    %374 = math.rsqrt %373 : vector<16x1xf32>
    %375 = vector.broadcast %374 : vector<16x1xf32> to vector<16x32xf32>
    %376 = arith.mulf %371, %375 : vector<16x32xf32>
    %377 = vector.broadcast %356 : vector<1x32xf32> to vector<16x32xf32>
    %378 = arith.mulf %376, %377 : vector<16x32xf32>
    %379 = vector.broadcast %358 : vector<1x32xf32> to vector<16x32xf32>
    %380 = arith.addf %378, %379 : vector<16x32xf32>
    %c1_138 = arith.constant 1 : index
    %c0_139 = arith.constant 0 : index
    %c0_140 = arith.constant 0 : index
    %381 = vector.load %arg13[%c1_138, %c0_139, %c0_140] : memref<2x32x64xbf16, #tpu.memory_space<vmem>>, vector<1x32x64xbf16>
    %382 = vector.shape_cast %381 : vector<1x32x64xbf16> to vector<32x64xbf16>
    %383 = arith.truncf %380 : vector<16x32xf32> to vector<16x32xbf16>
    %cst_141 = arith.constant dense<0.000000e+00> : vector<16x64xf32>
    %384 = tpu.matmul %383, %382, %cst_141 {dimension_numbers = #tpu.dot_dimension_numbers<[1], [0], [0], [1], [0, 0, 1, 1], [], []>} : vector<16x32xbf16>, vector<32x64xbf16>, vector<16x64xf32> -> vector<16x64xf32>
    %c1_142 = arith.constant 1 : index
    %c0_143 = arith.constant 0 : index
    %c0_144 = arith.constant 0 : index
    %385 = vector.load %arg14[%c1_142, %c0_143, %c0_144] : memref<2x1x64xf32, #tpu.memory_space<vmem>>, vector<1x1x64xf32>
    %386 = vector.shape_cast %385 : vector<1x1x64xf32> to vector<1x64xf32>
    %387 = vector.broadcast %386 : vector<1x64xf32> to vector<16x64xf32>
    %388 = arith.addf %384, %387 : vector<16x64xf32>
    %cst_145 = arith.constant 5.000000e-01 : f32
    %389 = vector.broadcast %cst_145 : f32 to vector<16x64xf32>
    %390 = arith.mulf %389, %388 : vector<16x64xf32>
    %cst_146 = arith.constant 4.471500e-02 : f32
    %391 = vector.broadcast %cst_146 : f32 to vector<16x64xf32>
    %392 = arith.mulf %391, %388 : vector<16x64xf32>
    %393 = arith.mulf %392, %388 : vector<16x64xf32>
    %394 = arith.mulf %393, %388 : vector<16x64xf32>
    %395 = arith.addf %388, %394 : vector<16x64xf32>
    %cst_147 = arith.constant 0.797884583 : f32
    %396 = vector.broadcast %cst_147 : f32 to vector<16x64xf32>
    %397 = arith.mulf %396, %395 : vector<16x64xf32>
    %398 = math.tanh %397 : vector<16x64xf32>
    %cst_148 = arith.constant 1.000000e+00 : f32
    %399 = vector.broadcast %cst_148 : f32 to vector<16x64xf32>
    %400 = arith.addf %399, %398 : vector<16x64xf32>
    %401 = arith.mulf %390, %400 : vector<16x64xf32>
    %c1_149 = arith.constant 1 : index
    %c0_150 = arith.constant 0 : index
    %c0_151 = arith.constant 0 : index
    %402 = vector.load %arg15[%c1_149, %c0_150, %c0_151] : memref<2x64x32xbf16, #tpu.memory_space<vmem>>, vector<1x64x32xbf16>
    %403 = vector.shape_cast %402 : vector<1x64x32xbf16> to vector<64x32xbf16>
    %404 = arith.truncf %401 : vector<16x64xf32> to vector<16x64xbf16>
    %cst_152 = arith.constant dense<0.000000e+00> : vector<16x32xf32>
    %405 = tpu.matmul %404, %403, %cst_152 {dimension_numbers = #tpu.dot_dimension_numbers<[1], [0], [0], [1], [0, 0, 1, 1], [], []>} : vector<16x64xbf16>, vector<64x32xbf16>, vector<16x32xf32> -> vector<16x32xf32>
    %c1_153 = arith.constant 1 : index
    %c0_154 = arith.constant 0 : index
    %c0_155 = arith.constant 0 : index
    %406 = vector.load %arg16[%c1_153, %c0_154, %c0_155] : memref<2x1x32xf32, #tpu.memory_space<vmem>>, vector<1x1x32xf32>
    %407 = vector.shape_cast %406 : vector<1x1x32xf32> to vector<1x32xf32>
    %408 = vector.broadcast %407 : vector<1x32xf32> to vector<16x32xf32>
    %409 = arith.addf %405, %408 : vector<16x32xf32>
    %410 = arith.addf %380, %409 : vector<16x32xf32>
    %c1_156 = arith.constant 1 : index
    %c0_157 = arith.constant 0 : index
    %c0_158 = arith.constant 0 : index
    %411 = vector.load %arg17[%c1_156, %c0_157, %c0_158] : memref<2x1x32xf32, #tpu.memory_space<vmem>>, vector<1x1x32xf32>
    %412 = vector.shape_cast %411 : vector<1x1x32xf32> to vector<1x32xf32>
    %c1_159 = arith.constant 1 : index
    %c0_160 = arith.constant 0 : index
    %c0_161 = arith.constant 0 : index
    %413 = vector.load %arg18[%c1_159, %c0_160, %c0_161] : memref<2x1x32xf32, #tpu.memory_space<vmem>>, vector<1x1x32xf32>
    %414 = vector.shape_cast %413 : vector<1x1x32xf32> to vector<1x32xf32>
    %cst_162 = arith.constant dense<0.000000e+00> : vector<16xf32>
    %415 = vector.multi_reduction <add>, %410, %cst_162 [1] : vector<16x32xf32> to vector<16xf32>
    %416 = vector.shape_cast %415 : vector<16xf32> to vector<16x1xf32>
    %cst_163 = arith.constant 3.200000e+01 : f32
    %417 = vector.broadcast %cst_163 : f32 to vector<16x1xf32>
    %418 = arith.divf %416, %417 : vector<16x1xf32>
    %419 = vector.broadcast %418 : vector<16x1xf32> to vector<16x32xf32>
    %420 = arith.subf %410, %419 : vector<16x32xf32>
    %421 = arith.mulf %420, %420 : vector<16x32xf32>
    %cst_164 = arith.constant dense<0.000000e+00> : vector<16xf32>
    %422 = vector.multi_reduction <add>, %421, %cst_164 [1] : vector<16x32xf32> to vector<16xf32>
    %423 = vector.shape_cast %422 : vector<16xf32> to vector<16x1xf32>
    %cst_165 = arith.constant 3.200000e+01 : f32
    %424 = vector.broadcast %cst_165 : f32 to vector<16x1xf32>
    %425 = arith.divf %423, %424 : vector<16x1xf32>
    %426 = vector.broadcast %418 : vector<16x1xf32> to vector<16x32xf32>
    %427 = arith.subf %410, %426 : vector<16x32xf32>
    %cst_166 = arith.constant 9.99999996E-13 : f32
    %428 = vector.broadcast %cst_166 : f32 to vector<16x1xf32>
    %429 = arith.addf %425, %428 : vector<16x1xf32>
    %430 = math.rsqrt %429 : vector<16x1xf32>
    %431 = vector.broadcast %430 : vector<16x1xf32> to vector<16x32xf32>
    %432 = arith.mulf %427, %431 : vector<16x32xf32>
    %433 = vector.broadcast %412 : vector<1x32xf32> to vector<16x32xf32>
    %434 = arith.mulf %432, %433 : vector<16x32xf32>
    %435 = vector.broadcast %414 : vector<1x32xf32> to vector<16x32xf32>
    %436 = arith.addf %434, %435 : vector<16x32xf32>
    %437 = vector.shape_cast %436 : vector<16x32xf32> to vector<2x8x32xf32>
    %438 = vector.extract_strided_slice %437 {offsets = [0, 0, 0], sizes = [2, 1, 32], strides = [1, 1, 1]} : vector<2x8x32xf32> to vector<2x1x32xf32>
    %439 = vector.shape_cast %438 : vector<2x1x32xf32> to vector<2x32xf32>
    %c0_167 = arith.constant 0 : index
    %c0_168 = arith.constant 0 : index
    %440 = vector.load %arg19[%c0_167, %c0_168] : memref<32x32xbf16, #tpu.memory_space<vmem>>, vector<32x32xbf16>
    %441 = arith.truncf %439 : vector<2x32xf32> to vector<2x32xbf16>
    %cst_169 = arith.constant dense<0.000000e+00> : vector<2x32xf32>
    %442 = tpu.matmul %441, %440, %cst_169 {dimension_numbers = #tpu.dot_dimension_numbers<[1], [0], [0], [1], [0, 0, 1, 1], [], []>} : vector<2x32xbf16>, vector<32x32xbf16>, vector<2x32xf32> -> vector<2x32xf32>
    %c0_170 = arith.constant 0 : index
    %c0_171 = arith.constant 0 : index
    %443 = vector.load %arg20[%c0_170, %c0_171] : memref<1x32xf32, #tpu.memory_space<vmem>>, vector<1x32xf32>
    %444 = vector.broadcast %443 : vector<1x32xf32> to vector<2x32xf32>
    %445 = arith.addf %442, %444 : vector<2x32xf32>
    %446 = math.tanh %445 : vector<2x32xf32>
    %c0_172 = arith.constant 0 : index
    %c0_173 = arith.constant 0 : index
    %447 = vector.load %arg21[%c0_172, %c0_173] : memref<32x6xbf16, #tpu.memory_space<vmem>>, vector<32x6xbf16>
    %448 = arith.truncf %446 : vector<2x32xf32> to vector<2x32xbf16>
    %cst_174 = arith.constant dense<0.000000e+00> : vector<2x6xf32>
    %449 = tpu.matmul %448, %447, %cst_174 {dimension_numbers = #tpu.dot_dimension_numbers<[1], [0], [0], [1], [0, 0, 1, 1], [], []>} : vector<2x32xbf16>, vector<32x6xbf16>, vector<2x6xf32> -> vector<2x6xf32>
    %c0_175 = arith.constant 0 : index
    %c0_176 = arith.constant 0 : index
    %450 = vector.load %arg22[%c0_175, %c0_176] : memref<1x6xf32, #tpu.memory_space<vmem>>, vector<1x6xf32>
    %451 = vector.broadcast %450 : vector<1x6xf32> to vector<2x6xf32>
    %452 = arith.addf %449, %451 : vector<2x6xf32>
    %c0_177 = arith.constant 0 : index
    %c0_178 = arith.constant 0 : index
    %453 = vector.load %arg23[%c0_177, %c0_178] : memref<2x6xf32, #tpu.memory_space<vmem>>, vector<2x6xf32>
    tpu.vector_store %arg23[%c0_177, %c0_178], %452 {strides = array<i32>} : memref<2x6xf32, #tpu.memory_space<vmem>>, vector<2x6xf32>,
    return
  }
  func.func @transform_0(%arg0: i32) -> (i32, i32, i32) {
    %c0_i32 = arith.constant 0 : i32
    %c0_i32_0 = arith.constant 0 : i32
    %c0_i32_1 = arith.constant 0 : i32
    %c0_i32_2 = arith.constant 0 : i32
    return %c0_i32, %c0_i32_0, %c0_i32_1 : i32, i32, i32
  }
  func.func @transform_1(%arg0: i32) -> (i32, i32, i32) {
    %c0_i32 = arith.constant 0 : i32
    %c0_i32_0 = arith.constant 0 : i32
    %c0_i32_1 = arith.constant 0 : i32
    %c0_i32_2 = arith.constant 0 : i32
    return %c0_i32, %c0_i32_0, %c0_i32_1 : i32, i32, i32
  }
  func.func @transform_2(%arg0: i32) -> (i32, i32, i32) {
    %c0_i32 = arith.constant 0 : i32
    %c0_i32_0 = arith.constant 0 : i32
    %c0_i32_1 = arith.constant 0 : i32
    %c0_i32_2 = arith.constant 0 : i32
    return %c0_i32, %c0_i32_0, %c0_i32_1 : i32, i32, i32
  }
  func.func @transform_3(%arg0: i32) -> (i32, i32) {
    %c0_i32 = arith.constant 0 : i32
    %c0_i32_0 = arith.constant 0 : i32
    %c0_i32_1 = arith.constant 0 : i32
    return %c0_i32, %c0_i32_0 : i32, i32
  }
  func.func @transform_4(%arg0: i32) -> (i32, i32) {
    %c0_i32 = arith.constant 0 : i32
    %c0_i32_0 = arith.constant 0 : i32
    %c0_i32_1 = arith.constant 0 : i32
    return %c0_i32, %c0_i32_0 : i32, i32
  }
  func.func @transform_5(%arg0: i32) -> (i32, i32) {
    %c0_i32 = arith.constant 0 : i32
    %c0_i32_0 = arith.constant 0 : i32
    %c0_i32_1 = arith.constant 0 : i32
    return %c0_i32, %c0_i32_0 : i32, i32
  }
  func.func @transform_6(%arg0: i32) -> (i32, i32, i32) {
    %c0_i32 = arith.constant 0 : i32
    %c0_i32_0 = arith.constant 0 : i32
    %c0_i32_1 = arith.constant 0 : i32
    %c0_i32_2 = arith.constant 0 : i32
    return %c0_i32, %c0_i32_0, %c0_i32_1 : i32, i32, i32
  }
  func.func @transform_7(%arg0: i32) -> (i32, i32, i32) {
    %c0_i32 = arith.constant 0 : i32
    %c0_i32_0 = arith.constant 0 : i32
    %c0_i32_1 = arith.constant 0 : i32
    %c0_i32_2 = arith.constant 0 : i32
    return %c0_i32, %c0_i32_0, %c0_i32_1 : i32, i32, i32
  }
  func.func @transform_8(%arg0: i32) -> (i32, i32, i32) {
    %c0_i32 = arith.constant 0 : i32
    %c0_i32_0 = arith.constant 0 : i32
    %c0_i32_1 = arith.constant 0 : i32
    %c0_i32_2 = arith.constant 0 : i32
    return %c0_i32, %c0_i32_0, %c0_i32_1 : i32, i32, i32
  }
  func.func @transform_9(%arg0: i32) -> (i32, i32, i32) {
    %c0_i32 = arith.constant 0 : i32
    %c0_i32_0 = arith.constant 0 : i32
    %c0_i32_1 = arith.constant 0 : i32
    %c0_i32_2 = arith.constant 0 : i32
    return %c0_i32, %c0_i32_0, %c0_i32_1 : i32, i32, i32
  }
  func.func @transform_10(%arg0: i32) -> (i32, i32, i32) {
    %c0_i32 = arith.constant 0 : i32
    %c0_i32_0 = arith.constant 0 : i32
    %c0_i32_1 = arith.constant 0 : i32
    %c0_i32_2 = arith.constant 0 : i32
    return %c0_i32, %c0_i32_0, %c0_i32_1 : i32, i32, i32
  }
  func.func @transform_11(%arg0: i32) -> (i32, i32, i32) {
    %c0_i32 = arith.constant 0 : i32
    %c0_i32_0 = arith.constant 0 : i32
    %c0_i32_1 = arith.constant 0 : i32
    %c0_i32_2 = arith.constant 0 : i32
    return %c0_i32, %c0_i32_0, %c0_i32_1 : i32, i32, i32
  }
  func.func @transform_12(%arg0: i32) -> (i32, i32, i32) {
    %c0_i32 = arith.constant 0 : i32
    %c0_i32_0 = arith.constant 0 : i32
    %c0_i32_1 = arith.constant 0 : i32
    %c0_i32_2 = arith.constant 0 : i32
    return %c0_i32, %c0_i32_0, %c0_i32_1 : i32, i32, i32
  }
  func.func @transform_13(%arg0: i32) -> (i32, i32, i32) {
    %c0_i32 = arith.constant 0 : i32
    %c0_i32_0 = arith.constant 0 : i32
    %c0_i32_1 = arith.constant 0 : i32
    %c0_i32_2 = arith.constant 0 : i32
    return %c0_i32, %c0_i32_0, %c0_i32_1 : i32, i32, i32
  }
  func.func @transform_14(%arg0: i32) -> (i32, i32, i32) {
    %c0_i32 = arith.constant 0 : i32
    %c0_i32_0 = arith.constant 0 : i32
    %c0_i32_1 = arith.constant 0 : i32
    %c0_i32_2 = arith.constant 0 : i32
    return %c0_i32, %c0_i32_0, %c0_i32_1 : i32, i32, i32
  }
  func.func @transform_15(%arg0: i32) -> (i32, i32, i32) {
    %c0_i32 = arith.constant 0 : i32
    %c0_i32_0 = arith.constant 0 : i32
    %c0_i32_1 = arith.constant 0 : i32
    %c0_i32_2 = arith.constant 0 : i32
    return %c0_i32, %c0_i32_0, %c0_i32_1 : i32, i32, i32
  }
  func.func @transform_16(%arg0: i32) -> (i32, i32, i32) {
    %c0_i32 = arith.constant 0 : i32
    %c0_i32_0 = arith.constant 0 : i32
    %c0_i32_1 = arith.constant 0 : i32
    %c0_i32_2 = arith.constant 0 : i32
    return %c0_i32, %c0_i32_0, %c0_i32_1 : i32, i32, i32
  }
  func.func @transform_17(%arg0: i32) -> (i32, i32, i32) {
    %c0_i32 = arith.constant 0 : i32
    %c0_i32_0 = arith.constant 0 : i32
    %c0_i32_1 = arith.constant 0 : i32
    %c0_i32_2 = arith.constant 0 : i32
    return %c0_i32, %c0_i32_0, %c0_i32_1 : i32, i32, i32
  }
  func.func @transform_18(%arg0: i32) -> (i32, i32) {
    %c0_i32 = arith.constant 0 : i32
    %c0_i32_0 = arith.constant 0 : i32
    %c0_i32_1 = arith.constant 0 : i32
    return %c0_i32, %c0_i32_0 : i32, i32
  }
  func.func @transform_19(%arg0: i32) -> (i32, i32) {
    %c0_i32 = arith.constant 0 : i32
    %c0_i32_0 = arith.constant 0 : i32
    %c0_i32_1 = arith.constant 0 : i32
    return %c0_i32, %c0_i32_0 : i32, i32
  }
  func.func @transform_20(%arg0: i32) -> (i32, i32) {
    %c0_i32 = arith.constant 0 : i32
    %c0_i32_0 = arith.constant 0 : i32
    %c0_i32_1 = arith.constant 0 : i32
    return %c0_i32, %c0_i32_0 : i32, i32
  }
  func.func @transform_21(%arg0: i32) -> (i32, i32) {
    %c0_i32 = arith.constant 0 : i32
    %c0_i32_0 = arith.constant 0 : i32
    %c0_i32_1 = arith.constant 0 : i32
    return %c0_i32, %c0_i32_0 : i32, i32
  }
  func.func @transform_22(%arg0: i32) -> (i32, i32) {
    %c0_i32 = arith.constant 0 : i32
    %c0_i32_0 = arith.constant 0 : i32
    %c0_i32_1 = arith.constant 0 : i32
    return %c0_i32, %c0_i32_0 : i32, i32
  }
}

</mosaic_0001>

<bundles_post_ra>
// kernel: bert_classifier_forward.1
= control target key start
LH: loop header
LB: loop body
LE: loop exit
PB: predicated region body
PF: predicated region fallthrough
CT: control target
= control target key end

     0   :  { %s4409_s0 = inlined_call_operand.vmem [shape: s32[2,1,1], index: 0, kind: input, shape index: {}]   ;;  %s4410_s1 = inlined_call_operand.vmem [shape: f32[2,8,32], index: 1, kind: input, shape index: {}]   ;;  %s4411_s2 = inlined_call_operand.vmem [shape: f32[2,8,32], index: 2, kind: input, shape index: {}]   ;;  %s4412_s3 = inlined_call_operand.vmem [shape: f32[8,32], index: 3, kind: input, shape index: {}]   ;;  %s4413_s4 = inlined_call_operand.vmem [shape: f32[1,32], index: 4, kind: input, shape index: {}]   ;;  %s4414_s5 = inlined_call_operand.vmem [shape: f32[1,32], index: 5, kind: input, shape index: {}]   ;;  %s4415_s6 = inlined_call_operand.vmem [shape: bf16[2,32,96], index: 6, kind: input, shape index: {}]   ;;  %s4416_s7 = inlined_call_operand.vmem [shape: f32[2,1,96], index: 7, kind: input, shape index: {}]   ;;  %s4417_s8 = inlined_call_operand.vmem [shape: bf16[2,32,32], index: 8, kind: input, shape index: {}]   ;;  %s4418_s9 = inlined_call_operand.vmem [shape: f32[2,1,32], index: 9, kind: input, shape index: {}]   ;;  %s4419_s10 = inlined_call_operand.vmem [shape: f32[2,1,32], index: 10, kind: input, shape index: {}]   ;;  %s4420_s11 = inlined_call_operand.vmem [shape: f32[2,1,32], index: 11, kind: input, shape index: {}]   ;;  %s4421_s12 = inlined_call_operand.vmem [shape: bf16[2,32,64], index: 12, kind: input, shape index: {}]   ;;  %s4422_s13 = inlined_call_operand.vmem [shape: f32[2,1,64], index: 13, kind: input, shape index: {}]   ;;  %s4423_s14 = inlined_call_operand.vmem [shape: bf16[2,64,32], index: 14, kind: input, shape index: {}]   ;;  %s4424_s15 = inlined_call_operand.vmem [shape: f32[2,1,32], index: 15, kind: input, shape index: {}]   ;;  %s4425_s16 = inlined_call_operand.vmem [shape: f32[2,1,32], index: 16, kind: input, shape index: {}]   ;;  %s4426_s17 = inlined_call_operand.vmem [shape: f32[2,1,32], index: 17, kind: input, shape index: {}]   ;;  %s4427_s18 = inlined_call_operand.vmem [shape: bf16[32,32], index: 18, kind: input, shape index: {}]   ;;  %s4428_s19 = inlined_call_operand.vmem [shape: f32[1,32], index: 19, kind: input, shape index: {}]   ;;  %s4429_s20 = inlined_call_operand.vmem [shape: bf16[32,6], index: 20, kind: input, shape index: {}]   ;;  %s4430_s21 = inlined_call_operand.vmem [shape: f32[1,6], index: 21, kind: input, shape index: {}]   ;;  %s4431_s22 = inlined_call_operand.hbm [shape: f32[2,6], index: 22, kind: output, shape index: {}]  }
   0x1   :  { %4448 = sst [smem:[#allocation5_spill]] %s4409_s0 }
   0x2   :  { %4449 = sst [smem:[#allocation6_spill]] %s4410_s1 }
   0x3   :  { %4450 = sst [smem:[#allocation7_spill]] %s4411_s2 }
   0x4   :  { %4451 = sst [smem:[#allocation8_spill]] %s4412_s3 }
   0x5   :  { %4452 = sst [smem:[#allocation9_spill]] %s4413_s4 }
   0x6   :  { %4453 = sst [smem:[#allocation10_spill]] %s4414_s5 }
   0x7   :  { %4454 = sst [smem:[#allocation11_spill]] %s4415_s6 }
   0x8   :  { %4455 = sst [smem:[#allocation12_spill]] %s4426_s17 }
   0x9   :  { %s4456_s29 = sld [smem:[#allocation6_spill]]  ;;  %s4457_s17 = sld [smem:[#allocation7_spill]]  ;;  %vm106_vm0 = vcmask 261120  }
   0xa   :  { %s4458_s1 = sld [smem:[#allocation8_spill]] }
   0xf   :  { %v95_v0 = vld [vmem:[%s4456_s29] sm:$0xff]  ;;  %v96_v4 = vld [vmem:[%s4456_s29 + $0x8] sm:$0xff] }
  0x10   :  { %v97_v1 = vld [vmem:[%s4457_s17] sm:$0xff]  ;;  %v98_v5 = vld [vmem:[%s4457_s17 + $0x8] sm:$0xff] }
  0x11   :  { %v101_v2 = vld [vmem:[%s4458_s1] sm:$0xff]  ;;  %v99_v3 = vadd.f32 %v97_v1, %v95_v0  ;;  %v100_v6 = vadd.f32 %v98_v5, %v96_v4 }
  0x13   :  { %v102_v7 = vadd.f32 %v101_v2, %v99_v3  ;;  %v103_v8 = vadd.f32 %v101_v2, %v100_v6 }
  0x15   :  { %v107_v9 = vsel %vm106_vm0, %v102_v7, 0.0  ;;  %v110_v10 = vsel %vm106_vm0, %v103_v8, 0.0 }
  0x16   :  { %108 = vadd.xlane.f32.xlu0 %v107_v9 }
  0x1a   :  { %111 = vadd.xlane.f32.xlu0 %v110_v10 }
  0x1b   :  { %27 = vsyncpa [#allocation3], 0  ;;  %s4459_s2 = sld [smem:[#allocation11_spill]]  ;;  %v3660_v22 = vmov 0.0   ;;  %vm3661_vm1 = vmmov 0   ;;  %s4460_s30 = sld [smem:[#allocation9_spill]]  ;;  %v73_v57 = vlaneseq }
  0x1c   :  { %3187 = vmatprep.subr.bf16.mxu0 %v3660_v22  ;;  %3191 = vmatprep.mubr.msk.bf16.mxu0 %vm3661_vm1, %v3660_v22  ;;  %s4461_s23 = sld [smem:[#allocation10_spill]]  ;;  %v2977_v41 = vld [vmem:[%s4416_s7] ss:$0 sm:$0xff]  ;;  %v3662_v49 = vmov 0   ;;  %s3663_s24 = smov 96   ;;  %vm223_vm2 = vcmask 64512  }
  0x1d   :  { %3195 = vmatprep.subr.bf16.mxu1 %v3660_v22  ;;  %3197 = vmatprep.mubr.msk.bf16.mxu1 %vm3661_vm1, %v3660_v22  ;;  %s4462_s17 = sld [smem:[#allocation5_spill]]  ;;  %v81_v58 = vshrl.u32 %v73_v57, 7  ;;  %v74_v61 = vand.u32 127, %v73_v57  ;;  %v3664_v1 = vmov -1e+09   ;;  %s3665_s3 = smov 64  }
  0x1e   :  { %3486 = vset.pattern.permute.xlu1 %v3662_v49  ;;  %3517 = vset.pattern.permute.xlu0 %v3662_v49  ;;  %s3666_s28 = smov 88   ;;  %s3667_s29 = smov 120   ;;  %vm352_vm5 = vcmask 1043456   ;;  %vm1142_vm6 = vcmask 130048   ;;  %vm1145_vm7 = vcmask 195584   ;;  %vm1388_vm8 = vcmask 523264  }
  0x1f   :  { %v82_v60 = vsub.s32 0, %v81_v58  ;;  %s3669_s4 = smov 80   ;;  %s3670_s0 = smov 112   ;;  %vm2833_vm9 = vcmask 1041409   ;;  %vm2959_vm10 = vcmask 41984  }
  0x20   :  { %s4444_s1 = smov 72   ;;  %s4442_s5 = smov 104  }
  0x21   :  { %v3518_v21 = vld [vmem:[%s4459_s2] sm:$0xff]   ;;  %v3519_v23 = vld [vmem:[%s4459_s2 + $0x8] sm:$0xff]   ;;  %s4440_s6 = smov 40   ;;  %s4438_s25 = smov 8  }
  0x22   :  { %3188 = vmatpush3.bf16.msra.mxu0 %v3518_v21  ;;  %v2975_v32 = vld [vmem:[%s4460_s30] ss:$0 sm:$0xff]  ;;  %s3668_s30 = smov 56   ;;  %s4439_s26 = smov 24  }
  0x23   :  { %3189 = vmatprep.subr.bf16.mxu0 %v3660_v22  ;;  %v2976_v36 = vld [vmem:[%s4461_s23] ss:$0 sm:$0xff]  ;;  %v76_v52 = vld [vmem:[%s4462_s17 + $0x1] sm:$0x1]  ;;  %s4446_s23 = smov 48  }
  0x24   :  { %v75_v51 = vld [vmem:[%s4462_s17] sm:$0x1]  ;;  %s4437_s17 = smov 16  }
  0x26   :  { %3190 = vmatpush3.bf16.msra.mxu0 %v3519_v23 }
  0x27   :  { %3201 = vmatprep.subr.bf16.mxu0 %v3660_v22 }
  0xa3   :  { %v109_v11 = vpop.xlane.xlu0 %108 }
  0xa4   :  { %v114_v12 = vmul.f32 0.03125, %v109_v11 }
  0xa6   :  { %v116_v13 = vsub.f32 %v102_v7, %v114_v12 }
  0xa7   :  { %v112_v14 = vpop.xlane.xlu0 %111 }
  0xa8   :  { %v115_v15 = vmul.f32 0.03125, %v112_v14  ;;  %v118_v16 = vmul.f32 %v116_v13, %v116_v13 }
  0xaa   :  { %v117_v17 = vsub.f32 %v103_v8, %v115_v15  ;;  %v120_v18 = vsel %vm106_vm0, %v118_v16, 0.0 }
  0xab   :  { %121 = vadd.xlane.f32.xlu1 %v120_v18 }
  0xac   :  { %v119_v19 = vmul.f32 %v117_v17, %v117_v17 }
  0xae   :  { %v123_v20 = vsel %vm106_vm0, %v119_v19, 0.0 }
  0xaf   :  { %124 = vadd.xlane.f32.xlu1 %v123_v20 }
 0x138   :  { %v122_v24 = vpop.xlane.xlu1 %121 }
 0x139   :  { %v126_v25 = vmul.f32 0.03125, %v122_v24 }
 0x13b   :  { %v128_v26 = vadd.f32 1e-12, %v126_v25 }
 0x13c   :  { %v125_v27 = vpop.xlane.xlu1 %124 }
 0x13d   :  { %3542 = vrsqrt.f32 %v128_v26  ;;  %v127_v28 = vmul.f32 0.03125, %v125_v27 }
 0x13f   :  { %v129_v29 = vadd.f32 1e-12, %v127_v28 }
 0x141   :  { %3544 = vrsqrt.f32 %v129_v29 }
 0x147   :  { %v3543_v30 = vpop.eup %3542 }
 0x148   :  { %v132_v31 = vmul.f32 %v3543_v30, %v116_v13 }
 0x14a   :  { %v140_v35 = vmul.f32 %v2975_v32, %v132_v31 }
 0x14b   :  { %v3545_v33 = vpop.eup %3544 }
 0x14c   :  { %v133_v34 = vmul.f32 %v3545_v33, %v117_v17  ;;  %v3833_v38 = vadd.f32 %v2976_v36, %v140_v35 }
 0x14e   :  { %v141_v37 = vmul.f32 %v2975_v32, %v133_v34 }
 0x150   :  { %v3835_v39 = vadd.f32 %v2976_v36, %v141_v37 }
 0x152   :  { %v154_v40 = vpack.c.bf16 %v3835_v39, %v3833_v38 }
 0x154   :  { %3192 = vmatmul.mubr.msk.bf16.vlgmr.msra.gmra.mrb[0].mxu0 %vm106_vm0, %v154_v40 }
 0x155   :  { %3203 = vmatprep.mubr.msk.bf16.mxu0 %vm3661_vm1, %v3660_v22 }
 0x227   :  { %v211_v42 = vpop.f32.mrb[0].mxu0 }
 0x228   :  { %v212_v43 = vadd.f32 %v2977_v41, %v211_v42  ;;  %v3193_v44 = vpop.f32.mrb[1].mxu0 }
 0x229   :  { %v214_v45 = vpop.f32.mrb[2].mxu0 }
 0x22a   :  { %v3845_v46 = vpack.c.bf16 %v212_v43, %v212_v43  ;;  %v215_v47 = vadd.f32 %v2977_v41, %v214_v45  ;;  %v3194_v48 = vpop.f32.mrb[3].mxu0 }
 0x22c   :  { %v3847_v50 = vpack.c.bf16 %v215_v47, %v215_v47  ;;  %221 = vrot.lane.b32.xlu0 %v3845_v46, %s3663_s24 }
 0x22e   :  { %271 = vrot.lane.b32.xlu1 %v3847_v50, %s3663_s24 }
 0x232   :  { %78 = vperm.xlu1 %3486, %v75_v51  }
 0x236   :  { %85 = vperm.xlu1 %3486, %v76_v52  }
 0x29e   :  { %v222_v53 = vpop.permute.xlu0 %221 }
 0x29f   :  { %v228_v54 = vsel %vm223_vm2, %v222_v53, 0 }
 0x2a0   :  { %3196 = vmatpush3.bf16.xpose.msra.mxu1 %v228_v54  ;;  %v272_v55 = vpop.permute.xlu1 %271 }
 0x2a1   :  { %v277_v56 = vsel %vm223_vm2, %v272_v55, 0  ;;  %3207 = vmatprep.subr.bf16.mxu1 %v3660_v22 }
 0x2a2   :  { %3202 = vmatpush3.bf16.xpose.msra.mxu0 %v277_v56 }
 0x2a3   :  { %3213 = vmatprep.subr.bf16.mxu0 %v3660_v22 }
 0x2a7   :  { %3198 = vmatmul.mubr.msk.bf16.vlgmr.msra.gmra.mrb[0].mxu1 %vm223_vm2, %v3845_v46 }
 0x2a8   :  { %3209 = vmatprep.mubr.msk.bf16.mxu1 %vm3661_vm1, %v3660_v22 }
 0x2a9   :  { %3204 = vmatmul.mubr.msk.bf16.vlgmr.msra.gmra.mrb[4].mxu0 %vm223_vm2, %v3847_v50 }
 0x2aa   :  { %3215 = vmatprep.mubr.msk.bf16.mxu0 %vm3661_vm1, %v3660_v22 }
 0x2b1   :  { %v79_v59 = vpop.permute.xlu1 %78 }
 0x2b2   :  { %v83_v62 = vrot.slane %v79_v59, %v82_v60 }
 0x2b4   :  { %vm91_vm3 = vcmp.lt.s32.totalorder %v74_v61, %v83_v62 }
 0x2b5   :  { %v86_v63 = vpop.permute.xlu1 %85  ;;  %v3871_v2 = vsel %vm91_vm3, 0.0, %v3664_v1 }
 0x2b6   :  { %v90_v0 = vrot.slane %v86_v63, %v82_v60 }
 0x2b8   :  { %vm92_vm4 = vcmp.lt.s32.totalorder %v74_v61, %v90_v0 }
 0x2b9   :  { %v3874_v12 = vsel %vm92_vm4, 0.0, %v3664_v1 }
 0x37a   :  { %v264_v3 = vpop.f32.mrb[0].mxu1 }
 0x37b   :  { %v319_v4 = vmul.f32 0.35355338, %v264_v3  ;;  %v3199_v5 = vpop.f32.mrb[1].mxu1 }
 0x37c   :  { %v267_v6 = vpop.f32.mrb[2].mxu1  ;;  %v313_v7 = vpop.f32.mrb[4].mxu0 }
 0x37d   :  { %v320_v8 = vmul.f32 0.35355338, %v313_v7  ;;  %v3200_v9 = vpop.f32.mrb[3].mxu1  ;;  %v3205_v10 = vpop.f32.mrb[5].mxu0  ;;  %v321_v11 = vadd.f32 %v319_v4, %v3871_v2 }
 0x37e   :  { %v316_v13 = vpop.f32.mrb[6].mxu0 }
 0x37f   :  { %v3206_v14 = vpop.f32.mrb[7].mxu0  ;;  %v323_v15 = vsel %vm223_vm2, %v321_v11, -inf  ;;  %v322_v16 = vadd.f32 %v320_v8, %v3874_v12 }
 0x380   :  { %324 = vmax.xlane.f32.xlu0 %v323_v15 }
 0x381   :  { %v326_v17 = vsel %vm223_vm2, %v322_v16, -inf }
 0x382   :  { %327 = vmax.xlane.f32.xlu1 %v326_v17 }
 0x393   :  { %396 = vrot.lane.b32.xlu1 %v3847_v50, %s3665_s3 }
 0x397   :  { %446 = vrot.lane.b32.xlu1 %v3845_v46, %s3666_s28 }
 0x39b   :  { %496 = vrot.lane.b32.xlu1 %v3847_v50, %s3666_s28 }
 0x39f   :  { %494 = vrot.lane.b32.xlu1 %v3847_v50, %s3667_s29 }
 0x40d   :  { %v325_v18 = vpop.xlane.xlu0 %324 }
 0x40e   :  { %v329_v19 = vsub.f32 %v321_v11, %v325_v18 }
 0x40f   :  { %v328_v20 = vpop.xlane.xlu1 %327 }
 0x410   :  { %v331_v21 = vmul.f32 1.442695, %v329_v19  ;;  %v330_v23 = vsub.f32 %v322_v16, %v328_v20 }
 0x412   :  { %3546 = vpow2.f32 %v331_v21  ;;  %v333_v24 = vmul.f32 1.442695, %v330_v23 }
 0x413   :  { %v397_v25 = vpop.permute.xlu1 %396 }
 0x414   :  { %3548 = vpow2.f32 %v333_v24  ;;  %v402_v26 = vsel %vm352_vm5, %v397_v25, 0 }
 0x415   :  { %3214 = vmatpush3.bf16.msra.mxu0 %v402_v26 }
 0x416   :  { %3225 = vmatprep.subr.bf16.mxu0 %v3660_v22 }
 0x417   :  { %v447_v36 = vpop.permute.xlu1 %446 }
 0x418   :  { %v452_v44 = vsel %vm223_vm2, %v447_v36, 0 }
 0x41b   :  { %v497_v43 = vpop.permute.xlu1 %496 }
 0x41c   :  { %v3547_v27 = vpop.eup %3546  ;;  %v502_v47 = vsel %vm223_vm2, %v497_v43, 0 }
 0x41d   :  { %v335_v28 = vsel %vm223_vm2, %v3547_v27, 0.0 }
 0x41e   :  { %v3549_v29 = vpop.eup %3548  ;;  %336 = vadd.xlane.f32.xlu0 %v335_v28 }
 0x41f   :  { %v338_v30 = vsel %vm223_vm2, %v3549_v29, 0.0  ;;  %v495_v49 = vpop.permute.xlu1 %494 }
 0x422   :  { %339 = vadd.xlane.f32.xlu0 %v338_v30 }
 0x438   :  { %347 = vrot.lane.b32.xlu0 %v3845_v46, %s3665_s3 }
 0x43c   :  { %444 = vrot.lane.b32.xlu0 %v3845_v46, %s3667_s29 }
 0x4ab   :  { %v337_v31 = vpop.xlane.xlu0 %336 }
 0x4ac   :  { %3550 = vrcp.f32 %v337_v31 }
 0x4af   :  { %v340_v32 = vpop.xlane.xlu0 %339 }
 0x4b0   :  { %3552 = vrcp.f32 %v340_v32 }
 0x4b3   :  { %v348_v33 = vpop.permute.xlu0 %347 }
 0x4b4   :  { %v354_v34 = vsel %vm352_vm5, %v348_v33, 0 }
 0x4b5   :  { %3208 = vmatpush3.bf16.msra.mxu1 %v354_v34 }
 0x4b6   :  { %v3551_v35 = vpop.eup %3550  ;;  %3219 = vmatprep.subr.bf16.mxu1 %v3660_v22 }
 0x4b7   :  { %v343_v37 = vmul.f32 %v3551_v35, %v3547_v27  ;;  %v445_v48 = vpop.permute.xlu0 %444 }
 0x4b9   :  { %v345_v40 = vpack.c.bf16 %v343_v37, %v343_v37 }
 0x4ba   :  { %v3553_v41 = vpop.eup %3552 }
 0x4bb   :  { %v344_v42 = vmul.f32 %v3553_v41, %v3549_v29  ;;  %3210 = vmatmul.mubr.msk.bf16.vlgmr.msra.gmra.mrb[4].mxu1 %vm223_vm2, %v345_v40 }
 0x4bc   :  { %3221 = vmatprep.mubr.msk.bf16.mxu1 %vm3661_vm1, %v3660_v22 }
 0x4bd   :  { %v346_v45 = vpack.c.bf16 %v344_v42, %v344_v42 }
 0x4be   :  { %3220 = vmatpush3.bf16.xpose.msra.mxu1 %v452_v44 }
 0x4bf   :  { %3216 = vmatmul.mubr.msk.bf16.vlgmr.msra.gmra.mrb[8].mxu0 %vm223_vm2, %v346_v45  ;;  %3231 = vmatprep.subr.bf16.mxu1 %v3660_v22 }
 0x4c0   :  { %3226 = vmatpush3.bf16.xpose.msra.mxu0 %v502_v47  ;;  %3227 = vmatprep.mubr.msk.bf16.mxu0 %vm3661_vm1, %v3660_v22 }
 0x4c1   :  { %3237 = vmatprep.subr.bf16.mxu0 %v3660_v22 }
 0x4c5   :  { %3222 = vmatmul.mubr.msk.bf16.vlgmr.msra.gmra.mrb[8].mxu1 %vm223_vm2, %v445_v48 }
 0x4c6   :  { %3233 = vmatprep.mubr.msk.bf16.mxu1 %vm3661_vm1, %v3660_v22 }
 0x4c7   :  { %3228 = vmatmul.mubr.msk.bf16.vlgmr.msra.gmra.mrb[12].mxu0 %vm223_vm2, %v495_v49 }
 0x4c8   :  { %3239 = vmatprep.mubr.msk.bf16.mxu0 %vm3661_vm1, %v3660_v22 }
 0x58e   :  { %v3913_v51 = vpop.f32.mrb[4].mxu1 }
 0x58f   :  { %v3211_v52 = vpop.f32.mrb[5].mxu1 }
 0x590   :  { %v393_v53 = vpop.f32.mrb[6].mxu1 }
 0x591   :  { %v3212_v54 = vpop.f32.mrb[7].mxu1 }
 0x592   :  { %v3915_v55 = vpop.f32.mrb[8].mxu0 }
 0x593   :  { %v3217_v56 = vpop.f32.mrb[9].mxu0 }
 0x594   :  { %v441_v57 = vpop.f32.mrb[10].mxu0 }
 0x595   :  { %v3218_v58 = vpop.f32.mrb[11].mxu0 }
 0x598   :  { %v488_v59 = vpop.f32.mrb[8].mxu1 }
 0x599   :  { %v544_v60 = vmul.f32 0.35355338, %v488_v59  ;;  %v3223_v61 = vpop.f32.mrb[9].mxu1 }
 0x59a   :  { %v491_v62 = vpop.f32.mrb[10].mxu1  ;;  %v538_v63 = vpop.f32.mrb[12].mxu0 }
 0x59b   :  { %v545_v0 = vmul.f32 0.35355338, %v538_v63  ;;  %v3224_v1 = vpop.f32.mrb[11].mxu1  ;;  %v3229_v3 = vpop.f32.mrb[13].mxu0  ;;  %v546_v4 = vadd.f32 %v544_v60, %v3871_v2 }
 0x59c   :  { %v541_v5 = vpop.f32.mrb[14].mxu0 }
 0x59d   :  { %v3230_v6 = vpop.f32.mrb[15].mxu0  ;;  %v548_v7 = vsel %vm223_vm2, %v546_v4, -inf  ;;  %v547_v8 = vadd.f32 %v545_v0, %v3874_v12 }
 0x59e   :  { %549 = vmax.xlane.f32.xlu0 %v548_v7 }
 0x59f   :  { %v551_v9 = vsel %vm223_vm2, %v547_v8, -inf }
 0x5a0   :  { %552 = vmax.xlane.f32.xlu1 %v551_v9 }
 0x5b1   :  { %620 = vrot.lane.b32.xlu1 %v3847_v50, %s3668_s30 }
 0x5b5   :  { %670 = vrot.lane.b32.xlu1 %v3845_v46, %s3669_s4 }
 0x5b9   :  { %720 = vrot.lane.b32.xlu1 %v3847_v50, %s3669_s4 }
 0x5bd   :  { %718 = vrot.lane.b32.xlu1 %v3847_v50, %s3670_s0 }
 0x62b   :  { %v550_v10 = vpop.xlane.xlu0 %549 }
 0x62c   :  { %v554_v11 = vsub.f32 %v546_v4, %v550_v10 }
 0x62d   :  { %v553_v13 = vpop.xlane.xlu1 %552 }
 0x62e   :  { %v556_v14 = vmul.f32 1.442695, %v554_v11  ;;  %v555_v15 = vsub.f32 %v547_v8, %v553_v13 }
 0x630   :  { %3554 = vpow2.f32 %v556_v14  ;;  %v558_v16 = vmul.f32 1.442695, %v555_v15 }
 0x631   :  { %v621_v17 = vpop.permute.xlu1 %620 }
 0x632   :  { %3556 = vpow2.f32 %v558_v16  ;;  %v626_v18 = vsel %vm352_vm5, %v621_v17, 0 }
 0x633   :  { %3238 = vmatpush3.bf16.msra.mxu0 %v626_v18 }
 0x634   :  { %3249 = vmatprep.subr.bf16.mxu0 %v3660_v22 }
 0x635   :  { %v671_v29 = vpop.permute.xlu1 %670 }
 0x636   :  { %v676_v35 = vsel %vm223_vm2, %v671_v29, 0 }
 0x639   :  { %v721_v34 = vpop.permute.xlu1 %720 }
 0x63a   :  { %v3555_v19 = vpop.eup %3554  ;;  %v726_v37 = vsel %vm223_vm2, %v721_v34, 0 }
 0x63b   :  { %v560_v20 = vsel %vm223_vm2, %v3555_v19, 0.0 }
 0x63c   :  { %v3557_v21 = vpop.eup %3556  ;;  %561 = vadd.xlane.f32.xlu0 %v560_v20 }
 0x63d   :  { %v563_v23 = vsel %vm223_vm2, %v3557_v21, 0.0  ;;  %v719_v41 = vpop.permute.xlu1 %718 }
 0x640   :  { %564 = vadd.xlane.f32.xlu0 %v563_v23 }
 0x656   :  { %572 = vrot.lane.b32.xlu0 %v3845_v46, %s3668_s30 }
 0x65a   :  { %668 = vrot.lane.b32.xlu0 %v3845_v46, %s3670_s0 }
 0x6c9   :  { %v562_v24 = vpop.xlane.xlu0 %561 }
 0x6ca   :  { %3558 = vrcp.f32 %v562_v24 }
 0x6cd   :  { %v565_v25 = vpop.xlane.xlu0 %564 }
 0x6ce   :  { %3560 = vrcp.f32 %v565_v25 }
 0x6d1   :  { %v573_v26 = vpop.permute.xlu0 %572 }
 0x6d2   :  { %v578_v27 = vsel %vm352_vm5, %v573_v26, 0 }
 0x6d3   :  { %3232 = vmatpush3.bf16.msra.mxu1 %v578_v27 }
 0x6d4   :  { %v3559_v28 = vpop.eup %3558  ;;  %3243 = vmatprep.subr.bf16.mxu1 %v3660_v22 }
 0x6d5   :  { %v568_v30 = vmul.f32 %v3559_v28, %v3555_v19  ;;  %v669_v40 = vpop.permute.xlu0 %668 }
 0x6d7   :  { %v570_v31 = vpack.c.bf16 %v568_v30, %v568_v30 }
 0x6d8   :  { %v3561_v32 = vpop.eup %3560 }
 0x6d9   :  { %v569_v33 = vmul.f32 %v3561_v32, %v3557_v21  ;;  %3234 = vmatmul.mubr.msk.bf16.vlgmr.msra.gmra.mrb[12].mxu1 %vm223_vm2, %v570_v31 }
 0x6da   :  { %3245 = vmatprep.mubr.msk.bf16.mxu1 %vm3661_vm1, %v3660_v22 }
 0x6db   :  { %v571_v36 = vpack.c.bf16 %v569_v33, %v569_v33 }
 0x6dc   :  { %3244 = vmatpush3.bf16.xpose.msra.mxu1 %v676_v35 }
 0x6dd   :  { %3240 = vmatmul.mubr.msk.bf16.vlgmr.msra.gmra.mrb[16].mxu0 %vm223_vm2, %v571_v36  ;;  %3255 = vmatprep.subr.bf16.mxu1 %v3660_v22 }
 0x6de   :  { %3250 = vmatpush3.bf16.xpose.msra.mxu0 %v726_v37  ;;  %3251 = vmatprep.mubr.msk.bf16.mxu0 %vm3661_vm1, %v3660_v22 }
 0x6df   :  { %3261 = vmatprep.subr.bf16.mxu0 %v3660_v22 }
 0x6e3   :  { %3246 = vmatmul.mubr.msk.bf16.vlgmr.msra.gmra.mrb[16].mxu1 %vm223_vm2, %v669_v40 }
 0x6e4   :  { %3257 = vmatprep.mubr.msk.bf16.mxu1 %vm3661_vm1, %v3660_v22 }
 0x6e5   :  { %3252 = vmatmul.mubr.msk.bf16.vlgmr.msra.gmra.mrb[20].mxu0 %vm223_vm2, %v719_v41 }
 0x6e6   :  { %3263 = vmatprep.mubr.msk.bf16.mxu0 %vm3661_vm1, %v3660_v22 }
 0x7ac   :  { %v3955_v42 = vpop.f32.mrb[12].mxu1 }
 0x7ad   :  { %v3235_v43 = vpop.f32.mrb[13].mxu1 }
 0x7ae   :  { %v617_v44 = vpop.f32.mrb[14].mxu1 }
 0x7af   :  { %v3236_v45 = vpop.f32.mrb[15].mxu1 }
 0x7b0   :  { %v3957_v47 = vpop.f32.mrb[16].mxu0 }
 0x7b1   :  { %v3487_v48 = vpack.i.bf16 %v3957_v47, %v3955_v42  ;;  %v3241_v49 = vpop.f32.mrb[17].mxu0 }
 0x7b2   :  { %v665_v52 = vpop.f32.mrb[18].mxu0 }
 0x7b3   :  { %v3242_v53 = vpop.f32.mrb[19].mxu0 }
 0x7b6   :  { %v712_v54 = vpop.f32.mrb[16].mxu1 }
 0x7b7   :  { %v768_v56 = vmul.f32 0.35355338, %v712_v54  ;;  %v3247_v57 = vpop.f32.mrb[17].mxu1 }
 0x7b8   :  { %v715_v58 = vpop.f32.mrb[18].mxu1  ;;  %v762_v59 = vpop.f32.mrb[20].mxu0 }
 0x7b9   :  { %v769_v60 = vmul.f32 0.35355338, %v762_v59  ;;  %v3248_v61 = vpop.f32.mrb[19].mxu1  ;;  %v3253_v62 = vpop.f32.mrb[21].mxu0  ;;  %v770_v63 = vadd.f32 %v768_v56, %v3871_v2 }
 0x7ba   :  { %v765_v0 = vpop.f32.mrb[22].mxu0 }
 0x7bb   :  { %v3254_v1 = vpop.f32.mrb[23].mxu0  ;;  %v772_v3 = vsel %vm223_vm2, %v770_v63, -inf  ;;  %v771_v4 = vadd.f32 %v769_v60, %v3874_v12 }
 0x7bc   :  { %773 = vmax.xlane.f32.xlu0 %v772_v3 }
 0x7bd   :  { %v775_v5 = vsel %vm223_vm2, %v771_v4, -inf }
 0x7be   :  { %776 = vmax.xlane.f32.xlu1 %v775_v5 }
 0x7cf   :  { %844 = vrot.lane.b32.xlu1 %v3847_v50, %s4446_s23 }
 0x7d3   :  { %894 = vrot.lane.b32.xlu1 %v3845_v46, %s4444_s1 }
 0x7d7   :  { %944 = vrot.lane.b32.xlu1 %v3847_v50, %s4444_s1  ;;  %s4463_s1 = sld [smem:[#allocation12_spill]] }
 0x7db   :  { %942 = vrot.lane.b32.xlu1 %v3847_v50, %s4442_s5 }
 0x849   :  { %v774_v6 = vpop.xlane.xlu0 %773 }
 0x84a   :  { %v778_v7 = vsub.f32 %v770_v63, %v774_v6 }
 0x84b   :  { %v777_v8 = vpop.xlane.xlu1 %776 }
 0x84c   :  { %v780_v9 = vmul.f32 1.442695, %v778_v7  ;;  %v779_v10 = vsub.f32 %v771_v4, %v777_v8 }
 0x84e   :  { %3562 = vpow2.f32 %v780_v9  ;;  %v782_v11 = vmul.f32 1.442695, %v779_v10 }
 0x84f   :  { %v845_v13 = vpop.permute.xlu1 %844 }
 0x850   :  { %3564 = vpow2.f32 %v782_v11  ;;  %v850_v14 = vsel %vm352_vm5, %v845_v13, 0 }
 0x851   :  { %3262 = vmatpush3.bf16.msra.mxu0 %v850_v14 }
 0x852   :  { %3273 = vmatprep.subr.bf16.mxu0 %v3660_v22 }
 0x853   :  { %v895_v25 = vpop.permute.xlu1 %894 }
 0x854   :  { %v900_v31 = vsel %vm223_vm2, %v895_v25, 0  ;;  %v3521_v25 = vld [vmem:[%s4417_s8 + $0x8] sm:$0xff]  }
 0x857   :  { %v945_v30 = vpop.permute.xlu1 %944 }
 0x858   :  { %v3563_v15 = vpop.eup %3562  ;;  %v950_v33 = vsel %vm223_vm2, %v945_v30, 0 }
 0x859   :  { %v784_v16 = vsel %vm223_vm2, %v3563_v15, 0.0 }
 0x85a   :  { %v3565_v17 = vpop.eup %3564  ;;  %785 = vadd.xlane.f32.xlu0 %v784_v16 }
 0x85b   :  { %v787_v18 = vsel %vm223_vm2, %v3565_v17, 0.0  ;;  %v943_v35 = vpop.permute.xlu1 %942 }
 0x85e   :  { %788 = vadd.xlane.f32.xlu0 %v787_v18 }
 0x874   :  { %796 = vrot.lane.b32.xlu0 %v3845_v46, %s4446_s23 }
 0x878   :  { %892 = vrot.lane.b32.xlu0 %v3845_v46, %s4442_s5  ;;  %s4470_s5 = smov 24  }
 0x8e7   :  { %v786_v19 = vpop.xlane.xlu0 %785 }
 0x8e8   :  { %3566 = vrcp.f32 %v786_v19 }
 0x8eb   :  { %v789_v20 = vpop.xlane.xlu0 %788 }
 0x8ec   :  { %3568 = vrcp.f32 %v789_v20 }
 0x8ef   :  { %v797_v21 = vpop.permute.xlu0 %796 }
 0x8f0   :  { %v802_v23 = vsel %vm352_vm5, %v797_v21, 0 }
 0x8f1   :  { %3256 = vmatpush3.bf16.msra.mxu1 %v802_v23 }
 0x8f2   :  { %v3567_v24 = vpop.eup %3566  ;;  %3267 = vmatprep.subr.bf16.mxu1 %v3660_v22 }
 0x8f3   :  { %v792_v26 = vmul.f32 %v3567_v24, %v3563_v15  ;;  %v893_v34 = vpop.permute.xlu0 %892  ;;  %v3520_v24 = vld [vmem:[%s4417_s8] sm:$0xff]  }
 0x8f5   :  { %v794_v27 = vpack.c.bf16 %v792_v26, %v792_v26 }
 0x8f6   :  { %v3569_v28 = vpop.eup %3568 }
 0x8f7   :  { %v793_v29 = vmul.f32 %v3569_v28, %v3565_v17  ;;  %3258 = vmatmul.mubr.msk.bf16.vlgmr.msra.gmra.mrb[20].mxu1 %vm223_vm2, %v794_v27 }
 0x8f8   :  { %3269 = vmatprep.mubr.msk.bf16.mxu1 %vm3661_vm1, %v3660_v22 }
 0x8f9   :  { %v795_v32 = vpack.c.bf16 %v793_v29, %v793_v29 }
 0x8fa   :  { %3268 = vmatpush3.bf16.xpose.msra.mxu1 %v900_v31 }
 0x8fb   :  { %3264 = vmatmul.mubr.msk.bf16.vlgmr.msra.gmra.mrb[24].mxu0 %vm223_vm2, %v795_v32  ;;  %3279 = vmatprep.subr.bf16.mxu1 %v3660_v22 }
 0x8fc   :  { %3274 = vmatpush3.bf16.xpose.msra.mxu0 %v950_v33  ;;  %3275 = vmatprep.mubr.msk.bf16.mxu0 %vm3661_vm1, %v3660_v22 }
 0x8fd   :  { %3285 = vmatprep.subr.bf16.mxu0 %v3660_v22 }
 0x901   :  { %3270 = vmatmul.mubr.msk.bf16.vlgmr.msra.gmra.mrb[24].mxu1 %vm223_vm2, %v893_v34 }
 0x902   :  { %3281 = vmatprep.mubr.msk.bf16.mxu1 %vm3661_vm1, %v3660_v22 }
 0x903   :  { %3276 = vmatmul.mubr.msk.bf16.vlgmr.msra.gmra.mrb[28].mxu0 %vm223_vm2, %v943_v35 }
 0x904   :  { %3287 = vmatprep.mubr.msk.bf16.mxu0 %vm3661_vm1, %v3660_v22 }
 0x9ca   :  { %v838_v36 = vpop.f32.mrb[20].mxu1 }
 0x9cb   :  { %v3259_v37 = vpop.f32.mrb[21].mxu1 }
 0x9cc   :  { %v841_v40 = vpop.f32.mrb[22].mxu1 }
 0x9cd   :  { %v3260_v41 = vpop.f32.mrb[23].mxu1 }
 0x9ce   :  { %v886_v43 = vpop.f32.mrb[24].mxu0 }
 0x9cf   :  { %v3492_v44 = vpack.i.bf16 %v886_v43, %v838_v36  ;;  %v3265_v45 = vpop.f32.mrb[25].mxu0 }
 0x9d0   :  { %v889_v49 = vpop.f32.mrb[26].mxu0 }
 0x9d1   :  { %v3266_v52 = vpop.f32.mrb[27].mxu0 }
 0x9d4   :  { %v936_v53 = vpop.f32.mrb[24].mxu1 }
 0x9d5   :  { %v992_v54 = vmul.f32 0.35355338, %v936_v53  ;;  %v3271_v56 = vpop.f32.mrb[25].mxu1 }
 0x9d6   :  { %v939_v57 = vpop.f32.mrb[26].mxu1  ;;  %v986_v58 = vpop.f32.mrb[28].mxu0 }
 0x9d7   :  { %v993_v59 = vmul.f32 0.35355338, %v986_v58  ;;  %v3272_v60 = vpop.f32.mrb[27].mxu1  ;;  %v3277_v61 = vpop.f32.mrb[29].mxu0  ;;  %v994_v62 = vadd.f32 %v992_v54, %v3871_v2 }
 0x9d8   :  { %v989_v63 = vpop.f32.mrb[30].mxu0 }
 0x9d9   :  { %v3278_v0 = vpop.f32.mrb[31].mxu0  ;;  %v996_v1 = vsel %vm223_vm2, %v994_v62, -inf  ;;  %v995_v3 = vadd.f32 %v993_v59, %v3874_v12 }
 0x9da   :  { %997 = vmax.xlane.f32.xlu0 %v996_v1 }
 0x9db   :  { %v999_v4 = vsel %vm223_vm2, %v995_v3, -inf }
 0x9dc   :  { %1000 = vmax.xlane.f32.xlu1 %v999_v4 }
 0x9ed   :  { %1068 = vrot.lane.b32.xlu1 %v3847_v50, %s4440_s6 }
 0x9f1   :  { %3488 = vrot.lane.b32.xlu1 %v3487_v48, %s4438_s25 }
 0x9f5   :  { %3493 = vrot.lane.b32.xlu1 %v3492_v44, %s4437_s17 }
 0xa67   :  { %v998_v5 = vpop.xlane.xlu0 %997 }
 0xa68   :  { %v1002_v6 = vsub.f32 %v994_v62, %v998_v5 }
 0xa69   :  { %v1001_v7 = vpop.xlane.xlu1 %1000 }
 0xa6a   :  { %v1004_v8 = vmul.f32 1.442695, %v1002_v6  ;;  %v1003_v9 = vsub.f32 %v995_v3, %v1001_v7 }
 0xa6c   :  { %3570 = vpow2.f32 %v1004_v8  ;;  %v1006_v10 = vmul.f32 1.442695, %v1003_v9 }
 0xa6d   :  { %v1069_v11 = vpop.permute.xlu1 %1068 }
 0xa6e   :  { %3572 = vpow2.f32 %v1006_v10  ;;  %v1074_v50 = vsel %vm352_vm5, %v1069_v11, 0 }
 0xa6f   :  { %3286 = vmatpush3.bf16.msra.mxu0 %v1074_v50 }
 0xa70   :  { %3299 = vmatprep.subr.bf16.mxu0 %v3660_v22 }
 0xa71   :  { %v3489_v35 = vpop.permute.xlu1 %3488 }
 0xa72   :  { %v3491_v37 = vunpack.i.h.bf16 %v3489_v35  ;;  %v3490_v40 = vunpack.i.l.bf16 %v3489_v35 }
 0xa74   :  { %v1141_v45 = vsel %vm223_vm2, %v3915_v55, %v3491_v37  ;;  %v1140_v49 = vsel %vm223_vm2, %v3913_v51, %v3490_v40  ;;  %v2997_v51 = vld [vmem:[%s4418_s9] ss:$0 sm:$0xff] }
 0xa75   :  { %v3494_v36 = vpop.permute.xlu1 %3493 }
 0xa76   :  { %v3571_v13 = vpop.eup %3570  ;;  %v3496_v41 = vunpack.i.h.bf16 %v3494_v36  ;;  %v3495_v43 = vunpack.i.l.bf16 %v3494_v36 }
 0xa77   :  { %v1008_v42 = vsel %vm223_vm2, %v3571_v13, 0.0 }
 0xa78   :  { %v3573_v47 = vpop.eup %3572  ;;  %1009 = vadd.xlane.f32.xlu0 %v1008_v42  ;;  %v1144_v54 = vsel %vm1142_vm6, %v1141_v45, %v3496_v41  ;;  %v1143_v56 = vsel %vm1142_vm6, %v1140_v49, %v3495_v43 }
 0xa79   :  { %v1011_v48 = vsel %vm223_vm2, %v3573_v47, 0.0 }
 0xa7c   :  { %1012 = vadd.xlane.f32.xlu0 %v1011_v48 }
 0xa92   :  { %1020 = vrot.lane.b32.xlu0 %v3845_v46, %s4440_s6 }
 0xb05   :  { %v1010_v14 = vpop.xlane.xlu0 %1009 }
 0xb06   :  { %3574 = vrcp.f32 %v1010_v14 }
 0xb09   :  { %v1013_v15 = vpop.xlane.xlu0 %1012 }
 0xb0a   :  { %3576 = vrcp.f32 %v1013_v15 }
 0xb0d   :  { %v1021_v16 = vpop.permute.xlu0 %1020 }
 0xb0e   :  { %v1026_v17 = vsel %vm352_vm5, %v1021_v16, 0 }
 0xb0f   :  { %3280 = vmatpush3.bf16.msra.mxu1 %v1026_v17 }
 0xb10   :  { %v3575_v18 = vpop.eup %3574  ;;  %3291 = vmatprep.subr.bf16.mxu1 %v3660_v22 }
 0xb11   :  { %v1016_v19 = vmul.f32 %v3575_v18, %v3571_v13 }
 0xb13   :  { %v1018_v20 = vpack.c.bf16 %v1016_v19, %v1016_v19 }
 0xb14   :  { %v3577_v21 = vpop.eup %3576 }
 0xb15   :  { %v1017_v23 = vmul.f32 %v3577_v21, %v3573_v47  ;;  %3282 = vmatmul.mubr.msk.bf16.vlgmr.msra.gmra.mrb[28].mxu1 %vm223_vm2, %v1018_v20  ;;  %v3523_v47 = vld [vmem:[%s4421_s12 + $0x8] sm:$0xff]   ;;  %v3001_v21 = vld [vmem:[%s4419_s10] ss:$0 sm:$0xff] }
 0xb16   :  { %3295 = vmatprep.mubr.msk.bf16.mxu1 %vm3661_vm1, %v3660_v22  ;;  %3292 = vmatpush3.bf16.msra.mxu1 %v3520_v24 }
 0xb17   :  { %v1019_v46 = vpack.c.bf16 %v1017_v23, %v1017_v23  ;;  %3293 = vmatprep.subr.bf16.mxu1 %v3660_v22 }
 0xb19   :  { %3288 = vmatmul.mubr.msk.bf16.vlgmr.msra.gmra.mrb[32].mxu0 %vm223_vm2, %v1019_v46 }
 0xb1a   :  { %3303 = vmatprep.mubr.msk.bf16.mxu0 %vm3661_vm1, %v3660_v22  ;;  %3294 = vmatpush3.bf16.msra.mxu1 %v3521_v25  ;;  %v3002_v25 = vld [vmem:[%s4420_s11] ss:$0 sm:$0xff] }
 0xb1b   :  { %3307 = vmatprep.subr.bf16.mxu1 %v3660_v22 }
 0xbe8   :  { %v1062_v26 = vpop.f32.mrb[28].mxu1 }
 0xbe9   :  { %v3283_v27 = vpop.f32.mrb[29].mxu1 }
 0xbea   :  { %v1065_v28 = vpop.f32.mrb[30].mxu1 }
 0xbeb   :  { %v3284_v29 = vpop.f32.mrb[31].mxu1 }
 0xbec   :  { %v1110_v30 = vpop.f32.mrb[32].mxu0 }
 0xbed   :  { %v3497_v31 = vpack.i.bf16 %v1110_v30, %v1062_v26  ;;  %v3289_v32 = vpop.f32.mrb[33].mxu0  ;;  %v3524_v30 = vld [vmem:[%s4423_s14] sm:$0xff]  }
 0xbee   :  { %v1113_v33 = vpop.f32.mrb[34].mxu0  ;;  %v3526_v32 = vld [vmem:[%s4423_s14 + $0x10] sm:$0xff]  }
 0xbef   :  { %v3290_v34 = vpop.f32.mrb[35].mxu0  ;;  %3498 = vrot.lane.b32.xlu0 %v3497_v31, %s4439_s26  ;;  %v3525_v31 = vld [vmem:[%s4423_s14 + $0x8] sm:$0xff]   ;;  %v3527_v33 = vld [vmem:[%s4423_s14 + $0x18] sm:$0xff]  }
 0xbf0   :  { %v3003_v34 = vld [vmem:[%s4422_s13] ss:$0 sm:$0xff] }
 0xc61   :  { %v3499_v44 = vpop.permute.xlu0 %3498 }
 0xc62   :  { %v3501_v52 = vunpack.i.h.bf16 %v3499_v44  ;;  %v3500_v53 = vunpack.i.l.bf16 %v3499_v44 }
 0xc64   :  { %v1147_v57 = vsel %vm1145_vm7, %v1144_v54, %v3501_v52  ;;  %v1146_v58 = vsel %vm1145_vm7, %v1143_v56, %v3500_v53 }
 0xc65   :  { %v1152_v59 = vpack.c.bf16 %v1147_v57, %v1146_v58 }
 0xc67   :  { %3296 = vmatmul.mubr.msk.bf16.vlgmr.msra.gmra.mrb[32].mxu1 %vm106_vm0, %v1152_v59 }
 0xc68   :  { %3315 = vmatprep.mubr.msk.bf16.mxu1 %vm3661_vm1, %v3660_v22  ;;  %3308 = vmatpush3.bf16.msra.mxu1 %v3524_v30 }
 0xc69   :  { %3309 = vmatprep.subr.bf16.mxu1 %v3660_v22 }
 0xc6c   :  { %3310 = vmatpush3.bf16.msra.mxu1 %v3525_v31 }
 0xc6d   :  { %3311 = vmatprep.subr.bf16.mxu1 %v3660_v22 }
 0xc70   :  { %3312 = vmatpush3.bf16.msra.mxu1 %v3526_v32 }
 0xc71   :  { %3313 = vmatprep.subr.bf16.mxu1 %v3660_v22 }
 0xc74   :  { %3314 = vmatpush3.bf16.msra.mxu1 %v3527_v33 }
 0xc75   :  { %3333 = vmatprep.subr.bf16.mxu1 %v3660_v22 }
 0xd3a   :  { %v1209_v55 = vpop.f32.mrb[32].mxu1 }
 0xd3b   :  { %v1210_v60 = vadd.f32 %v2997_v51, %v1209_v55  ;;  %v3297_v61 = vpop.f32.mrb[33].mxu1 }
 0xd3c   :  { %v1212_v62 = vpop.f32.mrb[34].mxu1 }
 0xd3d   :  { %v1213_v63 = vadd.f32 %v2997_v51, %v1212_v62  ;;  %v3298_v0 = vpop.f32.mrb[35].mxu1  ;;  %v1216_v1 = vadd.f32 %v1210_v60, %v3833_v38 }
 0xd3f   :  { %v1220_v3 = vsel %vm106_vm0, %v1216_v1, 0.0  ;;  %v1217_v4 = vadd.f32 %v1213_v63, %v3835_v39  ;;  %v3522_v39 = vld [vmem:[%s4421_s12] sm:$0xff]  }
 0xd40   :  { %1221 = vadd.xlane.f32.xlu1 %v1220_v3  ;;  %3300 = vmatpush3.bf16.msra.mxu0 %v3522_v39 }
 0xd41   :  { %v1223_v5 = vsel %vm106_vm0, %v1217_v4, 0.0  ;;  %3301 = vmatprep.subr.bf16.mxu0 %v3660_v22 }
 0xd42   :  { %1224 = vadd.xlane.f32.xlu0 %v1223_v5 }
 0xd44   :  { %3302 = vmatpush3.bf16.msra.mxu0 %v3523_v47 }
 0xd45   :  { %3319 = vmatprep.subr.bf16.mxu0 %v3660_v22 }
 0xdcd   :  { %v1222_v6 = vpop.xlane.xlu1 %1221 }
 0xdce   :  { %v1226_v7 = vmul.f32 0.03125, %v1222_v6 }
 0xdcf   :  { %v1225_v8 = vpop.xlane.xlu0 %1224 }
 0xdd0   :  { %v1228_v9 = vsub.f32 %v1216_v1, %v1226_v7  ;;  %v1227_v10 = vmul.f32 0.03125, %v1225_v8 }
 0xdd2   :  { %v1229_v11 = vsub.f32 %v1217_v4, %v1227_v10  ;;  %v1230_v50 = vmul.f32 %v1228_v9, %v1228_v9  ;;  %v3007_v4 = vld [vmem:[%s4424_s15] ss:$0 sm:$0xff] }
 0xdd4   :  { %v1232_v13 = vsel %vm106_vm0, %v1230_v50, 0.0  ;;  %v1231_v42 = vmul.f32 %v1229_v11, %v1229_v11 }
 0xdd5   :  { %1233 = vadd.xlane.f32.xlu0 %v1232_v13 }
 0xdd6   :  { %v1235_v38 = vsel %vm106_vm0, %v1231_v42, 0.0 }
 0xdd9   :  { %1236 = vadd.xlane.f32.xlu0 %v1235_v38 }
 0xe62   :  { %v1234_v48 = vpop.xlane.xlu0 %1233 }
 0xe63   :  { %v1238_v14 = vmul.f32 0.03125, %v1234_v48 }
 0xe65   :  { %v1240_v15 = vadd.f32 1e-12, %v1238_v14 }
 0xe66   :  { %v1237_v16 = vpop.xlane.xlu0 %1236 }
 0xe67   :  { %3578 = vrsqrt.f32 %v1240_v15  ;;  %v1239_v17 = vmul.f32 0.03125, %v1237_v16 }
 0xe69   :  { %v1241_v18 = vadd.f32 1e-12, %v1239_v17 }
 0xe6b   :  { %3580 = vrsqrt.f32 %v1241_v18 }
 0xe71   :  { %v3579_v19 = vpop.eup %3578 }
 0xe72   :  { %v1244_v20 = vmul.f32 %v3579_v19, %v1228_v9 }
 0xe74   :  { %v1252_v46 = vmul.f32 %v3001_v21, %v1244_v20  ;;  %v3528_v20 = vld [vmem:[%s4459_s2 + $0x10] sm:$0xff]  }
 0xe75   :  { %v3581_v23 = vpop.eup %3580 }
 0xe76   :  { %v1245_v24 = vmul.f32 %v3581_v23, %v1229_v11  ;;  %v1260_v27 = vadd.f32 %v3002_v25, %v1252_v46 }
 0xe78   :  { %v1253_v26 = vmul.f32 %v3001_v21, %v1245_v24  ;;  %v3529_v21 = vld [vmem:[%s4459_s2 + $0x18] sm:$0xff]  }
 0xe7a   :  { %v1261_v28 = vadd.f32 %v3002_v25, %v1253_v26 }
 0xe7c   :  { %v1266_v29 = vpack.c.bf16 %v1261_v28, %v1260_v27 }
 0xe7e   :  { %3304 = vmatmul.mubr.msk.bf16.vlgmr.msra.gmra.mrb[36].mxu0 %vm106_vm0, %v1266_v29  ;;  %v3013_v29 = vld [vmem:[%s4425_s16] ss:$0 sm:$0xff] }
 0xe7f   :  { %3323 = vmatprep.mubr.msk.bf16.mxu0 %vm3661_vm1, %v3660_v22  ;;  %3320 = vmatpush3.bf16.msra.mxu0 %v3528_v20 }
 0xe80   :  { %3321 = vmatprep.subr.bf16.mxu0 %v3660_v22 }
 0xe83   :  { %3322 = vmatpush3.bf16.msra.mxu0 %v3529_v21 }
 0xe84   :  { %3327 = vmatprep.subr.bf16.mxu0 %v3660_v22 }
 0xf51   :  { %v1323_v35 = vpop.f32.mrb[36].mxu0 }
 0xf52   :  { %v1324_v36 = vadd.f32 %v3003_v34, %v1323_v35  ;;  %v3305_v37 = vpop.f32.mrb[37].mxu0 }
 0xf53   :  { %v1326_v40 = vpop.f32.mrb[38].mxu0 }
 0xf54   :  { %v1332_v41 = vmul.f32 0.044715, %v1324_v36  ;;  %v1327_v43 = vadd.f32 %v3003_v34, %v1326_v40  ;;  %v3306_v44 = vpop.f32.mrb[39].mxu0  ;;  %v1330_v61 = vmul.f32 0.5, %v1324_v36  ;;  %v3014_v34 = vld [vmem:[%s4463_s1] ss:$0 sm:$0xff] }
 0xf56   :  { %v1334_v45 = vmul.f32 %v1332_v41, %v1324_v36  ;;  %v1333_v49 = vmul.f32 0.044715, %v1327_v43  ;;  %v1331_v62 = vmul.f32 0.5, %v1327_v43  ;;  %v3020_v41 = vld [vmem:[%s4416_s7 + $0x1] ss:$0 sm:$0xff]  ;;  %s4464_s7 = smov 48  }
 0xf58   :  { %v1336_v52 = vmul.f32 %v1334_v45, %v1324_v36  ;;  %v1335_v53 = vmul.f32 %v1333_v49, %v1327_v43 }
 0xf5a   :  { %v1338_v54 = vadd.f32 %v1336_v52, %v1324_v36  ;;  %v1337_v56 = vmul.f32 %v1335_v53, %v1327_v43 }
 0xf5c   :  { %v1340_v57 = vmul.f32 0.7978846, %v1338_v54  ;;  %v1339_v58 = vadd.f32 %v1337_v56, %v1327_v43 }
 0xf5e   :  { %3582 = vtanh.f32 %v1340_v57  ;;  %v1341_v59 = vmul.f32 0.7978846, %v1339_v58 }
 0xf60   :  { %3584 = vtanh.f32 %v1341_v59 }
 0xf68   :  { %v3583_v51 = vpop.eup %3582 }
 0xf69   :  { %v1344_v55 = vadd.f32 1.0, %v3583_v51 }
 0xf6a   :  { %v3585_v60 = vpop.eup %3584 }
 0xf6b   :  { %v1345_v63 = vadd.f32 1.0, %v3585_v60  ;;  %v1346_v0 = vmul.f32 %v1344_v55, %v1330_v61 }
 0xf6d   :  { %v1347_v1 = vmul.f32 %v1345_v63, %v1331_v62 }
 0xf6f   :  { %v1356_v3 = vpack.c.bf16 %v1347_v1, %v1346_v0 }
 0xf71   :  { %3316 = vmatmul.mubr.msk.bf16.vlgmr.msra.gmra.mrb[36].mxu1 %vm1388_vm8, %v1356_v3 }
 0xf72   :  { %3335 = vmatprep.mubr.msk.bf16.mxu1 %vm3661_vm1, %v3660_v22 }
0x1044   :  { %v1426_v5 = vpop.f32.mrb[36].mxu1 }
0x1045   :  { %v1427_v6 = vadd.f32 %v3007_v4, %v1426_v5  ;;  %v3317_v7 = vpop.f32.mrb[37].mxu1 }
0x1046   :  { %v1429_v8 = vpop.f32.mrb[38].mxu1 }
0x1047   :  { %v1430_v9 = vadd.f32 %v3007_v4, %v1429_v8  ;;  %v3318_v10 = vpop.f32.mrb[39].mxu1  ;;  %v1433_v11 = vadd.f32 %v1427_v6, %v1260_v27 }
0x1049   :  { %v1437_v50 = vsel %vm106_vm0, %v1433_v11, 0.0  ;;  %v1434_v13 = vadd.f32 %v1430_v9, %v1261_v28 }
0x104a   :  { %1438 = vadd.xlane.f32.xlu1 %v1437_v50 }
0x104b   :  { %v1440_v42 = vsel %vm106_vm0, %v1434_v13, 0.0 }
0x104c   :  { %1441 = vadd.xlane.f32.xlu0 %v1440_v42 }
0x10d7   :  { %v1439_v38 = vpop.xlane.xlu1 %1438 }
0x10d8   :  { %v1443_v39 = vmul.f32 0.03125, %v1439_v38 }
0x10d9   :  { %v1442_v47 = vpop.xlane.xlu0 %1441 }
0x10da   :  { %v1445_v48 = vsub.f32 %v1433_v11, %v1443_v39  ;;  %v1444_v14 = vmul.f32 0.03125, %v1442_v47 }
0x10dc   :  { %v1446_v15 = vsub.f32 %v1434_v13, %v1444_v14  ;;  %v1447_v16 = vmul.f32 %v1445_v48, %v1445_v48 }
0x10de   :  { %v1449_v17 = vsel %vm106_vm0, %v1447_v16, 0.0  ;;  %v1448_v18 = vmul.f32 %v1446_v15, %v1446_v15 }
0x10df   :  { %1450 = vadd.xlane.f32.xlu1 %v1449_v17 }
0x10e0   :  { %v1452_v19 = vsel %vm106_vm0, %v1448_v18, 0.0 }
0x10e1   :  { %1453 = vadd.xlane.f32.xlu0 %v1452_v19 }
0x116c   :  { %v1451_v23 = vpop.xlane.xlu1 %1450 }
0x116d   :  { %v1455_v46 = vmul.f32 0.03125, %v1451_v23 }
0x116e   :  { %v1454_v24 = vpop.xlane.xlu0 %1453 }
0x116f   :  { %v1457_v25 = vadd.f32 1e-12, %v1455_v46  ;;  %v1456_v26 = vmul.f32 0.03125, %v1454_v24 }
0x1171   :  { %3586 = vrsqrt.f32 %v1457_v25  ;;  %v1458_v27 = vadd.f32 1e-12, %v1456_v26 }
0x1173   :  { %3588 = vrsqrt.f32 %v1458_v27 }
0x117b   :  { %v3587_v28 = vpop.eup %3586 }
0x117c   :  { %v1461_v30 = vmul.f32 %v3587_v28, %v1445_v48 }
0x117d   :  { %v3589_v31 = vpop.eup %3588 }
0x117e   :  { %v1469_v32 = vmul.f32 %v3013_v29, %v1461_v30  ;;  %v1462_v33 = vmul.f32 %v3589_v31, %v1446_v15 }
0x1180   :  { %v1470_v35 = vmul.f32 %v3013_v29, %v1462_v33  ;;  %v4113_v36 = vadd.f32 %v3014_v34, %v1469_v32 }
0x1182   :  { %v4115_v37 = vadd.f32 %v3014_v34, %v1470_v35 }
0x1184   :  { %v1484_v40 = vpack.c.bf16 %v4115_v37, %v4113_v36 }
0x1186   :  { %3324 = vmatmul.mubr.msk.bf16.vlgmr.msra.gmra.mrb[40].mxu0 %vm106_vm0, %v1484_v40 }
0x1187   :  { %3329 = vmatprep.mubr.msk.bf16.mxu0 %vm3661_vm1, %v3660_v22 }
0x1259   :  { %v1542_v43 = vpop.f32.mrb[40].mxu0 }
0x125a   :  { %v1543_v44 = vadd.f32 %v3020_v41, %v1542_v43  ;;  %v3325_v45 = vpop.f32.mrb[41].mxu0 }
0x125b   :  { %v1545_v49 = vpop.f32.mrb[42].mxu0 }
0x125c   :  { %v4125_v52 = vpack.c.bf16 %v1543_v44, %v1543_v44  ;;  %v1546_v53 = vadd.f32 %v3020_v41, %v1545_v49  ;;  %v3326_v54 = vpop.f32.mrb[43].mxu0 }
0x125e   :  { %v4127_v56 = vpack.c.bf16 %v1546_v53, %v1546_v53  ;;  %1552 = vrot.lane.b32.xlu1 %v4125_v52, %s3663_s24 }
0x1260   :  { %1601 = vrot.lane.b32.xlu0 %v4127_v56, %s3663_s24  ;;  %s4465_s24 = smov 72  }
0x12d0   :  { %v1553_v57 = vpop.permute.xlu1 %1552 }
0x12d1   :  { %v1558_v58 = vsel %vm223_vm2, %v1553_v57, 0 }
0x12d2   :  { %3328 = vmatpush3.bf16.xpose.msra.mxu0 %v1558_v58  ;;  %v1602_v59 = vpop.permute.xlu0 %1601 }
0x12d3   :  { %v1607_v51 = vsel %vm223_vm2, %v1602_v59, 0  ;;  %3339 = vmatprep.subr.bf16.mxu0 %v3660_v22 }
0x12d4   :  { %3334 = vmatpush3.bf16.xpose.msra.mxu1 %v1607_v51 }
0x12d5   :  { %3345 = vmatprep.subr.bf16.mxu1 %v3660_v22 }
0x12d9   :  { %3330 = vmatmul.mubr.msk.bf16.vlgmr.msra.gmra.mrb[44].mxu0 %vm223_vm2, %v4125_v52 }
0x12da   :  { %3341 = vmatprep.mubr.msk.bf16.mxu0 %vm3661_vm1, %v3660_v22 }
0x12db   :  { %3336 = vmatmul.mubr.msk.bf16.vlgmr.msra.gmra.mrb[40].mxu1 %vm223_vm2, %v4127_v56 }
0x12dc   :  { %3347 = vmatprep.mubr.msk.bf16.mxu1 %vm3661_vm1, %v3660_v22 }
0x13ac   :  { %v1594_v55 = vpop.f32.mrb[44].mxu0 }
0x13ad   :  { %v1649_v60 = vmul.f32 0.35355338, %v1594_v55  ;;  %v3331_v61 = vpop.f32.mrb[45].mxu0 }
0x13ae   :  { %v1597_v62 = vpop.f32.mrb[46].mxu0  ;;  %v1643_v63 = vpop.f32.mrb[40].mxu1 }
0x13af   :  { %v1650_v0 = vmul.f32 0.35355338, %v1643_v63  ;;  %v3332_v1 = vpop.f32.mrb[47].mxu0  ;;  %v3337_v3 = vpop.f32.mrb[41].mxu1  ;;  %v1651_v4 = vadd.f32 %v1649_v60, %v3871_v2 }
0x13b0   :  { %v1646_v5 = vpop.f32.mrb[42].mxu1 }
0x13b1   :  { %v3338_v6 = vpop.f32.mrb[43].mxu1  ;;  %v1653_v7 = vsel %vm223_vm2, %v1651_v4, -inf  ;;  %v1652_v8 = vadd.f32 %v1650_v0, %v3874_v12 }
0x13b2   :  { %1654 = vmax.xlane.f32.xlu1 %v1653_v7 }
0x13b3   :  { %v1656_v9 = vsel %vm223_vm2, %v1652_v8, -inf }
0x13b4   :  { %1657 = vmax.xlane.f32.xlu0 %v1656_v9 }
0x13c3   :  { %1677 = vrot.lane.b32.xlu1 %v4125_v52, %s3665_s3 }
0x143f   :  { %v1655_v10 = vpop.xlane.xlu1 %1654 }
0x1440   :  { %v1659_v11 = vsub.f32 %v1651_v4, %v1655_v10 }
0x1441   :  { %v1658_v50 = vpop.xlane.xlu0 %1657 }
0x1442   :  { %v1661_v13 = vmul.f32 1.442695, %v1659_v11  ;;  %v1660_v42 = vsub.f32 %v1652_v8, %v1658_v50 }
0x1443   :  { %v1678_v38 = vpop.permute.xlu1 %1677 }
0x1444   :  { %3590 = vpow2.f32 %v1661_v13  ;;  %v1663_v39 = vmul.f32 1.442695, %v1660_v42  ;;  %v1683_v47 = vsel %vm352_vm5, %v1678_v38, 0 }
0x1445   :  { %3340 = vmatpush3.bf16.msra.mxu0 %v1683_v47 }
0x1446   :  { %3592 = vpow2.f32 %v1663_v39  ;;  %3351 = vmatprep.subr.bf16.mxu0 %v3660_v22 }
0x144e   :  { %v3591_v48 = vpop.eup %3590 }
0x144f   :  { %v1665_v14 = vsel %vm223_vm2, %v3591_v48, 0.0 }
0x1450   :  { %v3593_v15 = vpop.eup %3592  ;;  %1666 = vadd.xlane.f32.xlu1 %v1665_v14 }
0x1451   :  { %v1668_v16 = vsel %vm223_vm2, %v3593_v15, 0.0 }
0x1452   :  { %1669 = vadd.xlane.f32.xlu0 %v1668_v16 }
0x1461   :  { %1775 = vrot.lane.b32.xlu1 %v4125_v52, %s3666_s28 }
0x1465   :  { %1825 = vrot.lane.b32.xlu1 %v4127_v56, %s3666_s28  ;;  %s4467_s28 = smov 40  }
0x1468   :  { %1725 = vrot.lane.b32.xlu0 %v4127_v56, %s3665_s3  ;;  %s4466_s3 = smov 104  }
0x1469   :  { %1773 = vrot.lane.b32.xlu1 %v4125_v52, %s3667_s29 }
0x146c   :  { %1823 = vrot.lane.b32.xlu0 %v4127_v56, %s3667_s29  ;;  %s4468_s29 = smov 8  }
0x14dd   :  { %v1667_v17 = vpop.xlane.xlu1 %1666 }
0x14de   :  { %3594 = vrcp.f32 %v1667_v17 }
0x14df   :  { %v1670_v18 = vpop.xlane.xlu0 %1669 }
0x14e0   :  { %3596 = vrcp.f32 %v1670_v18 }
0x14e1   :  { %v1776_v21 = vpop.permute.xlu1 %1775 }
0x14e2   :  { %v1781_v28 = vsel %vm223_vm2, %v1776_v21, 0 }
0x14e3   :  { %v1726_v19 = vpop.permute.xlu0 %1725 }
0x14e4   :  { %v1731_v20 = vsel %vm352_vm5, %v1726_v19, 0 }
0x14e5   :  { %3346 = vmatpush3.bf16.msra.mxu1 %v1731_v20  ;;  %v1826_v27 = vpop.permute.xlu1 %1825 }
0x14e6   :  { %3357 = vmatprep.subr.bf16.mxu1 %v3660_v22  ;;  %v1831_v30 = vsel %vm223_vm2, %v1826_v27, 0 }
0x14e7   :  { %v1824_v32 = vpop.permute.xlu0 %1823 }
0x14e8   :  { %v3595_v23 = vpop.eup %3594 }
0x14e9   :  { %v1673_v46 = vmul.f32 %v3595_v23, %v3591_v48  ;;  %v1774_v31 = vpop.permute.xlu1 %1773 }
0x14ea   :  { %v3597_v24 = vpop.eup %3596 }
0x14eb   :  { %v1674_v25 = vmul.f32 %v3597_v24, %v3593_v15  ;;  %v1675_v26 = vpack.c.bf16 %v1673_v46, %v1673_v46 }
0x14ed   :  { %3342 = vmatmul.mubr.msk.bf16.vlgmr.msra.gmra.mrb[48].mxu0 %vm223_vm2, %v1675_v26  ;;  %v1676_v29 = vpack.c.bf16 %v1674_v25, %v1674_v25 }
0x14ee   :  { %3352 = vmatpush3.bf16.xpose.msra.mxu0 %v1781_v28  ;;  %3353 = vmatprep.mubr.msk.bf16.mxu0 %vm3661_vm1, %v3660_v22 }
0x14ef   :  { %3348 = vmatmul.mubr.msk.bf16.vlgmr.msra.gmra.mrb[44].mxu1 %vm223_vm2, %v1676_v29  ;;  %3363 = vmatprep.subr.bf16.mxu0 %v3660_v22 }
0x14f0   :  { %3358 = vmatpush3.bf16.xpose.msra.mxu1 %v1831_v30  ;;  %3359 = vmatprep.mubr.msk.bf16.mxu1 %vm3661_vm1, %v3660_v22 }
0x14f1   :  { %3369 = vmatprep.subr.bf16.mxu1 %v3660_v22 }
0x14f5   :  { %3354 = vmatmul.mubr.msk.bf16.vlgmr.msra.gmra.mrb[52].mxu0 %vm223_vm2, %v1774_v31 }
0x14f6   :  { %3365 = vmatprep.mubr.msk.bf16.mxu0 %vm3661_vm1, %v3660_v22 }
0x14f7   :  { %3360 = vmatmul.mubr.msk.bf16.vlgmr.msra.gmra.mrb[48].mxu1 %vm223_vm2, %v1824_v32 }
0x14f8   :  { %3371 = vmatprep.mubr.msk.bf16.mxu1 %vm3661_vm1, %v3660_v22 }
0x15c0   :  { %v4183_v33 = vpop.f32.mrb[48].mxu0 }
0x15c1   :  { %v3343_v34 = vpop.f32.mrb[49].mxu0 }
0x15c2   :  { %v1722_v35 = vpop.f32.mrb[50].mxu0  ;;  %v4185_v40 = vpop.f32.mrb[44].mxu1 }
0x15c3   :  { %v3344_v41 = vpop.f32.mrb[51].mxu0  ;;  %v3349_v43 = vpop.f32.mrb[45].mxu1 }
0x15c4   :  { %v1770_v44 = vpop.f32.mrb[46].mxu1 }
0x15c5   :  { %v3350_v45 = vpop.f32.mrb[47].mxu1 }
0x15c8   :  { %v1817_v49 = vpop.f32.mrb[52].mxu0 }
0x15c9   :  { %v1873_v53 = vmul.f32 0.35355338, %v1817_v49  ;;  %v3355_v54 = vpop.f32.mrb[53].mxu0 }
0x15ca   :  { %v1820_v57 = vpop.f32.mrb[54].mxu0  ;;  %v1867_v58 = vpop.f32.mrb[48].mxu1 }
0x15cb   :  { %v1874_v59 = vmul.f32 0.35355338, %v1867_v58  ;;  %v3356_v51 = vpop.f32.mrb[55].mxu0  ;;  %v3361_v55 = vpop.f32.mrb[49].mxu1  ;;  %v1875_v60 = vadd.f32 %v1873_v53, %v3871_v2 }
0x15cc   :  { %v1870_v61 = vpop.f32.mrb[50].mxu1 }
0x15cd   :  { %v3362_v62 = vpop.f32.mrb[51].mxu1  ;;  %v1877_v63 = vsel %vm223_vm2, %v1875_v60, -inf  ;;  %v1876_v0 = vadd.f32 %v1874_v59, %v3874_v12 }
0x15ce   :  { %1878 = vmax.xlane.f32.xlu1 %v1877_v63 }
0x15cf   :  { %v1880_v1 = vsel %vm223_vm2, %v1876_v0, -inf }
0x15d0   :  { %1881 = vmax.xlane.f32.xlu0 %v1880_v1 }
0x15df   :  { %1901 = vrot.lane.b32.xlu1 %v4125_v52, %s3668_s30 }
0x15e3   :  { %1999 = vrot.lane.b32.xlu1 %v4125_v52, %s3669_s4 }
0x15e7   :  { %2049 = vrot.lane.b32.xlu1 %v4127_v56, %s3669_s4 }
0x15eb   :  { %1997 = vrot.lane.b32.xlu1 %v4125_v52, %s3670_s0 }
0x165b   :  { %v1879_v3 = vpop.xlane.xlu1 %1878 }
0x165c   :  { %v1883_v4 = vsub.f32 %v1875_v60, %v1879_v3 }
0x165d   :  { %v1882_v5 = vpop.xlane.xlu0 %1881 }
0x165e   :  { %v1885_v6 = vmul.f32 1.442695, %v1883_v4  ;;  %v1884_v7 = vsub.f32 %v1876_v0, %v1882_v5 }
0x165f   :  { %v1902_v8 = vpop.permute.xlu1 %1901 }
0x1660   :  { %3598 = vpow2.f32 %v1885_v6  ;;  %v1887_v9 = vmul.f32 1.442695, %v1884_v7  ;;  %v1907_v10 = vsel %vm352_vm5, %v1902_v8, 0 }
0x1661   :  { %3364 = vmatpush3.bf16.msra.mxu0 %v1907_v10 }
0x1662   :  { %3600 = vpow2.f32 %v1887_v9  ;;  %3375 = vmatprep.subr.bf16.mxu0 %v3660_v22 }
0x1663   :  { %v2000_v15 = vpop.permute.xlu1 %1999 }
0x1664   :  { %v2005_v19 = vsel %vm223_vm2, %v2000_v15, 0 }
0x1667   :  { %v2050_v21 = vpop.permute.xlu1 %2049 }
0x1668   :  { %v2055_v46 = vsel %vm223_vm2, %v2050_v21, 0 }
0x166a   :  { %v3599_v11 = vpop.eup %3598 }
0x166b   :  { %v1889_v50 = vsel %vm223_vm2, %v3599_v11, 0.0  ;;  %v1998_v24 = vpop.permute.xlu1 %1997 }
0x166c   :  { %v3601_v13 = vpop.eup %3600  ;;  %1890 = vadd.xlane.f32.xlu0 %v1889_v50 }
0x166d   :  { %v1892_v42 = vsel %vm223_vm2, %v3601_v13, 0.0 }
0x1670   :  { %1893 = vadd.xlane.f32.xlu0 %v1892_v42 }
0x1686   :  { %1949 = vrot.lane.b32.xlu0 %v4127_v56, %s3668_s30  ;;  %s4469_s30 = smov 16  }
0x168a   :  { %2047 = vrot.lane.b32.xlu0 %v4127_v56, %s3670_s0 }
0x16f9   :  { %v1891_v38 = vpop.xlane.xlu0 %1890 }
0x16fa   :  { %3602 = vrcp.f32 %v1891_v38 }
0x16fd   :  { %v1894_v39 = vpop.xlane.xlu0 %1893 }
0x16fe   :  { %3604 = vrcp.f32 %v1894_v39 }
0x1701   :  { %v1950_v47 = vpop.permute.xlu0 %1949 }
0x1702   :  { %v1955_v48 = vsel %vm352_vm5, %v1950_v47, 0 }
0x1703   :  { %3370 = vmatpush3.bf16.msra.mxu1 %v1955_v48 }
0x1704   :  { %v3603_v14 = vpop.eup %3602  ;;  %3381 = vmatprep.subr.bf16.mxu1 %v3660_v22 }
0x1705   :  { %v1897_v16 = vmul.f32 %v3603_v14, %v3599_v11  ;;  %v2048_v25 = vpop.permute.xlu0 %2047 }
0x1707   :  { %v1899_v17 = vpack.c.bf16 %v1897_v16, %v1897_v16 }
0x1708   :  { %v3605_v18 = vpop.eup %3604 }
0x1709   :  { %v1898_v20 = vmul.f32 %v3605_v18, %v3601_v13  ;;  %3366 = vmatmul.mubr.msk.bf16.vlgmr.msra.gmra.mrb[56].mxu0 %vm223_vm2, %v1899_v17 }
0x170a   :  { %3376 = vmatpush3.bf16.xpose.msra.mxu0 %v2005_v19  ;;  %3377 = vmatprep.mubr.msk.bf16.mxu0 %vm3661_vm1, %v3660_v22 }
0x170b   :  { %v1900_v23 = vpack.c.bf16 %v1898_v20, %v1898_v20  ;;  %3387 = vmatprep.subr.bf16.mxu0 %v3660_v22 }
0x170d   :  { %3372 = vmatmul.mubr.msk.bf16.vlgmr.msra.gmra.mrb[52].mxu1 %vm223_vm2, %v1900_v23 }
0x170e   :  { %3382 = vmatpush3.bf16.xpose.msra.mxu1 %v2055_v46  ;;  %3383 = vmatprep.mubr.msk.bf16.mxu1 %vm3661_vm1, %v3660_v22 }
0x170f   :  { %3393 = vmatprep.subr.bf16.mxu1 %v3660_v22 }
0x1711   :  { %3378 = vmatmul.mubr.msk.bf16.vlgmr.msra.gmra.mrb[60].mxu0 %vm223_vm2, %v1998_v24 }
0x1712   :  { %3389 = vmatprep.mubr.msk.bf16.mxu0 %vm3661_vm1, %v3660_v22 }
0x1715   :  { %3384 = vmatmul.mubr.msk.bf16.vlgmr.msra.gmra.mrb[56].mxu1 %vm223_vm2, %v2048_v25 }
0x1716   :  { %3395 = vmatprep.mubr.msk.bf16.mxu1 %vm3661_vm1, %v3660_v22 }
0x17dc   :  { %v4225_v26 = vpop.f32.mrb[56].mxu0 }
0x17dd   :  { %v3367_v27 = vpop.f32.mrb[57].mxu0 }
0x17de   :  { %v1946_v28 = vpop.f32.mrb[58].mxu0 }
0x17df   :  { %v3368_v29 = vpop.f32.mrb[59].mxu0 }
0x17e0   :  { %v4227_v30 = vpop.f32.mrb[52].mxu1 }
0x17e1   :  { %v3502_v31 = vpack.i.bf16 %v4227_v30, %v4225_v26  ;;  %v3373_v32 = vpop.f32.mrb[53].mxu1 }
0x17e2   :  { %v1994_v34 = vpop.f32.mrb[54].mxu1 }
0x17e3   :  { %v3374_v35 = vpop.f32.mrb[55].mxu1 }
0x17e4   :  { %v2041_v41 = vpop.f32.mrb[60].mxu0 }
0x17e5   :  { %v2097_v43 = vmul.f32 0.35355338, %v2041_v41  ;;  %v3379_v44 = vpop.f32.mrb[61].mxu0 }
0x17e6   :  { %v2044_v45 = vpop.f32.mrb[62].mxu0 }
0x17e7   :  { %v3380_v49 = vpop.f32.mrb[63].mxu0  ;;  %v2099_v53 = vadd.f32 %v2097_v43, %v3871_v2 }
0x17e8   :  { %v2091_v54 = vpop.f32.mrb[56].mxu1 }
0x17e9   :  { %v2098_v57 = vmul.f32 0.35355338, %v2091_v54  ;;  %v3385_v58 = vpop.f32.mrb[57].mxu1  ;;  %v2101_v59 = vsel %vm223_vm2, %v2099_v53, -inf }
0x17ea   :  { %2102 = vmax.xlane.f32.xlu1 %v2101_v59  ;;  %v2094_v51 = vpop.f32.mrb[58].mxu1 }
0x17eb   :  { %v3386_v55 = vpop.f32.mrb[59].mxu1  ;;  %v2100_v60 = vadd.f32 %v2098_v57, %v3874_v12 }
0x17ed   :  { %v2104_v61 = vsel %vm223_vm2, %v2100_v60, -inf }
0x17ee   :  { %2105 = vmax.xlane.f32.xlu0 %v2104_v61 }
0x17fb   :  { %2125 = vrot.lane.b32.xlu1 %v4125_v52, %s4464_s7 }
0x17ff   :  { %2223 = vrot.lane.b32.xlu1 %v4125_v52, %s4465_s24 }
0x1803   :  { %2273 = vrot.lane.b32.xlu1 %v4127_v56, %s4465_s24 }
0x1807   :  { %2221 = vrot.lane.b32.xlu1 %v4125_v52, %s4466_s3 }
0x1877   :  { %v2103_v62 = vpop.xlane.xlu1 %2102 }
0x1878   :  { %v2107_v63 = vsub.f32 %v2099_v53, %v2103_v62 }
0x187a   :  { %v2109_v0 = vmul.f32 1.442695, %v2107_v63 }
0x187b   :  { %v2126_v1 = vpop.permute.xlu1 %2125  ;;  %v2106_v3 = vpop.xlane.xlu0 %2105 }
0x187c   :  { %3606 = vpow2.f32 %v2109_v0  ;;  %v2131_v4 = vsel %vm352_vm5, %v2126_v1, 0  ;;  %v2108_v5 = vsub.f32 %v2100_v60, %v2106_v3 }
0x187d   :  { %3388 = vmatpush3.bf16.msra.mxu0 %v2131_v4 }
0x187e   :  { %v2111_v6 = vmul.f32 1.442695, %v2108_v5  ;;  %3399 = vmatprep.subr.bf16.mxu0 %v3660_v22 }
0x187f   :  { %v2224_v39 = vpop.permute.xlu1 %2223 }
0x1880   :  { %3608 = vpow2.f32 %v2111_v6  ;;  %v2229_v15 = vsel %vm223_vm2, %v2224_v39, 0 }
0x1883   :  { %v2274_v17 = vpop.permute.xlu1 %2273 }
0x1884   :  { %v2279_v19 = vsel %vm223_vm2, %v2274_v17, 0 }
0x1886   :  { %v3607_v7 = vpop.eup %3606 }
0x1887   :  { %v2113_v8 = vsel %vm223_vm2, %v3607_v7, 0.0  ;;  %v2222_v20 = vpop.permute.xlu1 %2221 }
0x1888   :  { %2114 = vadd.xlane.f32.xlu0 %v2113_v8 }
0x188a   :  { %v3609_v9 = vpop.eup %3608 }
0x188b   :  { %v2116_v10 = vsel %vm223_vm2, %v3609_v9, 0.0 }
0x188c   :  { %2117 = vadd.xlane.f32.xlu0 %v2116_v10 }
0x18a2   :  { %2173 = vrot.lane.b32.xlu0 %v4127_v56, %s4464_s7 }
0x18a6   :  { %2271 = vrot.lane.b32.xlu0 %v4127_v56, %s4466_s3 }
0x1915   :  { %v2115_v11 = vpop.xlane.xlu0 %2114 }
0x1916   :  { %3610 = vrcp.f32 %v2115_v11 }
0x1919   :  { %v2118_v50 = vpop.xlane.xlu0 %2117 }
0x191a   :  { %3612 = vrcp.f32 %v2118_v50 }
0x191d   :  { %v2174_v13 = vpop.permute.xlu0 %2173 }
0x191e   :  { %v2179_v42 = vsel %vm352_vm5, %v2174_v13, 0  ;;  %v3530_v13 = vld [vmem:[%s4417_s8 + $0x10] sm:$0xff]  }
0x191f   :  { %3394 = vmatpush3.bf16.msra.mxu1 %v2179_v42  ;;  %v3531_v42 = vld [vmem:[%s4417_s8 + $0x18] sm:$0xff]  }
0x1920   :  { %v3611_v38 = vpop.eup %3610  ;;  %3405 = vmatprep.subr.bf16.mxu1 %v3660_v22 }
0x1921   :  { %v2121_v47 = vmul.f32 %v3611_v38, %v3607_v7  ;;  %v2272_v21 = vpop.permute.xlu0 %2271 }
0x1923   :  { %v2123_v48 = vpack.c.bf16 %v2121_v47, %v2121_v47 }
0x1924   :  { %v3613_v14 = vpop.eup %3612 }
0x1925   :  { %v2122_v16 = vmul.f32 %v3613_v14, %v3609_v9  ;;  %3390 = vmatmul.mubr.msk.bf16.vlgmr.msra.gmra.mrb[64].mxu0 %vm223_vm2, %v2123_v48 }
0x1926   :  { %3400 = vmatpush3.bf16.xpose.msra.mxu0 %v2229_v15  ;;  %3401 = vmatprep.mubr.msk.bf16.mxu0 %vm3661_vm1, %v3660_v22 }
0x1927   :  { %v2124_v18 = vpack.c.bf16 %v2122_v16, %v2122_v16  ;;  %3411 = vmatprep.subr.bf16.mxu0 %v3660_v22 }
0x1929   :  { %3396 = vmatmul.mubr.msk.bf16.vlgmr.msra.gmra.mrb[60].mxu1 %vm223_vm2, %v2124_v18 }
0x192a   :  { %3406 = vmatpush3.bf16.xpose.msra.mxu1 %v2279_v19  ;;  %3407 = vmatprep.mubr.msk.bf16.mxu1 %vm3661_vm1, %v3660_v22 }
0x192b   :  { %3417 = vmatprep.subr.bf16.mxu1 %v3660_v22 }
0x192d   :  { %3402 = vmatmul.mubr.msk.bf16.vlgmr.msra.gmra.mrb[68].mxu0 %vm223_vm2, %v2222_v20 }
0x192e   :  { %3413 = vmatprep.mubr.msk.bf16.mxu0 %vm3661_vm1, %v3660_v22 }
0x1931   :  { %3408 = vmatmul.mubr.msk.bf16.vlgmr.msra.gmra.mrb[64].mxu1 %vm223_vm2, %v2272_v21 }
0x1932   :  { %3419 = vmatprep.mubr.msk.bf16.mxu1 %vm3661_vm1, %v3660_v22 }
0x19f8   :  { %v2167_v23 = vpop.f32.mrb[64].mxu0 }
0x19f9   :  { %v3391_v46 = vpop.f32.mrb[65].mxu0 }
0x19fa   :  { %v2170_v24 = vpop.f32.mrb[66].mxu0 }
0x19fb   :  { %v3392_v25 = vpop.f32.mrb[67].mxu0 }
0x19fc   :  { %v2215_v27 = vpop.f32.mrb[60].mxu1 }
0x19fd   :  { %v3507_v28 = vpack.i.bf16 %v2215_v27, %v2167_v23  ;;  %v3397_v29 = vpop.f32.mrb[61].mxu1 }
0x19fe   :  { %v2218_v32 = vpop.f32.mrb[62].mxu1 }
0x19ff   :  { %v3398_v34 = vpop.f32.mrb[63].mxu1 }
0x1a00   :  { %v2265_v35 = vpop.f32.mrb[68].mxu0 }
0x1a01   :  { %v2321_v41 = vmul.f32 0.35355338, %v2265_v35  ;;  %v3403_v43 = vpop.f32.mrb[69].mxu0 }
0x1a02   :  { %v2268_v44 = vpop.f32.mrb[70].mxu0 }
0x1a03   :  { %v3404_v45 = vpop.f32.mrb[71].mxu0  ;;  %v2323_v49 = vadd.f32 %v2321_v41, %v3871_v2 }
0x1a04   :  { %v2315_v53 = vpop.f32.mrb[64].mxu1 }
0x1a05   :  { %v2322_v54 = vmul.f32 0.35355338, %v2315_v53  ;;  %v3409_v57 = vpop.f32.mrb[65].mxu1  ;;  %v2325_v58 = vsel %vm223_vm2, %v2323_v49, -inf }
0x1a06   :  { %2326 = vmax.xlane.f32.xlu1 %v2325_v58  ;;  %v2318_v59 = vpop.f32.mrb[66].mxu1 }
0x1a07   :  { %v3410_v51 = vpop.f32.mrb[67].mxu1  ;;  %v2324_v55 = vadd.f32 %v2322_v54, %v3874_v12 }
0x1a09   :  { %v2328_v60 = vsel %vm223_vm2, %v2324_v55, -inf }
0x1a0a   :  { %2329 = vmax.xlane.f32.xlu0 %v2328_v60 }
0x1a17   :  { %2349 = vrot.lane.b32.xlu1 %v4125_v52, %s4467_s28 }
0x1a1b   :  { %3503 = vrot.lane.b32.xlu1 %v3502_v31, %s4468_s29 }
0x1a1f   :  { %3508 = vrot.lane.b32.xlu1 %v3507_v28, %s4469_s30 }
0x1a93   :  { %v2327_v2 = vpop.xlane.xlu1 %2326 }
0x1a94   :  { %v2331_v61 = vsub.f32 %v2323_v49, %v2327_v2 }
0x1a96   :  { %v2333_v62 = vmul.f32 1.442695, %v2331_v61 }
0x1a97   :  { %v2350_v63 = vpop.permute.xlu1 %2349  ;;  %v2330_v0 = vpop.xlane.xlu0 %2329 }
0x1a98   :  { %3614 = vpow2.f32 %v2333_v62  ;;  %v2355_v12 = vsel %vm352_vm5, %v2350_v63, 0  ;;  %v2332_v1 = vsub.f32 %v2324_v55, %v2330_v0 }
0x1a99   :  { %3412 = vmatpush3.bf16.msra.mxu0 %v2355_v12 }
0x1a9a   :  { %v2335_v3 = vmul.f32 1.442695, %v2332_v1  ;;  %3423 = vmatprep.subr.bf16.mxu0 %v3660_v22 }
0x1a9b   :  { %v3504_v19 = vpop.permute.xlu1 %3503 }
0x1a9c   :  { %3616 = vpow2.f32 %v2335_v3  ;;  %v3506_v21 = vunpack.i.h.bf16 %v3504_v19  ;;  %v3505_v23 = vunpack.i.l.bf16 %v3504_v19 }
0x1a9e   :  { %v2470_v27 = vsel %vm223_vm2, %v4185_v40, %v3506_v21  ;;  %v2469_v28 = vsel %vm223_vm2, %v4183_v33, %v3505_v23  ;;  %v3045_v33 = vld [vmem:[%s4418_s9 + $0x1] ss:$0 sm:$0xff] }
0x1a9f   :  { %v3509_v20 = vpop.permute.xlu1 %3508 }
0x1aa0   :  { %v3511_v46 = vunpack.i.h.bf16 %v3509_v20  ;;  %v3510_v24 = vunpack.i.l.bf16 %v3509_v20 }
0x1aa2   :  { %v3615_v52 = vpop.eup %3614  ;;  %v2472_v34 = vsel %vm1142_vm6, %v2470_v27, %v3511_v46  ;;  %v2471_v35 = vsel %vm1142_vm6, %v2469_v28, %v3510_v24 }
0x1aa3   :  { %v2337_v26 = vsel %vm223_vm2, %v3615_v52, 0.0 }
0x1aa4   :  { %2338 = vadd.xlane.f32.xlu0 %v2337_v26 }
0x1aa6   :  { %v3617_v30 = vpop.eup %3616 }
0x1aa7   :  { %v2340_v31 = vsel %vm223_vm2, %v3617_v30, 0.0 }
0x1aa8   :  { %2341 = vadd.xlane.f32.xlu0 %v2340_v31 }
0x1abe   :  { %2397 = vrot.lane.b32.xlu0 %v4127_v56, %s4467_s28 }
0x1b31   :  { %v2339_v4 = vpop.xlane.xlu0 %2338 }
0x1b32   :  { %3618 = vrcp.f32 %v2339_v4 }
0x1b35   :  { %v2342_v5 = vpop.xlane.xlu0 %2341 }
0x1b36   :  { %3620 = vrcp.f32 %v2342_v5 }
0x1b39   :  { %v2398_v6 = vpop.permute.xlu0 %2397 }
0x1b3a   :  { %v2403_v7 = vsel %vm352_vm5, %v2398_v6, 0 }
0x1b3b   :  { %3418 = vmatpush3.bf16.msra.mxu1 %v2403_v7 }
0x1b3c   :  { %v3619_v8 = vpop.eup %3618  ;;  %3431 = vmatprep.subr.bf16.mxu1 %v3660_v22 }
0x1b3d   :  { %v2345_v9 = vmul.f32 %v3619_v8, %v3615_v52  ;;  %v3533_v52 = vld [vmem:[%s4421_s12 + $0x18] sm:$0xff]  }
0x1b3f   :  { %v2347_v10 = vpack.c.bf16 %v2345_v9, %v2345_v9  ;;  %v3051_v9 = vld [vmem:[%s4419_s10 + $0x1] ss:$0 sm:$0xff] }
0x1b40   :  { %v3621_v11 = vpop.eup %3620 }
0x1b41   :  { %v2346_v50 = vmul.f32 %v3621_v11, %v3617_v30  ;;  %3414 = vmatmul.mubr.msk.bf16.vlgmr.msra.gmra.mrb[72].mxu0 %vm223_vm2, %v2347_v10 }
0x1b42   :  { %3427 = vmatprep.mubr.msk.bf16.mxu0 %vm3661_vm1, %v3660_v22  ;;  %3424 = vmatpush3.bf16.msra.mxu0 %v3530_v13 }
0x1b43   :  { %v2348_v56 = vpack.c.bf16 %v2346_v50, %v2346_v50  ;;  %3425 = vmatprep.subr.bf16.mxu0 %v3660_v22 }
0x1b45   :  { %3420 = vmatmul.mubr.msk.bf16.vlgmr.msra.gmra.mrb[68].mxu1 %vm223_vm2, %v2348_v56  ;;  %v3052_v56 = vld [vmem:[%s4420_s11 + $0x1] ss:$0 sm:$0xff] }
0x1b46   :  { %3435 = vmatprep.mubr.msk.bf16.mxu1 %vm3661_vm1, %v3660_v22  ;;  %3426 = vmatpush3.bf16.msra.mxu0 %v3531_v42 }
0x1b47   :  { %3439 = vmatprep.subr.bf16.mxu0 %v3660_v22 }
0x1c14   :  { %v2391_v38 = vpop.f32.mrb[72].mxu0 }
0x1c15   :  { %v3415_v39 = vpop.f32.mrb[73].mxu0 }
0x1c16   :  { %v2394_v47 = vpop.f32.mrb[74].mxu0 }
0x1c17   :  { %v3416_v48 = vpop.f32.mrb[75].mxu0  ;;  %v3534_v47 = vld [vmem:[%s4423_s14 + $0x20] sm:$0xff]  }
0x1c18   :  { %v2439_v14 = vpop.f32.mrb[68].mxu1  ;;  %v3535_v48 = vld [vmem:[%s4423_s14 + $0x28] sm:$0xff]  }
0x1c19   :  { %v3512_v15 = vpack.i.bf16 %v2439_v14, %v2391_v38  ;;  %v3421_v16 = vpop.f32.mrb[69].mxu1  ;;  %v3536_v14 = vld [vmem:[%s4423_s14 + $0x30] sm:$0xff]  }
0x1c1a   :  { %v2442_v17 = vpop.f32.mrb[70].mxu1  ;;  %v3058_v16 = vld [vmem:[%s4422_s13 + $0x1] ss:$0 sm:$0xff] }
0x1c1b   :  { %3513 = vrot.lane.b32.xlu1 %v3512_v15, %s4470_s5  ;;  %v3422_v18 = vpop.f32.mrb[71].mxu1  ;;  %v3537_v15 = vld [vmem:[%s4423_s14 + $0x38] sm:$0xff]  }
0x1c8d   :  { %v3514_v25 = vpop.permute.xlu1 %3513 }
0x1c8e   :  { %v3516_v29 = vunpack.i.h.bf16 %v3514_v25  ;;  %v3515_v32 = vunpack.i.l.bf16 %v3514_v25 }
0x1c90   :  { %v2474_v41 = vsel %vm1145_vm7, %v2472_v34, %v3516_v29  ;;  %v2473_v43 = vsel %vm1145_vm7, %v2471_v35, %v3515_v32 }
0x1c91   :  { %v2480_v44 = vpack.c.bf16 %v2474_v41, %v2473_v43 }
0x1c93   :  { %3428 = vmatmul.mubr.msk.bf16.vlgmr.msra.gmra.mrb[76].mxu0 %vm106_vm0, %v2480_v44 }
0x1c94   :  { %3447 = vmatprep.mubr.msk.bf16.mxu0 %vm3661_vm1, %v3660_v22  ;;  %3440 = vmatpush3.bf16.msra.mxu0 %v3534_v47  ;;  %v3080_v47 = vld [vmem:[%s4463_s1 + $0x1] ss:$0 sm:$0xff] }
0x1c95   :  { %3441 = vmatprep.subr.bf16.mxu0 %v3660_v22 }
0x1c98   :  { %3442 = vmatpush3.bf16.msra.mxu0 %v3535_v48 }
0x1c99   :  { %3443 = vmatprep.subr.bf16.mxu0 %v3660_v22 }
0x1c9c   :  { %3444 = vmatpush3.bf16.msra.mxu0 %v3536_v14 }
0x1c9d   :  { %3445 = vmatprep.subr.bf16.mxu0 %v3660_v22 }
0x1ca0   :  { %3446 = vmatpush3.bf16.msra.mxu0 %v3537_v15 }
0x1d66   :  { %v2538_v40 = vpop.f32.mrb[76].mxu0 }
0x1d67   :  { %v2539_v45 = vadd.f32 %v3045_v33, %v2538_v40  ;;  %v3429_v49 = vpop.f32.mrb[77].mxu0 }
0x1d68   :  { %v2541_v53 = vpop.f32.mrb[78].mxu0 }
0x1d69   :  { %v2542_v54 = vadd.f32 %v3045_v33, %v2541_v53  ;;  %v3430_v57 = vpop.f32.mrb[79].mxu0  ;;  %v2545_v58 = vadd.f32 %v2539_v45, %v4113_v36 }
0x1d6b   :  { %v2546_v59 = vadd.f32 %v2542_v54, %v4115_v37  ;;  %v2551_v51 = vsel %vm106_vm0, %v2545_v58, 0.0  ;;  %v3532_v37 = vld [vmem:[%s4421_s12 + $0x10] sm:$0xff]  }
0x1d6c   :  { %2552 = vadd.xlane.f32.xlu0 %v2551_v51  ;;  %3432 = vmatpush3.bf16.msra.mxu1 %v3532_v37 }
0x1d6d   :  { %v2554_v55 = vsel %vm106_vm0, %v2546_v59, 0.0  ;;  %3433 = vmatprep.subr.bf16.mxu1 %v3660_v22 }
0x1d6e   :  { %2555 = vadd.xlane.f32.xlu1 %v2554_v55 }
0x1d70   :  { %3434 = vmatpush3.bf16.msra.mxu1 %v3533_v52 }
0x1d71   :  { %3451 = vmatprep.subr.bf16.mxu1 %v3660_v22 }
0x1df9   :  { %v2553_v60 = vpop.xlane.xlu0 %2552 }
0x1dfa   :  { %v2557_v2 = vmul.f32 0.03125, %v2553_v60 }
0x1dfb   :  { %v2556_v61 = vpop.xlane.xlu1 %2555 }
0x1dfc   :  { %v2559_v62 = vsub.f32 %v2545_v58, %v2557_v2  ;;  %v2558_v63 = vmul.f32 0.03125, %v2556_v61  ;;  %v3071_v58 = vld [vmem:[%s4424_s15 + $0x1] ss:$0 sm:$0xff] }
0x1dfe   :  { %v2560_v0 = vsub.f32 %v2546_v59, %v2558_v63  ;;  %v2561_v12 = vmul.f32 %v2559_v62, %v2559_v62 }
0x1e00   :  { %v2563_v1 = vsel %vm106_vm0, %v2561_v12, 0.0  ;;  %v2562_v3 = vmul.f32 %v2560_v0, %v2560_v0 }
0x1e01   :  { %2564 = vadd.xlane.f32.xlu0 %v2563_v1 }
0x1e02   :  { %v2566_v36 = vsel %vm106_vm0, %v2562_v3, 0.0 }
0x1e05   :  { %2567 = vadd.xlane.f32.xlu0 %v2566_v36 }
0x1e8e   :  { %v2565_v26 = vpop.xlane.xlu0 %2564 }
0x1e8f   :  { %v2569_v30 = vmul.f32 0.03125, %v2565_v26 }
0x1e91   :  { %v2571_v31 = vadd.f32 1e-12, %v2569_v30 }
0x1e92   :  { %v2568_v4 = vpop.xlane.xlu0 %2567 }
0x1e93   :  { %3622 = vrsqrt.f32 %v2571_v31  ;;  %v2570_v5 = vmul.f32 0.03125, %v2568_v4 }
0x1e95   :  { %v2572_v6 = vadd.f32 1e-12, %v2570_v5 }
0x1e97   :  { %3624 = vrsqrt.f32 %v2572_v6  ;;  %v3538_v6 = vld [vmem:[%s4427_s18] sm:$0xff]  }
0x1e9d   :  { %v3623_v7 = vpop.eup %3622 }
0x1e9e   :  { %v2575_v8 = vmul.f32 %v3623_v7, %v2559_v62  ;;  %v3539_v7 = vld [vmem:[%s4427_s18 + $0x8] sm:$0xff]  }
0x1ea0   :  { %v2583_v11 = vmul.f32 %v3051_v9, %v2575_v8 }
0x1ea1   :  { %v3625_v10 = vpop.eup %3624 }
0x1ea2   :  { %v2576_v50 = vmul.f32 %v3625_v10, %v2560_v0  ;;  %v2591_v42 = vadd.f32 %v3052_v56, %v2583_v11 }
0x1ea4   :  { %v2584_v13 = vmul.f32 %v3051_v9, %v2576_v50 }
0x1ea6   :  { %v2592_v38 = vadd.f32 %v3052_v56, %v2584_v13 }
0x1ea8   :  { %v2598_v39 = vpack.c.bf16 %v2592_v38, %v2591_v42 }
0x1eaa   :  { %3436 = vmatmul.mubr.msk.bf16.vlgmr.msra.gmra.mrb[72].mxu1 %vm106_vm0, %v2598_v39 }
0x1eab   :  { %3455 = vmatprep.mubr.msk.bf16.mxu1 %vm3661_vm1, %v3660_v22  ;;  %3452 = vmatpush3.bf16.msra.mxu1 %v3538_v6 }
0x1eac   :  { %3453 = vmatprep.subr.bf16.mxu1 %v3660_v22 }
0x1eaf   :  { %3454 = vmatpush3.bf16.msra.mxu1 %v3539_v7 }
0x1eb0   :  { %3459 = vmatprep.subr.bf16.mxu1 %v3660_v22 }
0x1f7d   :  { %v2656_v17 = vpop.f32.mrb[72].mxu1 }
0x1f7e   :  { %v2657_v18 = vadd.f32 %v3058_v16, %v2656_v17  ;;  %v3437_v19 = vpop.f32.mrb[73].mxu1 }
0x1f7f   :  { %v2659_v20 = vpop.f32.mrb[74].mxu1 }
0x1f80   :  { %v2665_v21 = vmul.f32 0.044715, %v2657_v18  ;;  %v2660_v23 = vadd.f32 %v3058_v16, %v2659_v20  ;;  %v3438_v46 = vpop.f32.mrb[75].mxu1  ;;  %v2663_v40 = vmul.f32 0.5, %v2657_v18 }
0x1f82   :  { %v2667_v24 = vmul.f32 %v2665_v21, %v2657_v18  ;;  %v2666_v25 = vmul.f32 0.044715, %v2660_v23  ;;  %v2664_v45 = vmul.f32 0.5, %v2660_v23 }
0x1f84   :  { %v2669_v27 = vmul.f32 %v2667_v24, %v2657_v18  ;;  %v2668_v28 = vmul.f32 %v2666_v25, %v2660_v23  ;;  %v3540_v25 = vld [vmem:[%s4429_s20] sm:$0xff]  }
0x1f86   :  { %v2671_v29 = vadd.f32 %v2669_v27, %v2657_v18  ;;  %v2670_v32 = vmul.f32 %v2668_v28, %v2660_v23  ;;  %v3541_v27 = vld [vmem:[%s4429_s20 + $0x8] sm:$0xff]   ;;  %v3081_v28 = vld [vmem:[%s4428_s19] ss:$0 sm:$0xff]  ;;  %s3678_s20 = smov [#allocation2]  }
0x1f87   :  { %s2967_s28 = sshll.u32 %s3678_s20, 4  ;;  %s2968_s28 = int_to_ptr.vmem [resolvable:$true] %s2967_s28 }
0x1f88   :  { %v2673_v34 = vmul.f32 0.7978846, %v2671_v29  ;;  %v2672_v35 = vadd.f32 %v2670_v32, %v2660_v23  ;;  %s3636_s19 = scalar_lea.vmem %s2968_s28, 32  ;;  %p3641_p1 = scmp.lt.s32.totalorder %s2968_s28, %s2968_s28 }
0x1f89   :  { %p3637_p0 = scmp.ne.s32.totalorder %s2968_s28, %s3636_s19  ;;  %p3642_p2 = scmp.lt.s32.totalorder %s3636_s19, %s3636_s19 }
0x1f8a   :  { %3626 = vtanh.f32 %v2673_v34  ;;  %v2674_v41 = vmul.f32 0.7978846, %v2672_v35 }
0x1f8b   :  { %p3643_p3 = por %p3642_p2, %p3641_p1 }
0x1f8c   :  { %3628 = vtanh.f32 %v2674_v41 }
0x1f8d   :  { %p3644_p4 = pnand %p3643_p3, %p3637_p0 }
0x1f94   :  { %v3627_v43 = vpop.eup %3626 }
0x1f95   :  { %v2677_v44 = vadd.f32 1.0, %v3627_v43 }
0x1f96   :  { %v3629_v33 = vpop.eup %3628 }
0x1f97   :  { %v2678_v49 = vadd.f32 1.0, %v3629_v33  ;;  %v2679_v53 = vmul.f32 %v2677_v44, %v2663_v40 }
0x1f99   :  { %v2680_v54 = vmul.f32 %v2678_v49, %v2664_v45 }
0x1f9b   :  { %v2690_v57 = vpack.c.bf16 %v2680_v54, %v2679_v53 }
0x1f9d   :  { %3448 = vmatmul.mubr.msk.bf16.vlgmr.msra.gmra.mrb[80].mxu0 %vm1388_vm8, %v2690_v57 }
0x2070   :  { %v2760_v59 = vpop.f32.mrb[80].mxu0 }
0x2071   :  { %v2761_v51 = vadd.f32 %v3071_v58, %v2760_v59  ;;  %v3449_v55 = vpop.f32.mrb[81].mxu0 }
0x2072   :  { %v2763_v60 = vpop.f32.mrb[82].mxu0 }
0x2073   :  { %v2767_v2 = vadd.f32 %v2761_v51, %v2591_v42  ;;  %v2764_v61 = vadd.f32 %v3071_v58, %v2763_v60  ;;  %v3450_v62 = vpop.f32.mrb[83].mxu0  ;;  %v3079_v42 = vld [vmem:[%s4425_s16 + $0x1] ss:$0 sm:$0xff] }
0x2075   :  { %v2768_v63 = vadd.f32 %v2764_v61, %v2592_v38  ;;  %v2773_v0 = vsel %vm106_vm0, %v2767_v2, 0.0 }
0x2076   :  { %2774 = vadd.xlane.f32.xlu1 %v2773_v0 }
0x2077   :  { %v2776_v12 = vsel %vm106_vm0, %v2768_v63, 0.0 }
0x2078   :  { %2777 = vadd.xlane.f32.xlu0 %v2776_v12 }
0x2103   :  { %v2775_v1 = vpop.xlane.xlu1 %2774 }
0x2104   :  { %v2779_v3 = vmul.f32 0.03125, %v2775_v1 }
0x2105   :  { %v2778_v36 = vpop.xlane.xlu0 %2777 }
0x2106   :  { %v2781_v37 = vsub.f32 %v2767_v2, %v2779_v3  ;;  %v2780_v52 = vmul.f32 0.03125, %v2778_v36 }
0x2108   :  { %v2782_v26 = vsub.f32 %v2768_v63, %v2780_v52  ;;  %v2783_v30 = vmul.f32 %v2781_v37, %v2781_v37 }
0x210a   :  { %v2785_v31 = vsel %vm106_vm0, %v2783_v30, 0.0  ;;  %v2784_v4 = vmul.f32 %v2782_v26, %v2782_v26 }
0x210b   :  { %2786 = vadd.xlane.f32.xlu1 %v2785_v31 }
0x210c   :  { %v2788_v5 = vsel %vm106_vm0, %v2784_v4, 0.0 }
0x210d   :  { %2789 = vadd.xlane.f32.xlu0 %v2788_v5 }
0x2198   :  { %v2787_v8 = vpop.xlane.xlu1 %2786 }
0x2199   :  { %v2791_v9 = vmul.f32 0.03125, %v2787_v8 }
0x219a   :  { %v2790_v10 = vpop.xlane.xlu0 %2789 }
0x219b   :  { %v2793_v11 = vadd.f32 1e-12, %v2791_v9  ;;  %v2792_v50 = vmul.f32 0.03125, %v2790_v10 }
0x219d   :  { %3630 = vrsqrt.f32 %v2793_v11  ;;  %v2794_v56 = vadd.f32 1e-12, %v2792_v50 }
0x219f   :  { %3632 = vrsqrt.f32 %v2794_v56 }
0x21a7   :  { %v3631_v13 = vpop.eup %3630 }
0x21a8   :  { %v2797_v38 = vmul.f32 %v3631_v13, %v2781_v37 }
0x21a9   :  { %v3633_v39 = vpop.eup %3632 }
0x21aa   :  { %v2805_v48 = vmul.f32 %v3079_v42, %v2797_v38  ;;  %v2798_v14 = vmul.f32 %v3633_v39, %v2782_v26 }
0x21ac   :  { %v2813_v15 = vadd.f32 %v3080_v47, %v2805_v48  ;;  %v2806_v16 = vmul.f32 %v3079_v42, %v2798_v14 }
0x21ae   :  { %v2814_v17 = vadd.f32 %v3080_v47, %v2806_v16  ;;  %v2819_v18 = vpack.c.bf16 %v2813_v15, %v2813_v15 }
0x21b0   :  { %v2820_v19 = vpack.c.bf16 %v2814_v17, %v2814_v17  ;;  %v2830_v21 = vunpack.c.l.b16 %v2819_v18 }
0x21b2   :  { %v2831_v20 = vunpack.c.l.b16 %v2820_v19 }
0x21b4   :  { %v2832_v23 = vrot.slane %v2831_v20, 7 }
0x21b6   :  { %v2834_v46 = vsel %vm2833_vm9, %v2832_v23, %v2830_v21 }
0x21b7   :  { %v2835_v24 = vpack.c.b16 %v2834_v46, %v2834_v46 }
0x21b9   :  { %3456 = vmatmul.mubr.msk.bf16.vlgmr.msra.gmra.mrb[76].mxu1 %vm106_vm0, %v2835_v24 }
0x21ba   :  { %3463 = vmatprep.mubr.msk.bf16.mxu1 %vm3661_vm1, %v3660_v22  ;;  %3460 = vmatpush3.bf16.msra.mxu1 %v3540_v25 }
0x21bb   :  { %3461 = vmatprep.subr.bf16.mxu1 %v3660_v22  ;;  %v3085_v22 = vld [vmem:[%s4430_s21] ss:$0 sm:$0xff] }
0x21be   :  { %3462 = vmatpush3.bf16.msra.mxu1 %v3541_v27 }
0x228c   :  { %v2885_v29 = vpop.f32.mrb[76].mxu1 }
0x228d   :  { %v2886_v32 = vadd.f32 %v3081_v28, %v2885_v29  ;;  %v3457_v34 = vpop.f32.mrb[77].mxu1 }
0x228e   :  { %v2888_v35 = vpop.f32.mrb[78].mxu1 }
0x228f   :  { %3634 = vtanh.f32 %v2886_v32  ;;  %v3458_v41 = vpop.f32.mrb[79].mxu1 }
0x2299   :  { %v3635_v43 = vpop.eup %3634 }
0x229a   :  { %v2896_v44 = vpack.c.bf16 %v3635_v43, %v3635_v43 }
0x229c   :  { %3464 = vmatmul.mubr.msk.bf16.vlgmr.msra.gmra.mrb[80].mxu1 %vm106_vm0, %v2896_v44 }
0x236f   :  { %v2953_v33 = vpop.f32.mrb[80].mxu1 }
0x2370   :  { %v2954_v40 = vadd.f32 %v3085_v22, %v2953_v33  ;;  %v3465_v45 = vpop.f32.mrb[81].mxu1 }
0x2371   :  { %v2956_v49 = vpop.f32.mrb[82].mxu1 }
0x2372   :  { %v3466_v53 = vpop.f32.mrb[83].mxu1  ;;  %2960 = vst.msk [vmem:[#allocation2] sm:$0x3] %vm2959_vm10, %v2954_v40 }
0x2373   :  { %3647 = shalt.err (!%p3644_p4)
}
0x2374   :  { %s3648_s21 = scalar_lea.hbm %s4431_s22, 32 }
0x2375   :  { %p3649_p5 = scmp.ne.s32.totalorder %s4431_s22, %s3648_s21  ;;  %p3652_p6 = scmp.lt.u32.totalorder %s3648_s21, %s4431_s22 }
0x2377   :  { %p3654_p7 = pnand %p3652_p6, %p3649_p5 }
0x2379   :  { %3657 = shalt.err (!%p3654_p7)
}
0x237a   :  { %2970 = dma.vmem_to_hbm [thread:$0]  %s2968_s28, 32, %s4431_s22, [#allocation3]  }
0x237b   :  { %3658 = dma.done.wait [#allocation3], 32  }
0x237c   :  { %3659 = vsyncadd [#allocation3], 4294967264 }
0x237d   :  { %2974 = vsyncpa [#allocation3], 1 }

</bundles_post_ra>
